<compile_context>
chip_gen: v7x
topology: tpu7x:2x2x1
jax: 0.10.0
libtpu: 0.0.40
codegen_flags: <defaults>
</compile_context>

<pallas_src>
import jax
import jax.numpy as jnp
import numpy as np
from jax.experimental import pallas as pl
from jax.experimental.pallas import tpu as pltpu

CLASS_BLOCK = 8        # classes per grid step (sublane-aligned; keeps padding waste low for C~20)
MAX_FRAME_TILE = 512   # cap for the i (anchor) and j (reduction) frame tiles; the f32 pairwise
                       # intermediate is CB*TI*TJ*4 B = 8 MiB -> safe on v7x's 64 MiB VMEM.
NEG_SCORE = -1e30      # score padding for padded frames (never ranks above a real frame)


def _round_up(x, m):
    return ((x + m - 1) // m) * m


def _ap_kernel(s_i_ref, s_j_ref, y_i_ref, y_j_ref, ap_ref, pos_ref,
               rank_acc, tp_acc, apnum_acc, pos_acc):
    """Tie-consistent pairwise AP for a block of CLASS_BLOCK classes, tiled over frames.

    grid = (class_blocks, i_tiles, j_tiles); j (comparison frames) is the reduction axis.
      s_i_ref, y_i_ref : [CB, TI] f32  scores / targets of the "anchor" frame tile
      s_j_ref, y_j_ref : [CB, TJ] f32  scores / targets of the comparison frame tile
      ap_ref, pos_ref  : [CB, 1]  f32  per-class AP / positive count (written once per class block)
      rank_acc, tp_acc : [CB, TI] f32  VMEM accumulators over j (rank / true-positive counts)
      apnum_acc/pos_acc: [CB, 1]  f32  VMEM accumulators over i (AP numerator / positives)
    """
    i = pl.program_id(1)
    j = pl.program_id(2)
    ni = pl.num_programs(1)
    nj = pl.num_programs(2)

    @pl.when(jnp.logical_and(i == 0, j == 0))
    def _():
        apnum_acc[...] = jnp.zeros_like(apnum_acc)
        pos_acc[...] = jnp.zeros_like(pos_acc)

    @pl.when(j == 0)
    def _():
        rank_acc[...] = jnp.zeros_like(rank_acc)
        tp_acc[...] = jnp.zeros_like(tp_acc)

    s_i = s_i_ref[...]                                  # [CB, TI] f32 (scores stay f32 -> no new ties)
    s_j = s_j_ref[...]                                  # [CB, TJ] f32
    y_j = y_j_ref[...]                                  # [CB, TJ] f32, exact 0/1

    # Pure-VPU pairwise reduction (no MXU, no bf16 cast): mask laid out [CB, TJ, TI] so
    # the anchor axis TI is lane-dense and the j-reduction is a cheap sublane tree-add.
    # Counts are exact integers (< 2**24) accumulated in f32.
    gf = (s_j[:, :, None] >= s_i[:, None, :]).astype(jnp.float32)   # [CB, TJ, TI]
    rank_acc[...] += jnp.sum(gf, axis=1)                            # frames ranked >= anchor
    tp_acc[...] += jnp.sum(gf * y_j[:, :, None], axis=1)            # positives ranked >= anchor

    @pl.when(j == nj - 1)
    def _():
        y_i = y_i_ref[...]                              # [CB, TI]
        # Padded anchor frames (score NEG_SCORE) have inflated rank (NEG_SCORE >= NEG_SCORE),
        # but y_i == 0 there, so they contribute nothing.  Padded comparison frames never
        # satisfy s_j >= s_i for real anchors.
        prec = tp_acc[...] / jnp.maximum(rank_acc[...], 1.0)
        apnum_acc[...] += jnp.sum(prec * y_i, axis=-1, keepdims=True)
        pos_acc[...] += jnp.sum(y_i, axis=-1, keepdims=True)

    @pl.when(jnp.logical_and(i == ni - 1, j == nj - 1))
    def _():
        pos = pos_acc[...]
        ap_ref[...] = apnum_acc[...] / jnp.maximum(pos, 1.0)
        pos_ref[...] = pos


@jax.jit
def batched_perframe_average_precision(scores_pnc, targets_pnc):
    """scores_pnc, targets_pnc: [P, N, C] (P metric problems batched together).

    Returns (per_class_AP [P, C], mean_AP [P]).
    """
    P, N, C = scores_pnc.shape
    assert N < (1 << 24), "frame count must stay < 2**24 for exact f32 rank/tp counting"
    Cp = _round_up(C, CLASS_BLOCK)

    # Frame tiling: grow both tiles up to MAX_FRAME_TILE so per-grid-step compute amortizes
    # the pipeline overhead and j-side HBM re-read traffic (~ Np^2 / TI) is minimized.
    Np0 = _round_up(N, 128)
    if Np0 <= MAX_FRAME_TILE:
        tile = Np0
        Np = Np0
    else:
        tile = MAX_FRAME_TILE
        Np = _round_up(N, MAX_FRAME_TILE)
    M = P * Cp

    # Class-major layout [P*Cp, Np].  Padded frames get a huge negative score so they never
    # rank >= a real frame; padded classes have zero positives and are excluded from the
    # per-problem mean below.
    s = jnp.full((P, Cp, Np), NEG_SCORE, jnp.float32)
    s = s.at[:, :C, :N].set(jnp.transpose(scores_pnc, (0, 2, 1)).astype(jnp.float32))
    y = jnp.zeros((P, Cp, Np), jnp.float32)
    y = y.at[:, :C, :N].set(jnp.transpose(targets_pnc, (0, 2, 1)).astype(jnp.float32))
    s = s.reshape(M, Np)
    y = y.reshape(M, Np)

    grid = (M // CLASS_BLOCK, Np // tile, Np // tile)
    ap, pos = pl.pallas_call(
        _ap_kernel,
        out_shape=(
            jax.ShapeDtypeStruct((M, 1), jnp.float32),
            jax.ShapeDtypeStruct((M, 1), jnp.float32),
        ),
        grid=grid,
        in_specs=[
            pl.BlockSpec((CLASS_BLOCK, tile), lambda c, i, j: (c, i)),   # s_i (anchor tile)
            pl.BlockSpec((CLASS_BLOCK, tile), lambda c, i, j: (c, j)),   # s_j (comparison tile)
            pl.BlockSpec((CLASS_BLOCK, tile), lambda c, i, j: (c, i)),   # y_i
            pl.BlockSpec((CLASS_BLOCK, tile), lambda c, i, j: (c, j)),   # y_j
        ],
        out_specs=(
            pl.BlockSpec((CLASS_BLOCK, 1), lambda c, i, j: (c, 0)),
            pl.BlockSpec((CLASS_BLOCK, 1), lambda c, i, j: (c, 0)),
        ),
        scratch_shapes=[
            pltpu.VMEM((CLASS_BLOCK, tile), jnp.float32),   # rank accumulator
            pltpu.VMEM((CLASS_BLOCK, tile), jnp.float32),   # true-positive accumulator
            pltpu.VMEM((CLASS_BLOCK, 1), jnp.float32),      # AP numerator
            pltpu.VMEM((CLASS_BLOCK, 1), jnp.float32),      # positive count
        ],
        compiler_params=pltpu.CompilerParams(
            dimension_semantics=("parallel", "arbitrary", "arbitrary"),
            # <= ~48 MiB: large enough for the 8 MiB pairwise intermediate + buffers on
            # v5e/v6e (128 MiB) while leaving headroom on v7x (64 MiB physical).
            vmem_limit_bytes=48 * 1024 * 1024,
        ),
    )(s, s, y, y)

    ap = ap.reshape(P, Cp)[:, :C]
    pos = pos.reshape(P, Cp)[:, :C]
    valid = pos > 0.0
    n_valid = jnp.sum(valid.astype(jnp.float32), axis=1)
    mean_ap = jnp.where(
        n_valid > 0.0,
        jnp.sum(jnp.where(valid, ap, 0.0), axis=1) / jnp.maximum(n_valid, 1.0),
        jnp.float32(0.0),
    )
    return ap, mean_ap


class ANTEvaluatePallas:
    """JAX/Pallas equivalent of ANT_Evaluate's forward-pass (evaluation) semantics."""

    def __init__(self, cfg):
        self.metric = cfg.get("metric", "AP")
        self.all_class_names = cfg["class_names"]
        # TODO(synk): thumos_postprocessing / 'cAP' calibrated variant not implemented.

    def __call__(self, pred_scores, gt_targets, ant_pred_scores, ant_gt_targets):
        # pred_scores / gt_targets         : [N, C]
        # ant_pred_scores / ant_gt_targets : [N, S, C]
        S = ant_gt_targets.shape[1]

        # Batch OAD + all S anticipation steps into ONE pallas_call: [S+1, N, C].
        scores_pnc = jnp.concatenate(
            [pred_scores[None], jnp.transpose(ant_pred_scores, (1, 0, 2))], axis=0)
        targets_pnc = jnp.concatenate(
            [gt_targets[None], jnp.transpose(ant_gt_targets, (1, 0, 2))], axis=0)
        ap, mean_ap = batched_perframe_average_precision(scores_pnc, targets_pnc)

        result = {"OAD": {"per_class_AP": ap[0], "mean_AP": mean_ap[0]}}
        for step in range(S):
            result[f"anticipation_{step + 1}"] = {
                "per_class_AP": ap[step + 1],
                "mean_AP": mean_ap[step + 1],
            }
        mean_ant_map = jnp.mean(mean_ap[1:])
        result["mean_anticipation_mAP"] = mean_ant_map
        return mean_ant_map, result


# -------------------- reference (numpy, sort-based) for a sanity check --------------------
def _ref_ap_single(scores, targets):
    order = np.argsort(-scores, kind="stable")
    y = targets[order]
    tp = np.cumsum(y)
    rank = np.arange(1, len(y) + 1, dtype=np.float64)
    prec = tp / rank
    P = y.sum()
    return float((prec * y).sum() / P) if P > 0 else 0.0


def _ref_mean_ap(scores_nc, targets_nc):
    aps = []
    for c in range(scores_nc.shape[1]):
        if targets_nc[:, c].sum() > 0:
            aps.append(_ref_ap_single(np.asarray(scores_nc[:, c]), np.asarray(targets_nc[:, c])))
    return float(np.mean(aps)) if aps else 0.0


if __name__ == "__main__":
    key = jax.random.PRNGKey(0)
    N, S, C = 128, 4, 8  # frames, anticipation steps, classes

    k1, k2, k3, k4 = jax.random.split(key, 4)

    # Synthetic "model outputs" (logits) and one-hot targets, deterministic.
    pred_scores = jax.random.normal(k1, (N, C), dtype=jnp.float32)
    gt_labels = jax.random.randint(k2, (N,), 0, C)
    gt_targets = jax.nn.one_hot(gt_labels, C, dtype=jnp.float32)

    ant_pred_scores = jax.random.normal(k3, (N, S, C), dtype=jnp.float32)
    ant_labels = jax.random.randint(k4, (N, S), 0, C)
    ant_gt_targets = jax.nn.one_hot(ant_labels, C, dtype=jnp.float32)

    cfg = {"metric": "AP", "class_names": [f"class_{i}" for i in range(C)]}
    evaluator = ANTEvaluatePallas(cfg)

    mean_ant_map, result = evaluator(pred_scores, gt_targets, ant_pred_scores, ant_gt_targets)
    mean_ant_map = jax.block_until_ready(mean_ant_map)

    # sanity check against numpy sort-based AP (scores are f32 with no ties)
    ref_oad = _ref_mean_ap(np.asarray(pred_scores), np.asarray(gt_targets))
    ref_ant = np.mean(
        [
            _ref_mean_ap(np.asarray(ant_pred_scores[:, s, :]), np.asarray(ant_gt_targets[:, s, :]))
            for s in range(S)
        ]
    )
    assert abs(float(result["OAD"]["mean_AP"]) - ref_oad) < 1e-4, (
        float(result["OAD"]["mean_AP"]), ref_oad)
    assert abs(float(mean_ant_map) - ref_ant) < 1e-4, (float(mean_ant_map), ref_ant)

    print("KERNEL_OK")
</pallas_src>

<mosaic_0001>
module attributes {stable_mosaic.version = 11 : i64} {
  func.func @_ap_kernel(%arg0: i32, %arg1: i32, %arg2: i32, %arg3: memref<8x128xf32, #tpu.memory_space<vmem>>, %arg4: memref<8x128xf32, #tpu.memory_space<vmem>>, %arg5: memref<8x128xf32, #tpu.memory_space<vmem>>, %arg6: memref<8x128xf32, #tpu.memory_space<vmem>>, %arg7: memref<8x1xf32, #tpu.memory_space<vmem>>, %arg8: memref<8x1xf32, #tpu.memory_space<vmem>>, %arg9: memref<8x128xf32, #tpu.memory_space<vmem>>, %arg10: memref<8x128xf32, #tpu.memory_space<vmem>>, %arg11: memref<8x1xf32, #tpu.memory_space<vmem>>, %arg12: memref<8x1xf32, #tpu.memory_space<vmem>>) attributes {dimension_semantics = [#tpu.dimension_semantics<parallel>, #tpu.dimension_semantics<arbitrary>, #tpu.dimension_semantics<arbitrary>], iteration_bounds = array<i64: 5, 1, 1>, scalar_prefetch = 0 : i64, scratch_operands = 4 : i64, tpu.core_type = #tpu.core_type<tc>, window_params = [{transform_indices = @transform_0, window_bounds = array<i64: 8, 128>}, {transform_indices = @transform_1, window_bounds = array<i64: 8, 128>}, {transform_indices = @transform_2, window_bounds = array<i64: 8, 128>}, {transform_indices = @transform_3, window_bounds = array<i64: 8, 128>}, {transform_indices = @transform_4, window_bounds = array<i64: 8, 1>}, {transform_indices = @transform_5, window_bounds = array<i64: 8, 1>}]} {
    %c0_i32 = arith.constant 0 : i32
    %0 = arith.cmpi eq, %arg1, %c0_i32 : i32
    %c0_i32_0 = arith.constant 0 : i32
    %1 = arith.cmpi eq, %arg2, %c0_i32_0 : i32
    %2 = arith.andi %0, %1 : i1
    %3 = arith.extui %2 : i1 to i32
    %c0_i32_1 = arith.constant 0 : i32
    %4 = arith.cmpi ne, %3, %c0_i32_1 : i32
    scf.if %4 {
      %cst_23 = arith.constant 0.000000e+00 : f32
      %37 = vector.broadcast %cst_23 : f32 to vector<8x1xf32>
      %c0_24 = arith.constant 0 : index
      %c0_25 = arith.constant 0 : index
      %38 = vector.load %arg11[%c0_24, %c0_25] : memref<8x1xf32, #tpu.memory_space<vmem>>, vector<8x1xf32>
      tpu.vector_store %arg11[%c0_24, %c0_25], %37 {strides = array<i32>} : memref<8x1xf32, #tpu.memory_space<vmem>>, vector<8x1xf32>,
      %cst_26 = arith.constant 0.000000e+00 : f32
      %39 = vector.broadcast %cst_26 : f32 to vector<8x1xf32>
      %c0_27 = arith.constant 0 : index
      %c0_28 = arith.constant 0 : index
      %40 = vector.load %arg12[%c0_27, %c0_28] : memref<8x1xf32, #tpu.memory_space<vmem>>, vector<8x1xf32>
      tpu.vector_store %arg12[%c0_27, %c0_28], %39 {strides = array<i32>} : memref<8x1xf32, #tpu.memory_space<vmem>>, vector<8x1xf32>,
    } else {
    }
    %c0_i32_2 = arith.constant 0 : i32
    %5 = arith.cmpi eq, %arg2, %c0_i32_2 : i32
    %6 = arith.extui %5 : i1 to i32
    %c0_i32_3 = arith.constant 0 : i32
    %7 = arith.cmpi ne, %6, %c0_i32_3 : i32
    scf.if %7 {
      %cst_23 = arith.constant 0.000000e+00 : f32
      %37 = vector.broadcast %cst_23 : f32 to vector<8x128xf32>
      %c0_24 = arith.constant 0 : index
      %c0_25 = arith.constant 0 : index
      %38 = vector.load %arg9[%c0_24, %c0_25] : memref<8x128xf32, #tpu.memory_space<vmem>>, vector<8x128xf32>
      tpu.vector_store %arg9[%c0_24, %c0_25], %37 {strides = array<i32>} : memref<8x128xf32, #tpu.memory_space<vmem>>, vector<8x128xf32>,
      %cst_26 = arith.constant 0.000000e+00 : f32
      %39 = vector.broadcast %cst_26 : f32 to vector<8x128xf32>
      %c0_27 = arith.constant 0 : index
      %c0_28 = arith.constant 0 : index
      %40 = vector.load %arg10[%c0_27, %c0_28] : memref<8x128xf32, #tpu.memory_space<vmem>>, vector<8x128xf32>
      tpu.vector_store %arg10[%c0_27, %c0_28], %39 {strides = array<i32>} : memref<8x128xf32, #tpu.memory_space<vmem>>, vector<8x128xf32>,
    } else {
    }
    %c0 = arith.constant 0 : index
    %c0_4 = arith.constant 0 : index
    %8 = vector.load %arg3[%c0, %c0_4] : memref<8x128xf32, #tpu.memory_space<vmem>>, vector<8x128xf32>
    %c0_5 = arith.constant 0 : index
    %c0_6 = arith.constant 0 : index
    %9 = vector.load %arg4[%c0_5, %c0_6] : memref<8x128xf32, #tpu.memory_space<vmem>>, vector<8x128xf32>
    %c0_7 = arith.constant 0 : index
    %c0_8 = arith.constant 0 : index
    %10 = vector.load %arg6[%c0_7, %c0_8] : memref<8x128xf32, #tpu.memory_space<vmem>>, vector<8x128xf32>
    %11 = vector.shape_cast %9 : vector<8x128xf32> to vector<8x128x1xf32>
    %12 = vector.shape_cast %8 : vector<8x128xf32> to vector<8x1x128xf32>
    %13 = vector.broadcast %11 : vector<8x128x1xf32> to vector<8x128x128xf32>
    %14 = vector.broadcast %12 : vector<8x1x128xf32> to vector<8x128x128xf32>
    %15 = arith.cmpf oge, %13, %14 : vector<8x128x128xf32>
    %16 = arith.extui %15 : vector<8x128x128xi1> to vector<8x128x128xi32>
    %17 = arith.sitofp %16 : vector<8x128x128xi32> to vector<8x128x128xf32>
    %c0_9 = arith.constant 0 : index
    %c0_10 = arith.constant 0 : index
    %18 = vector.load %arg9[%c0_9, %c0_10] : memref<8x128xf32, #tpu.memory_space<vmem>>, vector<8x128xf32>
    %cst = arith.constant dense<0.000000e+00> : vector<8x128xf32>
    %19 = vector.multi_reduction <add>, %17, %cst [1] : vector<8x128x128xf32> to vector<8x128xf32>
    %20 = arith.addf %18, %19 : vector<8x128xf32>
    %c0_11 = arith.constant 0 : index
    %c0_12 = arith.constant 0 : index
    %21 = vector.load %arg9[%c0_11, %c0_12] : memref<8x128xf32, #tpu.memory_space<vmem>>, vector<8x128xf32>
    tpu.vector_store %arg9[%c0_11, %c0_12], %20 {strides = array<i32>} : memref<8x128xf32, #tpu.memory_space<vmem>>, vector<8x128xf32>,
    %c0_13 = arith.constant 0 : index
    %c0_14 = arith.constant 0 : index
    %22 = vector.load %arg10[%c0_13, %c0_14] : memref<8x128xf32, #tpu.memory_space<vmem>>, vector<8x128xf32>
    %23 = vector.shape_cast %10 : vector<8x128xf32> to vector<8x128x1xf32>
    %24 = vector.broadcast %23 : vector<8x128x1xf32> to vector<8x128x128xf32>
    %25 = arith.mulf %17, %24 : vector<8x128x128xf32>
    %cst_15 = arith.constant dense<0.000000e+00> : vector<8x128xf32>
    %26 = vector.multi_reduction <add>, %25, %cst_15 [1] : vector<8x128x128xf32> to vector<8x128xf32>
    %27 = arith.addf %22, %26 : vector<8x128xf32>
    %c0_16 = arith.constant 0 : index
    %c0_17 = arith.constant 0 : index
    %28 = vector.load %arg10[%c0_16, %c0_17] : memref<8x128xf32, #tpu.memory_space<vmem>>, vector<8x128xf32>
    tpu.vector_store %arg10[%c0_16, %c0_17], %27 {strides = array<i32>} : memref<8x128xf32, #tpu.memory_space<vmem>>, vector<8x128xf32>,
    %c0_i32_18 = arith.constant 0 : i32
    %29 = arith.cmpi eq, %arg2, %c0_i32_18 : i32
    %30 = arith.extui %29 : i1 to i32
    %c0_i32_19 = arith.constant 0 : i32
    %31 = arith.cmpi ne, %30, %c0_i32_19 : i32
    scf.if %31 {
      %c0_23 = arith.constant 0 : index
      %c0_24 = arith.constant 0 : index
      %37 = vector.load %arg5[%c0_23, %c0_24] : memref<8x128xf32, #tpu.memory_space<vmem>>, vector<8x128xf32>
      %c0_25 = arith.constant 0 : index
      %c0_26 = arith.constant 0 : index
      %38 = vector.load %arg10[%c0_25, %c0_26] : memref<8x128xf32, #tpu.memory_space<vmem>>, vector<8x128xf32>
      %c0_27 = arith.constant 0 : index
      %c0_28 = arith.constant 0 : index
      %39 = vector.load %arg9[%c0_27, %c0_28] : memref<8x128xf32, #tpu.memory_space<vmem>>, vector<8x128xf32>
      %cst_29 = arith.constant 1.000000e+00 : f32
      %40 = vector.broadcast %cst_29 : f32 to vector<8x128xf32>
      %41 = arith.maximumf %39, %40 : vector<8x128xf32>
      %42 = arith.divf %38, %41 : vector<8x128xf32>
      %c0_30 = arith.constant 0 : index
      %c0_31 = arith.constant 0 : index
      %43 = vector.load %arg11[%c0_30, %c0_31] : memref<8x1xf32, #tpu.memory_space<vmem>>, vector<8x1xf32>
      %44 = arith.mulf %42, %37 : vector<8x128xf32>
      %cst_32 = arith.constant dense<0.000000e+00> : vector<8xf32>
      %45 = vector.multi_reduction <add>, %44, %cst_32 [1] : vector<8x128xf32> to vector<8xf32>
      %46 = vector.shape_cast %45 : vector<8xf32> to vector<8x1xf32>
      %47 = arith.addf %43, %46 : vector<8x1xf32>
      %c0_33 = arith.constant 0 : index
      %c0_34 = arith.constant 0 : index
      %48 = vector.load %arg11[%c0_33, %c0_34] : memref<8x1xf32, #tpu.memory_space<vmem>>, vector<8x1xf32>
      tpu.vector_store %arg11[%c0_33, %c0_34], %47 {strides = array<i32>} : memref<8x1xf32, #tpu.memory_space<vmem>>, vector<8x1xf32>,
      %c0_35 = arith.constant 0 : index
      %c0_36 = arith.constant 0 : index
      %49 = vector.load %arg12[%c0_35, %c0_36] : memref<8x1xf32, #tpu.memory_space<vmem>>, vector<8x1xf32>
      %cst_37 = arith.constant dense<0.000000e+00> : vector<8xf32>
      %50 = vector.multi_reduction <add>, %37, %cst_37 [1] : vector<8x128xf32> to vector<8xf32>
      %51 = vector.shape_cast %50 : vector<8xf32> to vector<8x1xf32>
      %52 = arith.addf %49, %51 : vector<8x1xf32>
      %c0_38 = arith.constant 0 : index
      %c0_39 = arith.constant 0 : index
      %53 = vector.load %arg12[%c0_38, %c0_39] : memref<8x1xf32, #tpu.memory_space<vmem>>, vector<8x1xf32>
      tpu.vector_store %arg12[%c0_38, %c0_39], %52 {strides = array<i32>} : memref<8x1xf32, #tpu.memory_space<vmem>>, vector<8x1xf32>,
    } else {
    }
    %c0_i32_20 = arith.constant 0 : i32
    %32 = arith.cmpi eq, %arg1, %c0_i32_20 : i32
    %c0_i32_21 = arith.constant 0 : i32
    %33 = arith.cmpi eq, %arg2, %c0_i32_21 : i32
    %34 = arith.andi %32, %33 : i1
    %35 = arith.extui %34 : i1 to i32
    %c0_i32_22 = arith.constant 0 : i32
    %36 = arith.cmpi ne, %35, %c0_i32_22 : i32
    scf.if %36 {
      %c0_23 = arith.constant 0 : index
      %c0_24 = arith.constant 0 : index
      %37 = vector.load %arg12[%c0_23, %c0_24] : memref<8x1xf32, #tpu.memory_space<vmem>>, vector<8x1xf32>
      %c0_25 = arith.constant 0 : index
      %c0_26 = arith.constant 0 : index
      %38 = vector.load %arg11[%c0_25, %c0_26] : memref<8x1xf32, #tpu.memory_space<vmem>>, vector<8x1xf32>
      %cst_27 = arith.constant 1.000000e+00 : f32
      %39 = vector.broadcast %cst_27 : f32 to vector<8x1xf32>
      %40 = arith.maximumf %37, %39 : vector<8x1xf32>
      %41 = arith.divf %38, %40 : vector<8x1xf32>
      %c0_28 = arith.constant 0 : index
      %c0_29 = arith.constant 0 : index
      %42 = vector.load %arg7[%c0_28, %c0_29] : memref<8x1xf32, #tpu.memory_space<vmem>>, vector<8x1xf32>
      tpu.vector_store %arg7[%c0_28, %c0_29], %41 {strides = array<i32>} : memref<8x1xf32, #tpu.memory_space<vmem>>, vector<8x1xf32>,
      %c0_30 = arith.constant 0 : index
      %c0_31 = arith.constant 0 : index
      %43 = vector.load %arg8[%c0_30, %c0_31] : memref<8x1xf32, #tpu.memory_space<vmem>>, vector<8x1xf32>
      tpu.vector_store %arg8[%c0_30, %c0_31], %37 {strides = array<i32>} : memref<8x1xf32, #tpu.memory_space<vmem>>, vector<8x1xf32>,
    } else {
    }
    return
  }
  func.func @transform_0(%arg0: i32, %arg1: i32, %arg2: i32) -> (i32, i32) {
    %c0_i32 = arith.constant 0 : i32
    return %arg0, %arg1 : i32, i32
  }
  func.func @transform_1(%arg0: i32, %arg1: i32, %arg2: i32) -> (i32, i32) {
    %c0_i32 = arith.constant 0 : i32
    return %arg0, %arg2 : i32, i32
  }
  func.func @transform_2(%arg0: i32, %arg1: i32, %arg2: i32) -> (i32, i32) {
    %c0_i32 = arith.constant 0 : i32
    return %arg0, %arg1 : i32, i32
  }
  func.func @transform_3(%arg0: i32, %arg1: i32, %arg2: i32) -> (i32, i32) {
    %c0_i32 = arith.constant 0 : i32
    return %arg0, %arg2 : i32, i32
  }
  func.func @transform_4(%arg0: i32, %arg1: i32, %arg2: i32) -> (i32, i32) {
    %c0_i32 = arith.constant 0 : i32
    %c0_i32_0 = arith.constant 0 : i32
    return %arg0, %c0_i32 : i32, i32
  }
  func.func @transform_5(%arg0: i32, %arg1: i32, %arg2: i32) -> (i32, i32) {
    %c0_i32 = arith.constant 0 : i32
    %c0_i32_0 = arith.constant 0 : i32
    return %arg0, %c0_i32 : i32, i32
  }
}

</mosaic_0001>

<bundles_post_ra>
// kernel: batched_perframe_average_precision.1
= control target key start
LH: loop header
LB: loop body
LE: loop exit
PB: predicated region body
PF: predicated region fallthrough
CT: control target
= control target key end

     0   :  { %s5241_s0 = inlined_call_operand.hbm [shape: f32[40,128], index: 0, kind: input, shape index: {}, may-alias: {0,1}]   ;;  %s5242_s1 = inlined_call_operand.hbm [shape: f32[40,128], index: 1, kind: input, shape index: {}, may-alias: {0,1}]   ;;  %s5243_s2 = inlined_call_operand.hbm [shape: f32[40,128], index: 2, kind: input, shape index: {}, may-alias: {2,3}]   ;;  %s5244_s3 = inlined_call_operand.hbm [shape: f32[40,128], index: 3, kind: input, shape index: {}, may-alias: {2,3}]   ;;  %s5245_s4 = inlined_call_operand.vmem [shape: f32[40,1], index: 4, kind: output, shape index: {0}]   ;;  %s5246_s5 = inlined_call_operand.vmem [shape: f32[40,1], index: 5, kind: output, shape index: {1}]  }
   0x1   :  { %5394 = sst [smem:[#allocation152_spill]] %s5242_s1 }
   0x2   :  { %11 = vsyncpa [#allocation7], 0 }
   0x3   :  { %13 = vsyncpa [#allocation7 + $0x1], 0 }
   0x4   :  { %14 = vsyncpa [#allocation9], 0 }
   0x5   :  { %16 = vsyncpa [#allocation9 + $0x1], 0 }
   0x6   :  { %17 = vsyncpa [#allocation12], 0 }
   0x7   :  { %19 = vsyncpa [#allocation12 + $0x1], 0  ;;  %s3112_s18 = smov 0   ;;  %s3114_s19 = smov 0  }
   0x8   :  { %s3116_s20 = smov 0   ;;  %s3118_s21 = smov 0  }
   0x9   :  { %s3120_s22 = smov 0   ;;  %s3122_s23 = smov 0  }
   0xa LB: > { %s5248_s24 = sadd.s32 4294967295, %s3074_s23   ;;  %s44_s25 = sadd.s32 1, %s3070_s22  ;;  %s3074_s23 = sphi %s3122_s23, %s25_s23   ;;  %s3070_s22 = sphi %s3120_s22, %s5793_s22   ;;  %s3066_s21 = sphi %s3118_s21, %s5792_s21   ;;  %s3062_s20 = sphi %s3116_s20, %s5791_s20   ;;  %s3058_s19 = sphi %s3114_s19, %s5790_s19   ;;  %s3054_s18 = sphi %s3112_s18, %s5789_s18  }
   0xb   : > { %p46_p0 = scmp.ge.s32.totalorder %s44_s25, 5  ;;  %s53_s26 = sadd.s32 1, %s3062_s20 }
   0xc   : > { %p60_p1 = scmp.ne.s32.totalorder %s3062_s20, %s3058_s19  ;;  %p61_p2 = scmp.eq.s32.totalorder %s3074_s23, 0 }
   0xd   : > { %s5795_s25 = smov (%p46_p0, %s44_s25), 0  ;;  %p66_p4 = scmp.ne.s32.totalorder %s3058_s19, %s3054_s18 }
   0xe   : > { %5395 = sst [smem:[#allocation16_spill]] %s5795_s25  ;;  %p62_p3 = por %p61_p2, %p60_p1 }
   0xf   : > { %s48_s27 = ssub.s32 %s3070_s22, %s5795_s25  ;;  %p67_p5 = scmp.eq.s32.totalorder %s5248_s24, 0 }
  0x10   : > { %p51_p6 = scmp.eq.s32.totalorder %s48_s27, 0  ;;  %p2840_p8 = scmp.lt.s32.totalorder %s3074_s23, 5 }
  0x11   : > { %p3153_p7 = por %p67_p5, %p66_p4  ;;  %s3162_s30 = sand.u32 1, %s3062_s20  }
  0x12   : > { %s3159_s29 = scalar_select %p51_p6, %s3062_s20, %s53_s26  }
  0x13   : > { %s5396_s28 = scalar_select %p3153_p7, 1, 0 }
  0x14   : > { %s3165_s6 = sshll.u32 %s3070_s22, 7  ;;  %s3168_s7 = sshll.u32 %s3162_s30, 3 }
  0x15   : > { %p3170_p9 = pnand %p2840_p8, %p62_p3  ;;  %s245_s9 = sand.u32 1, %s3074_s23  }
  0x16   : > { %s5398_s1 = sld [smem:[#allocation152_spill]]  ;;  %s249_s13 = scalar_lea.vmem [#allocation8], %s3168_s7 }
  0x17   : > { %s5397_s8 = scalar_select %p3170_p9, 1, 0 }
  0x18   : > { %s257_s14 = sshll.u32 %s249_s13, 4  ;;  %s3185_s15 = scalar_lea.sflag [#allocation9], %s245_s9  ;;  %s3182_s14 = int_to_ptr.vmem [resolvable:$true] %s257_s14 }
  0x19   : > { %p3191_p12 = pneg %p3170_p9 }
  0x1c   : > { %s3179_s12 = scalar_lea.hbm %s5398_s1, %s3165_s6  ;;  %s2901_s27 = scalar_lea.hbm %s5398_s1, 640 }
  0x1d   : > { %s2896_s16 = scalar_lea.hbm %s3179_s12, 128  ;;  %p2902_p1 = scmp.lt.u32.totalorder %s3179_s12, %s5398_s1 }
  0x1e   : > { %p2897_p11 = scmp.ne.s32.totalorder %s3179_s12, %s2896_s16  ;;  %p2903_p2 = scmp.lt.u32.totalorder %s2901_s27, %s2896_s16 }
  0x1f   : > { %p2905_p4 = scmp.lt.u32.totalorder %s2896_s16, %s3179_s12 }
  0x20   : > { %p2899_p13 = pnand %p3191_p12, %p2897_p11  ;;  %p2904_p3 = por %p2903_p2, %p2902_p1 }
  0x22   : > { %p2900_p0 = pneg %p2899_p13  ;;  %p2906_p5 = por %p2905_p4, %p2904_p3 }
  0x24   : > { %p2907_p6 = pnand %p2906_p5, %p2900_p0 }
  0x26   : > { %2910 = shalt.err (!%p2907_p6)
}
  0x27   : > { %s2911_s9 = scalar_lea.vmem %s3182_s14, 128  ;;  %s3076_s13 = smov [#allocation8]  }
  0x28   : > { %p2912_p8 = scmp.ne.s32.totalorder %s3182_s14, %s2911_s9  ;;  %s2916_s18 = sshll.u32 %s3076_s13, 4  ;;  %s2917_s18 = int_to_ptr.vmem [resolvable:$false] %s2916_s18 }
  0x29   : > { %s2918_s26 = scalar_lea.vmem %s2917_s18, 256  ;;  %p2919_p10 = scmp.lt.s32.totalorder %s3182_s14, %s2917_s18 }
  0x2a   : > { %p2914_p11 = pnand %p2912_p8, %p3191_p12  ;;  %p2920_p7 = scmp.lt.s32.totalorder %s2918_s26, %s2911_s9 }
  0x2c   : > { %p2915_p13 = pneg %p2914_p11  ;;  %p2921_p1 = por %p2920_p7, %p2919_p10 }
  0x2e   : > { %p2922_p2 = pnand %p2921_p1, %p2915_p13 }
  0x30   : > { %2925 = shalt.err (!%p2922_p2)
}
  0x31   : > { %2833 = dma.hbm_to_vmem [thread:$0]  (!%p3170_p9), %s3179_s12, 128, %s3182_s14, %s3185_s15  }
  0x32   : > { %p300_p0 = scmp.lt.s32.totalorder %s3074_s23, 6  ;;  %p5400_p3 = scmp.ge.s32.totalorder %s3074_s23, 1 }
  0x33   : > { %s3226_s11 = scalar_lea.hbm %s5241_s0, %s3165_s6  ;;  %s230_s9 = scalar_lea.vmem [#allocation6], %s3168_s7 }
  0x34   : > { %p3218_p4 = pnand %p5400_p3, %p300_p0  ;;  %s238_s13 = sshll.u32 %s230_s9, 4  ;;  %s239_s13 = int_to_ptr.vmem [resolvable:$true] %s238_s13 }
  0x35   : > { %s227_s18 = scalar_lea.sflag [#allocation7], %s3162_s30  ;;  %s2926_s12 = scalar_lea.hbm %s3226_s11, 128 }
  0x36   : > { %s5401_s16 = scalar_select %p3218_p4, 1, 0 }
  0x37   : > { %p2927_p7 = scmp.ne.s32.totalorder %s3226_s11, %s2926_s12  ;;  %s2931_s24 = scalar_lea.hbm %s5241_s0, 640 }
  0x38   : > { %p2932_p6 = scmp.lt.u32.totalorder %s3226_s11, %s5241_s0  ;;  %p2933_p8 = scmp.lt.u32.totalorder %s2931_s24, %s2926_s12 }
  0x39   : > { %p2929_p10 = pnand %p2927_p7, %p3191_p12  ;;  %p2935_p13 = scmp.lt.u32.totalorder %s2926_s12, %s3226_s11 }
  0x3a   : > { %p2934_p11 = por %p2933_p8, %p2932_p6 }
  0x3b   : > { %p2930_p5 = pneg %p2929_p10 }
  0x3c   : > { %p2936_p1 = por %p2935_p13, %p2934_p11 }
  0x3e   : > { %p2937_p2 = pnand %p2936_p1, %p2930_p5 }
  0x40   : > { %2940 = shalt.err (!%p2937_p2)
}
  0x41   : > { %s2941_s9 = scalar_lea.vmem %s239_s13, 128  ;;  %s3077_s1 = smov [#allocation6]  }
  0x42   : > { %p2942_p0 = scmp.ne.s32.totalorder %s239_s13, %s2941_s9  ;;  %s2946_s25 = sshll.u32 %s3077_s1, 4  ;;  %s2947_s25 = int_to_ptr.vmem [resolvable:$false] %s2946_s25 }
  0x43   : > { %s2948_s14 = scalar_lea.vmem %s2947_s25, 256  ;;  %p2949_p10 = scmp.lt.s32.totalorder %s239_s13, %s2947_s25 }
  0x44   : > { %p2944_p3 = pnand %p2942_p0, %p3191_p12  ;;  %p2950_p4 = scmp.lt.s32.totalorder %s2948_s14, %s2941_s9 }
  0x46   : > { %p2945_p7 = pneg %p2944_p3  ;;  %p2951_p9 = por %p2950_p4, %p2949_p10 }
  0x48   : > { %p2952_p6 = pnand %p2951_p9, %p2945_p7 }
  0x4a   : > { %2955 = shalt.err (!%p2952_p6)
}
  0x4b   : > { %p5402_p8 = scmp.ne.s32.totalorder %s5397_s8, 0  ;;  %s3251_s26 = scalar_lea.hbm %s5243_s2, %s3165_s6 }
  0x4c   : > { %s268_s1 = scalar_lea.vmem [#allocation10], %s3168_s7  ;;  %s2956_s27 = scalar_lea.hbm %s3251_s26, 128 }
  0x4d   : > { %2830 = dma.hbm_to_vmem [thread:$0]  (!%p5402_p8), %s3226_s11, 128, %s239_s13, %s227_s18  }
  0x4e   : > { %s276_s25 = sshll.u32 %s268_s1, 4  ;;  %p2957_p9 = scmp.ne.s32.totalorder %s3251_s26, %s2956_s27  ;;  %s277_s25 = int_to_ptr.vmem [resolvable:$true] %s276_s25 }
  0x4f   : > { %s2961_s11 = scalar_lea.hbm %s5243_s2, 640  ;;  %p2962_p11 = scmp.lt.u32.totalorder %s3251_s26, %s5243_s2 }
  0x50   : > { %p2959_p4 = pnand %p2957_p9, %p3191_p12  ;;  %p2963_p13 = scmp.lt.u32.totalorder %s2961_s11, %s2956_s27 }
  0x51   : > { %p2965_p2 = scmp.lt.u32.totalorder %s2956_s27, %s3251_s26 }
  0x52   : > { %p2960_p5 = pneg %p2959_p4  ;;  %p2964_p1 = por %p2963_p13, %p2962_p11 }
  0x54   : > { %p2966_p0 = por %p2965_p2, %p2964_p1 }
  0x56   : > { %p2967_p3 = pnand %p2966_p0, %p2960_p5 }
  0x58   : > { %2970 = shalt.err (!%p2967_p3)
}
  0x59   : > { %s2971_s14 = scalar_lea.vmem %s277_s25, 128  ;;  %s3078_s24 = smov [#allocation10]  }
  0x5a   : > { %p2972_p7 = scmp.ne.s32.totalorder %s277_s25, %s2971_s14  ;;  %s2976_s12 = sshll.u32 %s3078_s24, 4  ;;  %s2977_s12 = int_to_ptr.vmem [resolvable:$false] %s2976_s12 }
  0x5b   : > { %s2978_s1 = scalar_lea.vmem %s2977_s12, 256  ;;  %p2979_p9 = scmp.lt.s32.totalorder %s277_s25, %s2977_s12 }
  0x5c   : > { %p2974_p10 = pnand %p2972_p7, %p3191_p12  ;;  %p2980_p4 = scmp.lt.s32.totalorder %s2978_s1, %s2971_s14 }
  0x5e   : > { %p2975_p6 = pneg %p2974_p10  ;;  %p2981_p8 = por %p2980_p4, %p2979_p9 }
  0x60   : > { %p2982_p11 = pnand %p2981_p8, %p2975_p6 }
  0x62   : > { %2985 = shalt.err (!%p2982_p11)
}
  0x63   : > { %p5403_p13 = scmp.ne.s32.totalorder %s5397_s8, 0  ;;  %s3276_s9 = scalar_lea.hbm %s5244_s3, %s3165_s6 }
  0x64   : > { %s287_s11 = scalar_lea.vmem [#allocation11], %s3168_s7  ;;  %s284_s18 = scalar_lea.sflag [#allocation12], %s3162_s30 }
  0x65   : > { %2836 = dma.hbm_to_vmem [thread:$0]  (!%p5403_p13), %s3251_s26, 128, %s277_s25, %s3185_s15  }
  0x66   : > { %s295_s13 = sshll.u32 %s287_s11, 4  ;;  %s2986_s14 = scalar_lea.hbm %s3276_s9, 128  ;;  %s296_s13 = int_to_ptr.vmem [resolvable:$true] %s295_s13 }
  0x67   : > { %p2987_p8 = scmp.ne.s32.totalorder %s3276_s9, %s2986_s14  ;;  %s2991_s26 = scalar_lea.hbm %s5244_s3, 640 }
  0x68   : > { %p2992_p2 = scmp.lt.u32.totalorder %s3276_s9, %s5244_s3  ;;  %p2993_p0 = scmp.lt.u32.totalorder %s2991_s26, %s2986_s14 }
  0x69   : > { %p2989_p5 = pnand %p2987_p8, %p3191_p12  ;;  %p2995_p7 = scmp.lt.u32.totalorder %s2986_s14, %s3276_s9 }
  0x6a   : > { %p2994_p3 = por %p2993_p0, %p2992_p2 }
  0x6b   : > { %p2990_p1 = pneg %p2989_p5 }
  0x6c   : > { %p2996_p10 = por %p2995_p7, %p2994_p3 }
  0x6e   : > { %p2997_p6 = pnand %p2996_p10, %p2990_p1 }
  0x70   : > { %3000 = shalt.err (!%p2997_p6)
}
  0x71   : > { %s3001_s30 = scalar_lea.vmem %s296_s13, 128  ;;  %s3079_s7 = smov [#allocation11]  }
  0x72   : > { %p3002_p9 = scmp.ne.s32.totalorder %s296_s13, %s3001_s30  ;;  %s3006_s12 = sshll.u32 %s3079_s7, 4  ;;  %s3007_s12 = int_to_ptr.vmem [resolvable:$false] %s3006_s12 }
  0x73   : > { %s3008_s1 = scalar_lea.vmem %s3007_s12, 256  ;;  %p3009_p8 = scmp.lt.s32.totalorder %s296_s13, %s3007_s12 }
  0x74   : > { %p3004_p4 = pnand %p3002_p9, %p3191_p12  ;;  %p3010_p5 = scmp.lt.s32.totalorder %s3008_s1, %s3001_s30 }
  0x76   : > { %p3005_p11 = pneg %p3004_p4  ;;  %p3011_p13 = por %p3010_p5, %p3009_p8 }
  0x78   : > { %p3012_p0 = pnand %p3011_p13, %p3005_p11 }
  0x7a   : > { %3015 = shalt.err (!%p3012_p0)
}
  0x7b   : > { %p5404_p2 = scmp.ne.s32.totalorder %s5397_s8, 0  ;;  %p5405_p1 = scmp.ne.s32.totalorder %s5401_s16, 0 }
  0x7d   : > { %2839 = dma.hbm_to_vmem [thread:$0]  (!%p5404_p2), %s3276_s9, 128, %s296_s13, %s284_s18  }
  0x7e   : > { %304 = sbr.rel (%p5405_p1) target bundleno = 952 (0x3b8), region = 36 }
  0x85   : > { %s306_s17 = sand.u32 1, %s3058_s19   ;;  %p5406_p12 = scmp.ne.s32.totalorder %s5396_s28, 0 }
  0x86   : > { %s3300_s27 = sshll.u32 %s306_s17, 3  ;;  %s307_s10 = scalar_lea.sflag [#allocation7], %s306_s17 }
  0x87   : > { %s310_s11 = scalar_lea.vmem [#allocation6], %s3300_s27 }
  0x88   : > { %3041 = dma.done.wait (%p5406_p12), %s307_s10, 128  }
  0x89   : > { %3043 = vsyncadd (%p5406_p12), %s307_s10, 4294967168  ;;  %s5407_s8 = sadd.s32 4294967295, %s3074_s23   ;;  %s319_s13 = scalar_lea.vmem [#allocation8], %s3300_s27 }
  0x8a   : > { %s315_s9 = sand.u32 1, %s5407_s8  }
  0x8b   : > { %s316_s16 = scalar_lea.sflag [#allocation9], %s315_s9 }
  0x8c   : > { %3045 = dma.done.wait (%p5406_p12), %s316_s16, 256  }
  0x8d   : > { %3047 = vsyncadd (%p5406_p12), %s316_s16, 4294967040  ;;  %s328_s18 = scalar_lea.vmem [#allocation10], %s3300_s27  ;;  %s334_s14 = scalar_lea.sflag [#allocation12], %s306_s17 }
  0x8e   : > { %s337_s24 = scalar_lea.vmem [#allocation11], %s3300_s27 }
  0x8f   : > { %3049 = dma.done.wait (%p5406_p12), %s334_s14, 128  }
  0x90   : > { %3051 = vsyncadd (%p5406_p12), %s334_s14, 4294967168  ;;  %v407_v0 = vlaneseq  ;;  %v3325_v3 = vld [vmem:[%s319_s13] sm:$0xff]  ;;  %p382_p13 = scmp.lt.s32.totalorder %s3066_s21, 4 }
  0x92   : > { %v3320_v1 = vshrl.u32 %v407_v0, 7  ;;  %s5797_s21 = smov (!%p382_p13, %s3066_s21), 4 }
  0x93   : > { %s2687_s28 = sshll.u32 %s5797_s21, 3 }
  0x94   : > { %v3323_v2 = vsub.s32 0, %v3320_v1  ;;  %v5257_v5 = vsub.s32 1, %v3320_v1  ;;  %v5256_v7 = vsub.s32 2, %v3320_v1  ;;  %v5255_v9 = vsub.s32 3, %v3320_v1  ;;  %s389_s25 = scalar_lea.vmem %s5246_s5, %s2687_s28  ;;  %s385_s7 = scalar_lea.vmem %s5245_s4, %s2687_s28 }
  0x95   : > { %v5254_v15 = vsub.s32 4, %v3320_v1  ;;  %v5253_v33 = vsub.s32 5, %v3320_v1  ;;  %v5252_v51 = vsub.s32 6, %v3320_v1 }
  0x96   : > { %v410_v4 = vrot.slane %v3325_v3, %v3323_v2  ;;  %v477_v6 = vrot.slane %v3325_v3, %v5257_v5  ;;  %v544_v8 = vrot.slane %v3325_v3, %v5256_v7  ;;  %v611_v10 = vrot.slane %v3325_v3, %v5255_v9 }
  0x97   : > { %v678_v18 = vrot.slane %v3325_v3, %v5254_v15  ;;  %v745_v36 = vrot.slane %v3325_v3, %v5253_v33  ;;  %v812_v54 = vrot.slane %v3325_v3, %v5252_v51 }
  0x98   : > { %420 = vbcast.lane.b32.xlu1 %v410_v4, 272  ;;  %412 = vbcast.lane.b32.xlu0 %v410_v4, 256 }
  0x9c   : > { %424 = vbcast.lane.b32.xlu1 %v410_v4, 280  ;;  %416 = vbcast.lane.b32.xlu0 %v410_v4, 264 }
  0xa0   : > { %432 = vbcast.lane.b32.xlu1 %v410_v4, 296  ;;  %428 = vbcast.lane.b32.xlu0 %v410_v4, 288 }
  0xa4   : > { %440 = vbcast.lane.b32.xlu1 %v410_v4, 312  ;;  %436 = vbcast.lane.b32.xlu0 %v410_v4, 304 }
  0xa8   : > { %448 = vbcast.lane.b32.xlu1 %v410_v4, 328  ;;  %444 = vbcast.lane.b32.xlu0 %v410_v4, 320 }
  0xac   : > { %456 = vbcast.lane.b32.xlu1 %v410_v4, 344  ;;  %452 = vbcast.lane.b32.xlu0 %v410_v4, 336 }
  0xb0   : > { %464 = vbcast.lane.b32.xlu1 %v410_v4, 360  ;;  %460 = vbcast.lane.b32.xlu0 %v410_v4, 352 }
  0xb4   : > { %472 = vbcast.lane.b32.xlu1 %v410_v4, 376  ;;  %468 = vbcast.lane.b32.xlu0 %v410_v4, 368 }
  0xb8   : > { %483 = vbcast.lane.b32.xlu1 %v477_v6, 264  ;;  %479 = vbcast.lane.b32.xlu0 %v477_v6, 256 }
  0xbc   : > { %491 = vbcast.lane.b32.xlu1 %v477_v6, 280  ;;  %487 = vbcast.lane.b32.xlu0 %v477_v6, 272 }
  0xc0   : > { %499 = vbcast.lane.b32.xlu1 %v477_v6, 296  ;;  %495 = vbcast.lane.b32.xlu0 %v477_v6, 288 }
  0xc4   : > { %507 = vbcast.lane.b32.xlu1 %v477_v6, 312  ;;  %503 = vbcast.lane.b32.xlu0 %v477_v6, 304 }
  0xc8   : > { %515 = vbcast.lane.b32.xlu1 %v477_v6, 328  ;;  %511 = vbcast.lane.b32.xlu0 %v477_v6, 320 }
  0xcc   : > { %523 = vbcast.lane.b32.xlu1 %v477_v6, 344  ;;  %519 = vbcast.lane.b32.xlu0 %v477_v6, 336 }
  0xd0   : > { %531 = vbcast.lane.b32.xlu1 %v477_v6, 360  ;;  %527 = vbcast.lane.b32.xlu0 %v477_v6, 352 }
  0xd4   : > { %539 = vbcast.lane.b32.xlu1 %v477_v6, 376  ;;  %535 = vbcast.lane.b32.xlu0 %v477_v6, 368 }
  0xd8   : > { %550 = vbcast.lane.b32.xlu1 %v544_v8, 264  ;;  %546 = vbcast.lane.b32.xlu0 %v544_v8, 256 }
  0xdc   : > { %558 = vbcast.lane.b32.xlu1 %v544_v8, 280  ;;  %554 = vbcast.lane.b32.xlu0 %v544_v8, 272 }
  0xe0   : > { %566 = vbcast.lane.b32.xlu1 %v544_v8, 296  ;;  %562 = vbcast.lane.b32.xlu0 %v544_v8, 288 }
  0xe4   : > { %574 = vbcast.lane.b32.xlu1 %v544_v8, 312  ;;  %570 = vbcast.lane.b32.xlu0 %v544_v8, 304 }
  0xe8   : > { %582 = vbcast.lane.b32.xlu1 %v544_v8, 328  ;;  %578 = vbcast.lane.b32.xlu0 %v544_v8, 320 }
  0xec   : > { %590 = vbcast.lane.b32.xlu1 %v544_v8, 344  ;;  %586 = vbcast.lane.b32.xlu0 %v544_v8, 336 }
  0xf0   : > { %598 = vbcast.lane.b32.xlu1 %v544_v8, 360  ;;  %594 = vbcast.lane.b32.xlu0 %v544_v8, 352 }
  0xf4   : > { %606 = vbcast.lane.b32.xlu1 %v544_v8, 376  ;;  %602 = vbcast.lane.b32.xlu0 %v544_v8, 368 }
  0xf8   : > { %617 = vbcast.lane.b32.xlu1 %v611_v10, 264  ;;  %613 = vbcast.lane.b32.xlu0 %v611_v10, 256 }
  0xfc   : > { %625 = vbcast.lane.b32.xlu1 %v611_v10, 280  ;;  %621 = vbcast.lane.b32.xlu0 %v611_v10, 272 }
 0x100   : > { %633 = vbcast.lane.b32.xlu1 %v611_v10, 296  ;;  %629 = vbcast.lane.b32.xlu0 %v611_v10, 288 }
 0x104   : > { %641 = vbcast.lane.b32.xlu1 %v611_v10, 312  ;;  %637 = vbcast.lane.b32.xlu0 %v611_v10, 304 }
 0x108   : > { %649 = vbcast.lane.b32.xlu1 %v611_v10, 328  ;;  %645 = vbcast.lane.b32.xlu0 %v611_v10, 320 }
 0x10a   : > { %v3341_v11 = vpop.permute.xlu1 %420  ;;  %v3343_v12 = vpop.permute.xlu0 %412 }
 0x10c   : > { %657 = vbcast.lane.b32.xlu1 %v611_v10, 344  ;;  %653 = vbcast.lane.b32.xlu0 %v611_v10, 336 }
 0x10e   : > { %v3345_v13 = vpop.permute.xlu1 %424  ;;  %v3347_v14 = vpop.permute.xlu0 %416 }
 0x110   : > { %665 = vbcast.lane.b32.xlu1 %v611_v10, 360  ;;  %661 = vbcast.lane.b32.xlu0 %v611_v10, 352 }
 0x112   : > { %v3350_v16 = vpop.permute.xlu1 %432  ;;  %v3352_v17 = vpop.permute.xlu0 %428 }
 0x114   : > { %673 = vbcast.lane.b32.xlu1 %v611_v10, 376  ;;  %669 = vbcast.lane.b32.xlu0 %v611_v10, 368 }
 0x116   : > { %v3357_v19 = vpop.permute.xlu1 %440  ;;  %v3359_v20 = vpop.permute.xlu0 %436 }
 0x118   : > { %684 = vbcast.lane.b32.xlu1 %v678_v18, 264  ;;  %680 = vbcast.lane.b32.xlu0 %v678_v18, 256 }
 0x11a   : > { %v3361_v21 = vpop.permute.xlu1 %448  ;;  %v3363_v22 = vpop.permute.xlu0 %444 }
 0x11c   : > { %692 = vbcast.lane.b32.xlu1 %v678_v18, 280  ;;  %688 = vbcast.lane.b32.xlu0 %v678_v18, 272 }
 0x11e   : > { %v3365_v23 = vpop.permute.xlu1 %456  ;;  %v3367_v24 = vpop.permute.xlu0 %452 }
 0x11f   : > { %5408 = vst [vmem:[#allocation17_spill] sm:$0xff] %v3365_v23 }
 0x120   : > { %700 = vbcast.lane.b32.xlu1 %v678_v18, 296  ;;  %696 = vbcast.lane.b32.xlu0 %v678_v18, 288 }
 0x122   : > { %v3369_v25 = vpop.permute.xlu1 %464  ;;  %v3371_v26 = vpop.permute.xlu0 %460 }
 0x123   : > { %5409 = vst [vmem:[#allocation18_spill] sm:$0xff] %v3369_v25  ;;  %5410 = vst [vmem:[#allocation19_spill] sm:$0xff] %v3371_v26  ;;  %v5489_v25 = vsub.s32 6, %v3320_v1 }
 0x124   : > { %708 = vbcast.lane.b32.xlu1 %v678_v18, 312  ;;  %704 = vbcast.lane.b32.xlu0 %v678_v18, 304 }
 0x126   : > { %v3373_v27 = vpop.permute.xlu1 %472  ;;  %v3375_v28 = vpop.permute.xlu0 %468 }
 0x127   : > { %5411 = vst [vmem:[#allocation20_spill] sm:$0xff] %v3373_v27  ;;  %5412 = vst [vmem:[#allocation21_spill] sm:$0xff] %v3375_v28 }
 0x128   : > { %716 = vbcast.lane.b32.xlu1 %v678_v18, 328  ;;  %712 = vbcast.lane.b32.xlu0 %v678_v18, 320 }
 0x12a   : > { %v3377_v29 = vpop.permute.xlu1 %483  ;;  %v3379_v30 = vpop.permute.xlu0 %479 }
 0x12c   : > { %724 = vbcast.lane.b32.xlu1 %v678_v18, 344  ;;  %720 = vbcast.lane.b32.xlu0 %v678_v18, 336 }
 0x12e   : > { %v3381_v31 = vpop.permute.xlu1 %491  ;;  %v3383_v32 = vpop.permute.xlu0 %487 }
 0x130   : > { %732 = vbcast.lane.b32.xlu1 %v678_v18, 360  ;;  %728 = vbcast.lane.b32.xlu0 %v678_v18, 352 }
 0x132   : > { %v3386_v34 = vpop.permute.xlu1 %499  ;;  %v3388_v35 = vpop.permute.xlu0 %495 }
 0x134   : > { %740 = vbcast.lane.b32.xlu1 %v678_v18, 376  ;;  %736 = vbcast.lane.b32.xlu0 %v678_v18, 368  ;;  %v5260_v18 = vsub.s32 7, %v3320_v1 }
 0x136   : > { %v3393_v37 = vpop.permute.xlu1 %507  ;;  %v3395_v38 = vpop.permute.xlu0 %503  ;;  %v879_v33 = vrot.slane %v3325_v3, %v5260_v18 }
 0x138   : > { %751 = vbcast.lane.b32.xlu1 %v745_v36, 264  ;;  %747 = vbcast.lane.b32.xlu0 %v745_v36, 256 }
 0x13a   : > { %v3397_v39 = vpop.permute.xlu1 %515  ;;  %v3399_v40 = vpop.permute.xlu0 %511 }
 0x13c   : > { %759 = vbcast.lane.b32.xlu1 %v745_v36, 280  ;;  %755 = vbcast.lane.b32.xlu0 %v745_v36, 272 }
 0x13e   : > { %v3401_v41 = vpop.permute.xlu1 %523  ;;  %v3403_v42 = vpop.permute.xlu0 %519 }
 0x13f   : > { %5413 = vst [vmem:[#allocation22_spill] sm:$0xff] %v3401_v41  ;;  %5414 = vst [vmem:[#allocation23_spill] sm:$0xff] %v3403_v42 }
 0x140   : > { %767 = vbcast.lane.b32.xlu1 %v745_v36, 296  ;;  %763 = vbcast.lane.b32.xlu0 %v745_v36, 288 }
 0x142   : > { %v3405_v43 = vpop.permute.xlu1 %531  ;;  %v3407_v44 = vpop.permute.xlu0 %527 }
 0x143   : > { %5415 = vst [vmem:[#allocation24_spill] sm:$0xff] %v3405_v43  ;;  %5416 = vst [vmem:[#allocation25_spill] sm:$0xff] %v3407_v44 }
 0x144   : > { %775 = vbcast.lane.b32.xlu1 %v745_v36, 312  ;;  %771 = vbcast.lane.b32.xlu0 %v745_v36, 304 }
 0x146   : > { %v3409_v45 = vpop.permute.xlu1 %539  ;;  %v3411_v46 = vpop.permute.xlu0 %535 }
 0x147   : > { %5417 = vst [vmem:[#allocation26_spill] sm:$0xff] %v3409_v45  ;;  %5418 = vst [vmem:[#allocation27_spill] sm:$0xff] %v3411_v46 }
 0x148   : > { %783 = vbcast.lane.b32.xlu1 %v745_v36, 328  ;;  %779 = vbcast.lane.b32.xlu0 %v745_v36, 320 }
 0x14a   : > { %v3413_v47 = vpop.permute.xlu1 %550  ;;  %v3415_v48 = vpop.permute.xlu0 %546 }
 0x14c   : > { %791 = vbcast.lane.b32.xlu1 %v745_v36, 344  ;;  %787 = vbcast.lane.b32.xlu0 %v745_v36, 336 }
 0x14e   : > { %v3417_v49 = vpop.permute.xlu1 %558  ;;  %v3419_v50 = vpop.permute.xlu0 %554 }
 0x150   : > { %799 = vbcast.lane.b32.xlu1 %v745_v36, 360  ;;  %795 = vbcast.lane.b32.xlu0 %v745_v36, 352 }
 0x152   : > { %v3422_v52 = vpop.permute.xlu1 %566  ;;  %v3424_v53 = vpop.permute.xlu0 %562 }
 0x154   : > { %807 = vbcast.lane.b32.xlu1 %v745_v36, 376  ;;  %803 = vbcast.lane.b32.xlu0 %v745_v36, 368 }
 0x156   : > { %v3429_v55 = vpop.permute.xlu1 %574  ;;  %v3431_v56 = vpop.permute.xlu0 %570 }
 0x158   : > { %818 = vbcast.lane.b32.xlu1 %v812_v54, 264  ;;  %814 = vbcast.lane.b32.xlu0 %v812_v54, 256 }
 0x15a   : > { %v3433_v57 = vpop.permute.xlu1 %582  ;;  %v3435_v58 = vpop.permute.xlu0 %578 }
 0x15b   : > { %5419 = vst [vmem:[#allocation28_spill] sm:$0xff] %v3433_v57  ;;  %5420 = vst [vmem:[#allocation29_spill] sm:$0xff] %v3435_v58 }
 0x15c   : > { %826 = vbcast.lane.b32.xlu1 %v812_v54, 280  ;;  %822 = vbcast.lane.b32.xlu0 %v812_v54, 272 }
 0x15e   : > { %v3437_v59 = vpop.permute.xlu1 %590  ;;  %v3439_v60 = vpop.permute.xlu0 %586 }
 0x15f   : > { %5421 = vst [vmem:[#allocation30_spill] sm:$0xff] %v3437_v59  ;;  %5422 = vst [vmem:[#allocation31_spill] sm:$0xff] %v3439_v60 }
 0x160   : > { %834 = vbcast.lane.b32.xlu1 %v812_v54, 296  ;;  %830 = vbcast.lane.b32.xlu0 %v812_v54, 288 }
 0x162   : > { %v3441_v61 = vpop.permute.xlu1 %598  ;;  %v3443_v62 = vpop.permute.xlu0 %594 }
 0x163   : > { %5423 = vst [vmem:[#allocation32_spill] sm:$0xff] %v3441_v61  ;;  %5424 = vst [vmem:[#allocation33_spill] sm:$0xff] %v3443_v62 }
 0x164   : > { %842 = vbcast.lane.b32.xlu1 %v812_v54, 312  ;;  %838 = vbcast.lane.b32.xlu0 %v812_v54, 304 }
 0x166   : > { %v3445_v63 = vpop.permute.xlu1 %606  ;;  %v3447_v0 = vpop.permute.xlu0 %602 }
 0x167   : > { %5425 = vst [vmem:[#allocation34_spill] sm:$0xff] %v3445_v63  ;;  %5426 = vst [vmem:[#allocation35_spill] sm:$0xff] %v3447_v0 }
 0x168   : > { %850 = vbcast.lane.b32.xlu1 %v812_v54, 328  ;;  %846 = vbcast.lane.b32.xlu0 %v812_v54, 320 }
 0x16a   : > { %v3449_v4 = vpop.permute.xlu1 %617  ;;  %v3451_v6 = vpop.permute.xlu0 %613 }
 0x16c   : > { %858 = vbcast.lane.b32.xlu1 %v812_v54, 344  ;;  %854 = vbcast.lane.b32.xlu0 %v812_v54, 336 }
 0x16e   : > { %v3453_v8 = vpop.permute.xlu1 %625  ;;  %v3455_v10 = vpop.permute.xlu0 %621 }
 0x170   : > { %866 = vbcast.lane.b32.xlu1 %v812_v54, 360  ;;  %862 = vbcast.lane.b32.xlu0 %v812_v54, 352 }
 0x172   : > { %v3458_v36 = vpop.permute.xlu1 %633  ;;  %v3460_v51 = vpop.permute.xlu0 %629 }
 0x173   : > { %5427 = vst [vmem:[#allocation36_spill] sm:$0xff] %v3458_v36  ;;  %5428 = vst [vmem:[#allocation37_spill] sm:$0xff] %v3460_v51 }
 0x174   : > { %874 = vbcast.lane.b32.xlu1 %v812_v54, 376  ;;  %870 = vbcast.lane.b32.xlu0 %v812_v54, 368 }
 0x176   : > { %v3465_v15 = vpop.permute.xlu1 %641  ;;  %v3467_v9 = vpop.permute.xlu0 %637 }
 0x177   : > { %5429 = vst [vmem:[#allocation38_spill] sm:$0xff] %v3465_v15  ;;  %5430 = vst [vmem:[#allocation39_spill] sm:$0xff] %v3467_v9 }
 0x178   : > { %885 = vbcast.lane.b32.xlu1 %v879_v33, 264  ;;  %881 = vbcast.lane.b32.xlu0 %v879_v33, 256 }
 0x17a   : > { %v3469_v7 = vpop.permute.xlu1 %649  ;;  %v3471_v5 = vpop.permute.xlu0 %645 }
 0x17b   : > { %5431 = vst [vmem:[#allocation40_spill] sm:$0xff] %v3469_v7  ;;  %5432 = vst [vmem:[#allocation41_spill] sm:$0xff] %v3471_v5 }
 0x17c   : > { %893 = vbcast.lane.b32.xlu1 %v879_v33, 280  ;;  %889 = vbcast.lane.b32.xlu0 %v879_v33, 272 }
 0x17e   : > { %v3473_v63 = vpop.permute.xlu1 %657  ;;  %v3475_v0 = vpop.permute.xlu0 %653 }
 0x17f   : > { %5433 = vst [vmem:[#allocation42_spill] sm:$0xff] %v3473_v63  ;;  %5434 = vst [vmem:[#allocation43_spill] sm:$0xff] %v3475_v0 }
 0x180   : > { %901 = vbcast.lane.b32.xlu1 %v879_v33, 296  ;;  %897 = vbcast.lane.b32.xlu0 %v879_v33, 288 }
 0x182   : > { %v3477_v54 = vpop.permute.xlu1 %665  ;;  %v3479_v3 = vpop.permute.xlu0 %661 }
 0x183   : > { %5435 = vst [vmem:[#allocation44_spill] sm:$0xff] %v3477_v54  ;;  %5436 = vst [vmem:[#allocation45_spill] sm:$0xff] %v3479_v3  ;;  %v3495_v3 = vld [vmem:[%s337_s24] sm:$0xff] }
 0x184   : > { %909 = vbcast.lane.b32.xlu1 %v879_v33, 312  ;;  %905 = vbcast.lane.b32.xlu0 %v879_v33, 304  ;;  %v1615_v5 = vrot.slane %v3495_v3, %v3323_v2 }
 0x186   : > { %v3481_v18 = vpop.permute.xlu1 %673  ;;  %v3483_v7 = vpop.permute.xlu0 %669 }
 0x187   : > { %5437 = vst [vmem:[#allocation46_spill] sm:$0xff] %v3481_v18  ;;  %5438 = vst [vmem:[#allocation47_spill] sm:$0xff] %v3483_v7 }
 0x188   : > { %917 = vbcast.lane.b32.xlu1 %v879_v33, 328  ;;  %913 = vbcast.lane.b32.xlu0 %v879_v33, 320 }
 0x18a   : > { %v3485_v61 = vpop.permute.xlu1 %684  ;;  %v3487_v63 = vpop.permute.xlu0 %680 }
 0x18c   : > { %925 = vbcast.lane.b32.xlu1 %v879_v33, 344  ;;  %921 = vbcast.lane.b32.xlu0 %v879_v33, 336 }
 0x18e   : > { %v3489_v0 = vpop.permute.xlu1 %692  ;;  %v3491_v54 = vpop.permute.xlu0 %688 }
 0x18f   : > { %5439 = vst [vmem:[#allocation48_spill] sm:$0xff] %v3489_v0 }
 0x190   : > { %933 = vbcast.lane.b32.xlu1 %v879_v33, 360  ;;  %929 = vbcast.lane.b32.xlu0 %v879_v33, 352 }
 0x192   : > { %v3497_v18 = vpop.permute.xlu1 %700  ;;  %v3499_v7 = vpop.permute.xlu0 %696 }
 0x193   : > { %5440 = vst [vmem:[#allocation49_spill] sm:$0xff] %v3497_v18  ;;  %5441 = vst [vmem:[#allocation50_spill] sm:$0xff] %v3499_v7 }
 0x194   : > { %941 = vbcast.lane.b32.xlu1 %v879_v33, 376  ;;  %937 = vbcast.lane.b32.xlu0 %v879_v33, 368 }
 0x196   : > { %v3503_v62 = vpop.permute.xlu1 %708  ;;  %v3505_v45 = vpop.permute.xlu0 %704 }
 0x197   : > { %5442 = vst [vmem:[#allocation51_spill] sm:$0xff] %v3503_v62  ;;  %5443 = vst [vmem:[#allocation52_spill] sm:$0xff] %v3505_v45 }
 0x198   : > { %1621 = vbcast.lane.b32.xlu1 %v1615_v5, 264  ;;  %1617 = vbcast.lane.b32.xlu0 %v1615_v5, 256 }
 0x19a   : > { %v3507_v15 = vpop.permute.xlu1 %716  ;;  %v3509_v27 = vpop.permute.xlu0 %712 }
 0x19b   : > { %5444 = vst [vmem:[#allocation53_spill] sm:$0xff] %v3507_v15  ;;  %5445 = vst [vmem:[#allocation54_spill] sm:$0xff] %v3509_v27 }
 0x19c   : > { %1629 = vbcast.lane.b32.xlu1 %v1615_v5, 280  ;;  %1625 = vbcast.lane.b32.xlu0 %v1615_v5, 272 }
 0x19e   : > { %v3511_v9 = vpop.permute.xlu1 %724  ;;  %v3513_v59 = vpop.permute.xlu0 %720 }
 0x19f   : > { %5446 = vst [vmem:[#allocation55_spill] sm:$0xff] %v3511_v9  ;;  %5447 = vst [vmem:[#allocation56_spill] sm:$0xff] %v3513_v59 }
 0x1a0   : > { %1637 = vbcast.lane.b32.xlu1 %v1615_v5, 296  ;;  %1633 = vbcast.lane.b32.xlu0 %v1615_v5, 288 }
 0x1a2   : > { %v3515_v33 = vpop.permute.xlu1 %732  ;;  %v3517_v18 = vpop.permute.xlu0 %728 }
 0x1a3   : > { %5448 = vst [vmem:[#allocation57_spill] sm:$0xff] %v3515_v33  ;;  %5449 = vst [vmem:[#allocation58_spill] sm:$0xff] %v3517_v18 }
 0x1a4   : > { %1645 = vbcast.lane.b32.xlu1 %v1615_v5, 312  ;;  %1641 = vbcast.lane.b32.xlu0 %v1615_v5, 304 }
 0x1a6   : > { %v3519_v62 = vpop.permute.xlu1 %740  ;;  %v3521_v45 = vpop.permute.xlu0 %736 }
 0x1a7   : > { %5450 = vst [vmem:[#allocation59_spill] sm:$0xff] %v3519_v62  ;;  %5451 = vst [vmem:[#allocation60_spill] sm:$0xff] %v3521_v45  ;;  %v5455_v62 = vsub.s32 1, %v3320_v1 }
 0x1a8   : > { %1653 = vbcast.lane.b32.xlu1 %v1615_v5, 328  ;;  %1649 = vbcast.lane.b32.xlu0 %v1615_v5, 320 }
 0x1a9   : > { %v1682_v45 = vrot.slane %v3495_v3, %v5455_v62 }
 0x1aa   : > { %v3523_v15 = vpop.permute.xlu1 %751  ;;  %v3525_v27 = vpop.permute.xlu0 %747 }
 0x1ac   : > { %1661 = vbcast.lane.b32.xlu1 %v1615_v5, 344  ;;  %1657 = vbcast.lane.b32.xlu0 %v1615_v5, 336 }
 0x1ae   : > { %v3527_v59 = vpop.permute.xlu1 %759  ;;  %v3529_v9 = vpop.permute.xlu0 %755 }
 0x1af   : > { %5452 = vst [vmem:[#allocation61_spill] sm:$0xff] %v3527_v59  ;;  %v5494_v59 = vsub.s32 7, %v3320_v1 }
 0x1b0   : > { %1669 = vbcast.lane.b32.xlu1 %v1615_v5, 360  ;;  %1665 = vbcast.lane.b32.xlu0 %v1615_v5, 352 }
 0x1b2   : > { %v3531_v33 = vpop.permute.xlu1 %767  ;;  %v3533_v18 = vpop.permute.xlu0 %763 }
 0x1b3   : > { %5453 = vst [vmem:[#allocation62_spill] sm:$0xff] %v3531_v33  ;;  %5454 = vst [vmem:[#allocation63_spill] sm:$0xff] %v3533_v18 }
 0x1b4   : > { %1677 = vbcast.lane.b32.xlu1 %v1615_v5, 376  ;;  %1673 = vbcast.lane.b32.xlu0 %v1615_v5, 368 }
 0x1b6   : > { %v3538_v60 = vpop.permute.xlu1 %775  ;;  %v3540_v46 = vpop.permute.xlu0 %771 }
 0x1b7   : > { %5456 = vst [vmem:[#allocation64_spill] sm:$0xff] %v3538_v60  ;;  %5457 = vst [vmem:[#allocation65_spill] sm:$0xff] %v3540_v46 }
 0x1b8   : > { %1688 = vbcast.lane.b32.xlu1 %v1682_v45, 264  ;;  %1684 = vbcast.lane.b32.xlu0 %v1682_v45, 256 }
 0x1ba   : > { %v3542_v57 = vpop.permute.xlu1 %783  ;;  %v3544_v36 = vpop.permute.xlu0 %779 }
 0x1bb   : > { %5458 = vst [vmem:[#allocation66_spill] sm:$0xff] %v3542_v57  ;;  %5459 = vst [vmem:[#allocation67_spill] sm:$0xff] %v3544_v36 }
 0x1bc   : > { %1696 = vbcast.lane.b32.xlu1 %v1682_v45, 280  ;;  %1692 = vbcast.lane.b32.xlu0 %v1682_v45, 272 }
 0x1be   : > { %v3546_v33 = vpop.permute.xlu1 %791  ;;  %v3548_v18 = vpop.permute.xlu0 %787 }
 0x1bf   : > { %5460 = vst [vmem:[#allocation68_spill] sm:$0xff] %v3546_v33  ;;  %5461 = vst [vmem:[#allocation69_spill] sm:$0xff] %v3548_v18 }
 0x1c0   : > { %1704 = vbcast.lane.b32.xlu1 %v1682_v45, 296  ;;  %1700 = vbcast.lane.b32.xlu0 %v1682_v45, 288 }
 0x1c2   : > { %v3550_v5 = vpop.permute.xlu1 %799  ;;  %v3552_v62 = vpop.permute.xlu0 %795 }
 0x1c3   : > { %5462 = vst [vmem:[#allocation70_spill] sm:$0xff] %v3550_v5  ;;  %5463 = vst [vmem:[#allocation71_spill] sm:$0xff] %v3552_v62 }
 0x1c4   : > { %1712 = vbcast.lane.b32.xlu1 %v1682_v45, 312  ;;  %1708 = vbcast.lane.b32.xlu0 %v1682_v45, 304 }
 0x1c6   : > { %v3554_v60 = vpop.permute.xlu1 %807  ;;  %v3556_v46 = vpop.permute.xlu0 %803 }
 0x1c7   : > { %5464 = vst [vmem:[#allocation72_spill] sm:$0xff] %v3554_v60  ;;  %5465 = vst [vmem:[#allocation73_spill] sm:$0xff] %v3556_v46  ;;  %v5470_v60 = vsub.s32 2, %v3320_v1 }
 0x1c8   : > { %1720 = vbcast.lane.b32.xlu1 %v1682_v45, 328  ;;  %1716 = vbcast.lane.b32.xlu0 %v1682_v45, 320 }
 0x1c9   : > { %v3573_v46 = vrot.slane %v3495_v3, %v5470_v60 }
 0x1ca   : > { %v3558_v36 = vpop.permute.xlu1 %818  ;;  %v3560_v57 = vpop.permute.xlu0 %814 }
 0x1cc   : > { %1728 = vbcast.lane.b32.xlu1 %v1682_v45, 344  ;;  %1724 = vbcast.lane.b32.xlu0 %v1682_v45, 336 }
 0x1ce   : > { %v3562_v33 = vpop.permute.xlu1 %826  ;;  %v3564_v18 = vpop.permute.xlu0 %822 }
 0x1cf   : > { %5466 = vst [vmem:[#allocation74_spill] sm:$0xff] %v3562_v33  ;;  %5467 = vst [vmem:[#allocation75_spill] sm:$0xff] %v3564_v18 }
 0x1d0   : > { %1736 = vbcast.lane.b32.xlu1 %v1682_v45, 360  ;;  %1732 = vbcast.lane.b32.xlu0 %v1682_v45, 352 }
 0x1d2   : > { %v3566_v5 = vpop.permute.xlu1 %834  ;;  %v3568_v62 = vpop.permute.xlu0 %830 }
 0x1d3   : > { %5468 = vst [vmem:[#allocation76_spill] sm:$0xff] %v3566_v5  ;;  %5469 = vst [vmem:[#allocation77_spill] sm:$0xff] %v3568_v62 }
 0x1d4   : > { %1744 = vbcast.lane.b32.xlu1 %v1682_v45, 376  ;;  %1740 = vbcast.lane.b32.xlu0 %v1682_v45, 368 }
 0x1d6   : > { %v3575_v58 = vpop.permute.xlu1 %842  ;;  %v3577_v43 = vpop.permute.xlu0 %838 }
 0x1d7   : > { %5471 = vst [vmem:[#allocation78_spill] sm:$0xff] %v3575_v58  ;;  %5472 = vst [vmem:[#allocation79_spill] sm:$0xff] %v3577_v43 }
 0x1d8   : > { %1755 = vbcast.lane.b32.xlu1 %v3573_v46, 264  ;;  %1751 = vbcast.lane.b32.xlu0 %v3573_v46, 256 }
 0x1da   : > { %v3581_v33 = vpop.permute.xlu1 %850  ;;  %v3583_v5 = vpop.permute.xlu0 %846 }
 0x1db   : > { %5473 = vst [vmem:[#allocation80_spill] sm:$0xff] %v3581_v33  ;;  %5474 = vst [vmem:[#allocation81_spill] sm:$0xff] %v3583_v5  ;;  %v5479_v33 = vsub.s32 3, %v3320_v1 }
 0x1dc   : > { %1763 = vbcast.lane.b32.xlu1 %v3573_v46, 280  ;;  %1759 = vbcast.lane.b32.xlu0 %v3573_v46, 272 }
 0x1dd   : > { %v3602_v5 = vrot.slane %v3495_v3, %v5479_v33  ;;  %v5484_v33 = vsub.s32 5, %v3320_v1 }
 0x1de   : > { %v3587_v45 = vpop.permute.xlu1 %858  ;;  %v3589_v60 = vpop.permute.xlu0 %854 }
 0x1df   : > { %5475 = vst [vmem:[#allocation82_spill] sm:$0xff] %v3587_v45  ;;  %5476 = vst [vmem:[#allocation83_spill] sm:$0xff] %v3589_v60 }
 0x1e0   : > { %1771 = vbcast.lane.b32.xlu1 %v3573_v46, 296  ;;  %1767 = vbcast.lane.b32.xlu0 %v3573_v46, 288 }
 0x1e2   : > { %v3593_v58 = vpop.permute.xlu1 %866  ;;  %v3595_v43 = vpop.permute.xlu0 %862 }
 0x1e3   : > { %5477 = vst [vmem:[#allocation84_spill] sm:$0xff] %v3593_v58  ;;  %5478 = vst [vmem:[#allocation85_spill] sm:$0xff] %v3595_v43  ;;  %v5482_v58 = vsub.s32 4, %v3320_v1 }
 0x1e4   : > { %1779 = vbcast.lane.b32.xlu1 %v3573_v46, 312  ;;  %1775 = vbcast.lane.b32.xlu0 %v3573_v46, 304 }
 0x1e5   : > { %v3613_v43 = vrot.slane %v3495_v3, %v5482_v58 }
 0x1e6   : > { %v3604_v45 = vpop.permute.xlu1 %874  ;;  %v3606_v60 = vpop.permute.xlu0 %870 }
 0x1e7   : > { %5480 = vst [vmem:[#allocation86_spill] sm:$0xff] %v3604_v45  ;;  %5481 = vst [vmem:[#allocation87_spill] sm:$0xff] %v3606_v60  ;;  %v3624_v45 = vrot.slane %v3495_v3, %v5484_v33  ;;  %v3641_v33 = vrot.slane %v3495_v3, %v5489_v25  ;;  %v3658_v25 = vrot.slane %v3495_v3, %v5494_v59 }
 0x1e8   : > { %1822 = vbcast.lane.b32.xlu1 %v3602_v5, 264  ;;  %1818 = vbcast.lane.b32.xlu0 %v3602_v5, 256 }
 0x1ea   : > { %v3615_v62 = vpop.permute.xlu1 %885  ;;  %v3617_v7 = vpop.permute.xlu0 %881 }
 0x1eb   : > { %5483 = vst [vmem:[#allocation88_spill] sm:$0xff] %v3617_v7 }
 0x1ec   : > { %1889 = vbcast.lane.b32.xlu1 %v3613_v43, 264  ;;  %1885 = vbcast.lane.b32.xlu0 %v3613_v43, 256 }
 0x1ee   : > { %v3626_v60 = vpop.permute.xlu1 %893  ;;  %v3628_v44 = vpop.permute.xlu0 %889 }
 0x1ef   : > { %5485 = vst [vmem:[#allocation89_spill] sm:$0xff] %v3626_v60  ;;  %5486 = vst [vmem:[#allocation90_spill] sm:$0xff] %v3628_v44 }
 0x1f0   : > { %1952 = vbcast.lane.b32.xlu1 %v3624_v45, 256  ;;  %1826 = vbcast.lane.b32.xlu0 %v3602_v5, 272 }
 0x1f2   : > { %v3632_v58 = vpop.permute.xlu1 %901  ;;  %v3634_v28 = vpop.permute.xlu0 %897 }
 0x1f3   : > { %5487 = vst [vmem:[#allocation91_spill] sm:$0xff] %v3632_v58  ;;  %5488 = vst [vmem:[#allocation92_spill] sm:$0xff] %v3634_v28 }
 0x1f4   : > { %1893 = vbcast.lane.b32.xlu1 %v3613_v43, 272  ;;  %1956 = vbcast.lane.b32.xlu0 %v3624_v45, 264 }
 0x1f6   : > { %v3643_v60 = vpop.permute.xlu1 %909  ;;  %v3645_v44 = vpop.permute.xlu0 %905 }
 0x1f7   : > { %5490 = vst [vmem:[#allocation93_spill] sm:$0xff] %v3643_v60  ;;  %5491 = vst [vmem:[#allocation94_spill] sm:$0xff] %v3645_v44 }
 0x1f8   : > { %2023 = vbcast.lane.b32.xlu1 %v3641_v33, 264  ;;  %2019 = vbcast.lane.b32.xlu0 %v3641_v33, 256 }
 0x1fa   : > { %v3649_v58 = vpop.permute.xlu1 %917  ;;  %v3651_v28 = vpop.permute.xlu0 %913 }
 0x1fb   : > { %5492 = vst [vmem:[#allocation95_spill] sm:$0xff] %v3649_v58  ;;  %5493 = vst [vmem:[#allocation96_spill] sm:$0xff] %v3651_v28 }
 0x1fc   : > { %1960 = vbcast.lane.b32.xlu1 %v3624_v45, 272  ;;  %1830 = vbcast.lane.b32.xlu0 %v3602_v5, 280 }
 0x1fe   : > { %v3660_v60 = vpop.permute.xlu1 %925  ;;  %v3662_v44 = vpop.permute.xlu0 %921 }
 0x1ff   : > { %5495 = vst [vmem:[#allocation97_spill] sm:$0xff] %v3660_v60  ;;  %5496 = vst [vmem:[#allocation98_spill] sm:$0xff] %v3662_v44 }
 0x200   : > { %2090 = vbcast.lane.b32.xlu1 %v3658_v25, 264  ;;  %2086 = vbcast.lane.b32.xlu0 %v3658_v25, 256 }
 0x202   : > { %v3666_v58 = vpop.permute.xlu1 %933  ;;  %v3668_v28 = vpop.permute.xlu0 %929 }
 0x203   : > { %5497 = vst [vmem:[#allocation99_spill] sm:$0xff] %v3666_v58  ;;  %5498 = vst [vmem:[#allocation100_spill] sm:$0xff] %v3668_v28 }
 0x204   : > { %2027 = vbcast.lane.b32.xlu1 %v3641_v33, 272  ;;  %1897 = vbcast.lane.b32.xlu0 %v3613_v43, 280 }
 0x206   : > { %v3672_v51 = vpop.permute.xlu1 %941  ;;  %v3674_v59 = vpop.permute.xlu0 %937 }
 0x207   : > { %5499 = vst [vmem:[#allocation101_spill] sm:$0xff] %v3672_v51  ;;  %5500 = vst [vmem:[#allocation102_spill] sm:$0xff] %v3674_v59 }
 0x208   : > { %1964 = vbcast.lane.b32.xlu1 %v3624_v45, 280  ;;  %1834 = vbcast.lane.b32.xlu0 %v3602_v5, 288 }
 0x20a   : > { %v3678_v3 = vpop.permute.xlu1 %1621  ;;  %v3680_v60 = vpop.permute.xlu0 %1617 }
 0x20b   : > { %5501 = vst [vmem:[#allocation103_spill] sm:$0xff] %v3678_v3  ;;  %5502 = vst [vmem:[#allocation104_spill] sm:$0xff] %v3680_v60 }
 0x20c   : > { %1901 = vbcast.lane.b32.xlu1 %v3613_v43, 288  ;;  %2094 = vbcast.lane.b32.xlu0 %v3658_v25, 272 }
 0x20e   : > { %v3684_v58 = vpop.permute.xlu1 %1629  ;;  %v3686_v28 = vpop.permute.xlu0 %1625 }
 0x20f   : > { %5503 = vst [vmem:[#allocation105_spill] sm:$0xff] %v3684_v58  ;;  %5504 = vst [vmem:[#allocation106_spill] sm:$0xff] %v3686_v28 }
 0x210   : > { %1838 = vbcast.lane.b32.xlu1 %v3602_v5, 296  ;;  %2031 = vbcast.lane.b32.xlu0 %v3641_v33, 280 }
 0x212   : > { %v3690_v51 = vpop.permute.xlu1 %1637  ;;  %v3692_v59 = vpop.permute.xlu0 %1633 }
 0x213   : > { %5505 = vst [vmem:[#allocation107_spill] sm:$0xff] %v3690_v51  ;;  %5506 = vst [vmem:[#allocation108_spill] sm:$0xff] %v3692_v59 }
 0x214   : > { %2098 = vbcast.lane.b32.xlu1 %v3658_v25, 280  ;;  %1968 = vbcast.lane.b32.xlu0 %v3624_v45, 288 }
 0x216   : > { %v3696_v44 = vpop.permute.xlu1 %1645  ;;  %v3698_v60 = vpop.permute.xlu0 %1641 }
 0x217   : > { %5507 = vst [vmem:[#allocation109_spill] sm:$0xff] %v3696_v44  ;;  %5508 = vst [vmem:[#allocation110_spill] sm:$0xff] %v3698_v60 }
 0x218   : > { %2035 = vbcast.lane.b32.xlu1 %v3641_v33, 288  ;;  %1905 = vbcast.lane.b32.xlu0 %v3613_v43, 296 }
 0x21a   : > { %v3702_v58 = vpop.permute.xlu1 %1653  ;;  %v3704_v28 = vpop.permute.xlu0 %1649 }
 0x21b   : > { %5509 = vst [vmem:[#allocation111_spill] sm:$0xff] %v3702_v58  ;;  %5510 = vst [vmem:[#allocation112_spill] sm:$0xff] %v3704_v28 }
 0x21c   : > { %1972 = vbcast.lane.b32.xlu1 %v3624_v45, 296  ;;  %1842 = vbcast.lane.b32.xlu0 %v3602_v5, 304 }
 0x21e   : > { %v3708_v51 = vpop.permute.xlu1 %1661  ;;  %v3710_v59 = vpop.permute.xlu0 %1657 }
 0x21f   : > { %5511 = vst [vmem:[#allocation113_spill] sm:$0xff] %v3708_v51  ;;  %5512 = vst [vmem:[#allocation114_spill] sm:$0xff] %v3710_v59 }
 0x220   : > { %1909 = vbcast.lane.b32.xlu1 %v3613_v43, 304  ;;  %2102 = vbcast.lane.b32.xlu0 %v3658_v25, 288 }
 0x222   : > { %v3714_v44 = vpop.permute.xlu1 %1669  ;;  %v3716_v60 = vpop.permute.xlu0 %1665 }
 0x223   : > { %5513 = vst [vmem:[#allocation115_spill] sm:$0xff] %v3714_v44  ;;  %5514 = vst [vmem:[#allocation116_spill] sm:$0xff] %v3716_v60  ;;  %v3080_v44 = vmov 1966171168  }
 0x224   : > { %1846 = vbcast.lane.b32.xlu1 %v3602_v5, 312  ;;  %2039 = vbcast.lane.b32.xlu0 %v3641_v33, 296  ;;  %v946_v60 = vunpack.c.l.s4 %v3080_v44  ;;  %v404_v44 = vld [vmem:[%s310_s11] sm:$0xff] }
 0x225   : > { %v944_v42 = vcombine.high %v404_v44, %v404_v44 }
 0x226   : > { %v3720_v58 = vpop.permute.xlu1 %1677  ;;  %v3722_v28 = vpop.permute.xlu0 %1673 }
 0x227   : > { %5515 = vst [vmem:[#allocation117_spill] sm:$0xff] %v3720_v58  ;;  %5516 = vst [vmem:[#allocation118_spill] sm:$0xff] %v3722_v28  ;;  %v947_v28 = vunpack.c.0.s8 %v946_v60 }
 0x228   : > { %2106 = vbcast.lane.b32.xlu1 %v3658_v25, 296  ;;  %1976 = vbcast.lane.b32.xlu0 %v3624_v45, 304 }
 0x22a   : > { %v3726_v51 = vpop.permute.xlu1 %1688  ;;  %v3728_v59 = vpop.permute.xlu0 %1684 }
 0x22b   : > { %5517 = vst [vmem:[#allocation119_spill] sm:$0xff] %v3726_v51  ;;  %5518 = vst [vmem:[#allocation120_spill] sm:$0xff] %v3728_v59  ;;  %v3745_v59 = vsub.s32 %v947_v28, %v3320_v1 }
 0x22c   : > { %1913 = vbcast.lane.b32.xlu1 %v3613_v43, 312  ;;  %1783 = vbcast.lane.b32.xlu0 %v3573_v46, 320 }
 0x22d   : > { %v951_v60 = vrot.slane %v404_v44, %v3745_v59 }
 0x22e   : > { %v3732_v3 = vpop.permute.xlu1 %1696  ;;  %v3734_v58 = vpop.permute.xlu0 %1692 }
 0x22f   : > { %5519 = vst [vmem:[#allocation121_spill] sm:$0xff] %v3732_v3  ;;  %5520 = vst [vmem:[#allocation122_spill] sm:$0xff] %v3734_v58  ;;  %v967_v1 = vrot.slane %v951_v60, %v3745_v59  ;;  %v959_v26 = vcombine.high %v951_v60, %v951_v60 }
 0x230   : > { %1850 = vbcast.lane.b32.xlu1 %v3602_v5, 320  ;;  %2043 = vbcast.lane.b32.xlu0 %v3641_v33, 304 }
 0x231   : > { %v3777_v0 = vrot.slane %v967_v1, %v3323_v2 }
 0x232   : > { %v3738_v41 = vpop.permute.xlu1 %1704  ;;  %v3740_v51 = vpop.permute.xlu0 %1700 }
 0x233   : > { %5521 = vst [vmem:[#allocation123_spill] sm:$0xff] %v3738_v41  ;;  %5522 = vst [vmem:[#allocation124_spill] sm:$0xff] %v3740_v51  ;;  %vm1034_vm0 = vcmp.ge.f32.partialorder %v3347_v14, %v3777_v0  ;;  %vm1033_vm3 = vcmp.ge.f32.partialorder %v3343_v12, %v3777_v0  ;;  %vm1035_vm4 = vcmp.ge.f32.partialorder %v3341_v11, %v3777_v0 }
 0x234   : > { %2110 = vbcast.lane.b32.xlu1 %v3658_v25, 304  ;;  %1980 = vbcast.lane.b32.xlu0 %v3624_v45, 312  ;;  %vm1036_vm6 = vcmp.ge.f32.partialorder %v3345_v13, %v3777_v0  ;;  %vm1038_vm11 = vcmp.ge.f32.partialorder %v3350_v16, %v3777_v0  ;;  %vm1037_vm13 = vcmp.ge.f32.partialorder %v3352_v17, %v3777_v0 }
 0x236   : > { %v3749_v3 = vpop.permute.xlu1 %1712  ;;  %v3751_v58 = vpop.permute.xlu0 %1708 }
 0x237   : > { %5523 = vst [vmem:[#allocation125_spill] sm:$0xff] %v3749_v3  ;;  %5524 = vst [vmem:[#allocation126_spill] sm:$0xff] %v3751_v58  ;;  %v989_v58 = vcombine.high %v967_v1, %v967_v1 }
 0x238   : > { %1917 = vbcast.lane.b32.xlu1 %v3613_v43, 320  ;;  %1787 = vbcast.lane.b32.xlu0 %v3573_v46, 328 }
 0x23a   : > { %v3756_v41 = vpop.permute.xlu1 %1720  ;;  %v3758_v51 = vpop.permute.xlu0 %1716 }
 0x23b   : > { %5525 = vst [vmem:[#allocation127_spill] sm:$0xff] %v3756_v41  ;;  %5526 = vst [vmem:[#allocation128_spill] sm:$0xff] %v3758_v51  ;;  %v3774_v51 = vrot.slane %v989_v58, %v3323_v2  ;;  %v3795_v58 = vrot.slane %v944_v42, %v3745_v59 }
 0x23c   : > { %1854 = vbcast.lane.b32.xlu1 %v3602_v5, 328  ;;  %2047 = vbcast.lane.b32.xlu0 %v3641_v33, 312 }
 0x23d   : > { %vm1066_vm1 = vcmp.ge.f32.partialorder %v3413_v47, %v3774_v51  ;;  %vm1065_vm2 = vcmp.ge.f32.partialorder %v3415_v48, %v3774_v51  ;;  %vm1067_vm5 = vcmp.ge.f32.partialorder %v3419_v50, %v3774_v51  ;;  %vm1068_vm7 = vcmp.ge.f32.partialorder %v3417_v49, %v3774_v51 }
 0x23e   : > { %v3763_v28 = vpop.permute.xlu1 %1728  ;;  %v3765_v3 = vpop.permute.xlu0 %1724  ;;  %vm1069_vm10 = vcmp.ge.f32.partialorder %v3424_v53, %v3774_v51  ;;  %vm1070_vm12 = vcmp.ge.f32.partialorder %v3422_v52, %v3774_v51  ;;  %vm1071_vm15 = vcmp.ge.f32.partialorder %v3431_v56, %v3774_v51 }
 0x23f   : > { %5527 = vst [vmem:[#allocation129_spill] sm:$0xff] %v3763_v28  ;;  %5528 = vst [vmem:[#allocation130_spill] sm:$0xff] %v3765_v3  ;;  %v981_v28 = vrot.slane %v959_v26, %v3745_v59  ;;  %v5342_v26 = vmov 0.0  }
 0x240   : > { %2114 = vbcast.lane.b32.xlu1 %v3658_v25, 312  ;;  %1984 = vbcast.lane.b32.xlu0 %v3624_v45, 320  ;;  %v3803_v44 = vsel %vm1034_vm0, 1.0, %v5342_v26  ;;  %v3808_v12 = vsel %vm1066_vm1, 1.0, %v5342_v26  ;;  %v3811_v1 = vsel %vm1065_vm2, 1.0, %v5342_v26  ;;  %v3842_v23 = vsel %vm1067_vm5, 1.0, %v5342_v26 }
 0x241   : > { %v3800_v14 = vrot.slane %v981_v28, %v3323_v2  ;;  %5533 = vst [vmem:[#allocation135_spill] sm:$0xff] %v3803_v44  ;;  %v991_v47 = vcombine.high %v981_v28, %v981_v28  ;;  %v3822_v28 = vrot.slane %v3795_v58, %v3745_v59  ;;  %v3881_v16 = vsel %vm1069_vm10, 1.0, %v5342_v26 }
 0x242   : > { %v3769_v18 = vpop.permute.xlu1 %1736  ;;  %v3771_v41 = vpop.permute.xlu0 %1732  ;;  %v3898_v53 = vsel %vm1070_vm12, 1.0, %v5342_v26  ;;  %vm1072_vm0 = vcmp.ge.f32.partialorder %v3429_v55, %v3774_v51  ;;  %v3925_v17 = vsel %vm1071_vm15, 1.0, %v5342_v26 }
 0x243   : > { %5529 = vst [vmem:[#allocation131_spill] sm:$0xff] %v3769_v18  ;;  %5530 = vst [vmem:[#allocation132_spill] sm:$0xff] %v3771_v41  ;;  %vm1050_vm8 = vcmp.ge.f32.partialorder %v3377_v29, %v3800_v14  ;;  %vm1049_vm9 = vcmp.ge.f32.partialorder %v3379_v30, %v3800_v14  ;;  %v3853_v11 = vrot.slane %v3822_v28, %v3323_v2  ;;  %v3942_v56 = vsel %vm1072_vm0, 1.0, %v5342_v26 }
 0x244   : > { %1921 = vbcast.lane.b32.xlu1 %v3613_v43, 328  ;;  %1791 = vbcast.lane.b32.xlu0 %v3573_v46, 336  ;;  %vm1051_vm14 = vcmp.ge.f32.partialorder %v3383_v32, %v3800_v14  ;;  %vm1052_vm1 = vcmp.ge.f32.partialorder %v3381_v31, %v3800_v14  ;;  %vm1053_vm5 = vcmp.ge.f32.partialorder %v3388_v35, %v3800_v14 }
 0x245   : > { %vm1055_vm12 = vcmp.ge.f32.partialorder %v3395_v38, %v3800_v14  ;;  %vm1056_vm0 = vcmp.ge.f32.partialorder %v3393_v37, %v3800_v14  ;;  %v1460_v37 = vadd.f32 %v3808_v12, %v3811_v1 }
 0x246   : > { %v3784_v60 = vpop.permute.xlu1 %1744  ;;  %v3786_v18 = vpop.permute.xlu0 %1740 }
 0x247   : > { %5531 = vst [vmem:[#allocation133_spill] sm:$0xff] %v3784_v60  ;;  %5532 = vst [vmem:[#allocation134_spill] sm:$0xff] %v3786_v18  ;;  %v3816_v60 = vsel %vm1033_vm3, 1.0, %v5342_v26 }
 0x248   : > { %1858 = vbcast.lane.b32.xlu1 %v3602_v5, 336  ;;  %2051 = vbcast.lane.b32.xlu0 %v3641_v33, 320  ;;  %5534 = vst [vmem:[#allocation136_spill] sm:$0xff] %v3816_v60  ;;  %v1418_v3 = vadd.f32 %v3803_v44, %v3816_v60 }
 0x24a   : > { %v1756_v48 = vpop.permute.xlu1 %1755  ;;  %v1752_v42 = vpop.permute.xlu0 %1751 }
 0x24b   : > { %v2181_v18 = vmul.f32 %v3808_v12, %v1756_v48  ;;  %v2180_v41 = vmul.f32 %v3811_v1, %v1752_v42  ;;  %v3833_v48 = vrot.slane %v991_v47, %v3323_v2  ;;  %v3839_v42 = vsel %vm1035_vm4, 1.0, %v5342_v26 }
 0x24c   : > { %2118 = vbcast.lane.b32.xlu1 %v3658_v25, 320  ;;  %1988 = vbcast.lane.b32.xlu0 %v3624_v45, 328  ;;  %5535 = vst [vmem:[#allocation137_spill] sm:$0xff] %v3839_v42  ;;  %v1419_v49 = vadd.f32 %v3839_v42, %v1418_v3  ;;  %v3872_v3 = vsel %vm1050_vm8, 1.0, %v5342_v26  ;;  %vm1039_vm4 = vcmp.ge.f32.partialorder %v3359_v20, %v3777_v0 }
 0x24d   : > { %v2318_v50 = vadd.f32 %v2181_v18, %v2180_v41  ;;  %v3856_v41 = vsel %vm1036_vm6, 1.0, %v5342_v26  ;;  %v3860_v18 = vsel %vm1068_vm7, 1.0, %v5342_v26  ;;  %vm1082_vm2 = vcmp.ge.f32.partialorder %v3449_v4, %v3833_v48 }
 0x24e   : > { %v1764_v60 = vpop.permute.xlu1 %1763  ;;  %v1760_v44 = vpop.permute.xlu0 %1759  ;;  %5536 = vst [vmem:[#allocation138_spill] sm:$0xff] %v3856_v41  ;;  %5537 = vst [vmem:[#allocation139_spill] sm:$0xff] %v3860_v18  ;;  %v1420_v7 = vadd.f32 %v3856_v41, %v1419_v49  ;;  %vm1081_vm3 = vcmp.ge.f32.partialorder %v3451_v6, %v3833_v48  ;;  %vm1098_vm6 = vcmp.ge.f32.partialorder %v3485_v61, %v3853_v11 }
 0x24f   : > { %v2182_v13 = vmul.f32 %v3842_v23, %v1760_v44  ;;  %v2183_v29 = vmul.f32 %v3860_v18, %v1764_v60  ;;  %v3875_v44 = vsel %vm1049_vm9, 1.0, %v5342_v26  ;;  %v3891_v18 = vsel %vm1038_vm11, 1.0, %v5342_v26 }
 0x250   : > { %1925 = vbcast.lane.b32.xlu1 %v3613_v43, 336  ;;  %1795 = vbcast.lane.b32.xlu0 %v3573_v46, 344  ;;  %5538 = vst [vmem:[#allocation140_spill] sm:$0xff] %v3891_v18  ;;  %v1439_v52 = vadd.f32 %v3872_v3, %v3875_v44  ;;  %vm1097_vm7 = vcmp.ge.f32.partialorder %v3487_v63, %v3853_v11  ;;  %v4004_v20 = vsel %vm1098_vm6, 1.0, %v5342_v26 }
 0x251   : > { %v2319_v30 = vadd.f32 %v2318_v50, %v2182_v13  ;;  %v960_v13 = vcombine.high %v3795_v58, %v3795_v58  ;;  %v3908_v58 = vsel %vm1037_vm13, 1.0, %v5342_v26  ;;  %vm1040_vm8 = vcmp.ge.f32.partialorder %v3357_v19, %v3777_v0 }
 0x252   : > { %v1772_v47 = vpop.permute.xlu1 %1771  ;;  %v1768_v42 = vpop.permute.xlu0 %1767  ;;  %5539 = vst [vmem:[#allocation141_spill] sm:$0xff] %v3908_v58  ;;  %vm1054_vm9 = vcmp.ge.f32.partialorder %v3386_v34, %v3800_v14  ;;  %vm1083_vm10 = vcmp.ge.f32.partialorder %v3455_v10, %v3833_v48  ;;  %vm1041_vm11 = vcmp.ge.f32.partialorder %v3363_v22, %v3777_v0  ;;  %v4027_v34 = vsel %vm1040_vm8, 1.0, %v5342_v26 }
 0x253   : > { %v2184_v60 = vmul.f32 %v3881_v16, %v1768_v42  ;;  %v2320_v50 = vadd.f32 %v2319_v30, %v2183_v29  ;;  %v2185_v42 = vmul.f32 %v3898_v53, %v1772_v47  ;;  %v3919_v29 = vsel %vm1051_vm14, 1.0, %v5342_v26  ;;  %5543 = vst [vmem:[#allocation145_spill] sm:$0xff] %v4027_v34 }
 0x254   : > { %1862 = vbcast.lane.b32.xlu1 %v3602_v5, 344  ;;  %2055 = vbcast.lane.b32.xlu0 %v3641_v33, 328  ;;  %v3935_v32 = vrot.slane %v960_v13, %v3745_v59  ;;  %v1440_v59 = vadd.f32 %v3919_v29, %v1439_v52  ;;  %vm1099_vm13 = vcmp.ge.f32.partialorder %v3491_v54, %v3853_v11 }
 0x255   : > { %v2321_v49 = vadd.f32 %v2320_v50, %v2184_v60  ;;  %v1421_v50 = vadd.f32 %v3908_v58, %v1420_v7  ;;  %vm1058_vm8 = vcmp.ge.f32.partialorder %v3397_v39, %v3800_v14  ;;  %v5558_v39 = vld [vmem:[#allocation75_spill] sm:$0xff]  ;;  %v5575_v58 = vld [vmem:[#allocation29_spill] sm:$0xff] }
 0x256   : > { %v1780_v30 = vpop.permute.xlu1 %1779  ;;  %v1776_v41 = vpop.permute.xlu0 %1775  ;;  %v3983_v6 = vrot.slane %v3935_v32, %v3323_v2 }
 0x257   : > { %v2186_v47 = vmul.f32 %v3925_v17, %v1776_v41  ;;  %v2322_v60 = vadd.f32 %v2321_v49, %v2185_v42  ;;  %v3950_v41 = vsel %vm1052_vm1, 1.0, %v5342_v26  ;;  %v2187_v7 = vmul.f32 %v3942_v56, %v1780_v30 }
 0x258   : > { %2122 = vbcast.lane.b32.xlu1 %v3658_v25, 328  ;;  %1992 = vbcast.lane.b32.xlu0 %v3624_v45, 336  ;;  %5540 = vst [vmem:[#allocation142_spill] sm:$0xff] %v3950_v41  ;;  %v3962_v42 = vsel %vm1082_vm2, 1.0, %v5342_v26  ;;  %v3968_v49 = vsel %vm1081_vm3, 1.0, %v5342_v26  ;;  %v1422_v4 = vadd.f32 %v3891_v18, %v1421_v50  ;;  %v990_v50 = vcombine.high %v3822_v28, %v3822_v28 }
 0x259   : > { %v2323_v13 = vadd.f32 %v2322_v60, %v2186_v47  ;;  %v3989_v60 = vsel %vm1039_vm4, 1.0, %v5342_v26  ;;  %vm1114_vm14 = vcmp.ge.f32.partialorder %v3523_v15, %v3983_v6  ;;  %vm1113_vm15 = vcmp.ge.f32.partialorder %v3525_v27, %v3983_v6 }
 0x25a   : > { %v1823_v55 = vpop.permute.xlu1 %1822  ;;  %v1819_v31 = vpop.permute.xlu0 %1818  ;;  %5541 = vst [vmem:[#allocation143_spill] sm:$0xff] %v3989_v60  ;;  %v1423_v61 = vadd.f32 %v3989_v60, %v1422_v4  ;;  %v4039_v4 = vsel %vm1083_vm10, 1.0, %v5342_v26  ;;  %v4062_v27 = vsel %vm1055_vm12, 1.0, %v5342_v26  ;;  %v4080_v38 = vsel %vm1114_vm14, 1.0, %v5342_v26 }
 0x25b   : > { %v2197_v52 = vmul.f32 %v3962_v42, %v1823_v55  ;;  %v2196_v30 = vmul.f32 %v3968_v49, %v1819_v31  ;;  %v3974_v47 = vadd.f32 %v2323_v13, %v2187_v7  ;;  %v1441_v7 = vadd.f32 %v3950_v41, %v1440_v59  ;;  %5546 = vst [vmem:[#allocation148_spill] sm:$0xff] %v4062_v27 }
 0x25c   : > { %1929 = vbcast.lane.b32.xlu1 %v3613_v43, 344  ;;  %1799 = vbcast.lane.b32.xlu0 %v3573_v46, 352  ;;  %v3998_v55 = vsel %vm1053_vm5, 1.0, %v5342_v26  ;;  %v4010_v59 = vsel %vm1097_vm7, 1.0, %v5342_v26  ;;  %vm1042_vm3 = vcmp.ge.f32.partialorder %v3361_v21, %v3777_v0  ;;  %v4094_v15 = vsel %vm1056_vm0, 1.0, %v5342_v26 }
 0x25d   : > { %v2339_v13 = vadd.f32 %v2197_v52, %v2196_v30  ;;  %5542 = vst [vmem:[#allocation144_spill] sm:$0xff] %v3998_v55  ;;  %v1442_v63 = vadd.f32 %v3998_v55, %v1441_v7  ;;  %v4036_v52 = vsel %vm1054_vm9, 1.0, %v5342_v26  ;;  %v4051_v7 = vsel %vm1041_vm11, 1.0, %v5342_v26  ;;  %5547 = vst [vmem:[#allocation149_spill] sm:$0xff] %v4094_v15  ;;  %v5568_v55 = vld [vmem:[#allocation25_spill] sm:$0xff] }
 0x25e   : > { %v1890_v31 = vpop.permute.xlu1 %1889  ;;  %v1886_v18 = vpop.permute.xlu0 %1885  ;;  %5544 = vst [vmem:[#allocation146_spill] sm:$0xff] %v4036_v52  ;;  %5545 = vst [vmem:[#allocation147_spill] sm:$0xff] %v4051_v7  ;;  %vm1057_vm4 = vcmp.ge.f32.partialorder %v3399_v40, %v3800_v14  ;;  %vm1084_vm5 = vcmp.ge.f32.partialorder %v3453_v8, %v3833_v48  ;;  %vm1115_vm6 = vcmp.ge.f32.partialorder %v3529_v9, %v3983_v6 }
 0x25f   : > { %v2213_v35 = vmul.f32 %v4004_v20, %v1890_v31  ;;  %v2212_v28 = vmul.f32 %v4010_v59, %v1886_v18  ;;  %v4033_v18 = vrot.slane %v990_v50, %v3323_v2  ;;  %v1424_v50 = vadd.f32 %v4027_v34, %v1423_v61 }
 0x260   : > { %1866 = vbcast.lane.b32.xlu1 %v3602_v5, 352  ;;  %2059 = vbcast.lane.b32.xlu0 %v3641_v33, 336  ;;  %v992_v31 = vcombine.high %v3935_v32, %v3935_v32  ;;  %v4068_v61 = vsel %vm1113_vm15, 1.0, %v5342_v26  ;;  %v4074_v32 = vsel %vm1099_vm13, 1.0, %v5342_v26  ;;  %vm1043_vm7 = vcmp.ge.f32.partialorder %v3367_v24, %v3777_v0 }
 0x261   : > { %v2360_v10 = vadd.f32 %v2213_v35, %v2212_v28  ;;  %v1443_v35 = vadd.f32 %v4036_v52, %v1442_v63  ;;  %vm1130_vm1 = vcmp.ge.f32.partialorder %v3558_v36, %v4033_v18  ;;  %vm1129_vm2 = vcmp.ge.f32.partialorder %v3560_v57, %v4033_v18 }
 0x262   : > { %v1953_v30 = vpop.permute.xlu1 %1952  ;;  %v1827_v22 = vpop.permute.xlu0 %1826  ;;  %v1425_v54 = vadd.f32 %v4051_v7, %v1424_v50  ;;  %v4104_v50 = vrot.slane %v992_v31, %v3323_v2  ;;  %v5548_v7 = vmov 0.0   ;;  %v1461_v57 = vadd.f32 %v3842_v23, %v1460_v37 }
 0x263   : > { %v2198_v19 = vmul.f32 %v4039_v4, %v1827_v22  ;;  %v4112_v60 = vsel %vm1130_vm1, 1.0, %v5548_v7  ;;  %v4130_v36 = vsel %vm1042_vm3, 1.0, %v5548_v7  ;;  %v4145_v21 = vsel %vm1057_vm4, 1.0, %v5548_v7 }
 0x264   : > { %2126 = vbcast.lane.b32.xlu1 %v3658_v25, 336  ;;  %1996 = vbcast.lane.b32.xlu0 %v3624_v45, 344  ;;  %5549 = vst [vmem:[#allocation150_spill] sm:$0xff] %v4130_v36  ;;  %v1426_v9 = vadd.f32 %v4130_v36, %v1425_v54  ;;  %5550 = vst [vmem:[#allocation151_spill] sm:$0xff] %v4145_v21  ;;  %v4154_v24 = vsel %vm1084_vm5, 1.0, %v5548_v7  ;;  %vm1146_vm9 = vcmp.ge.f32.partialorder %v3615_v62, %v4104_v50  ;;  %v5554_v54 = vld [vmem:[#allocation139_spill] sm:$0xff] }
 0x265   : > { %v2340_v28 = vadd.f32 %v2339_v13, %v2198_v19  ;;  %v2228_v13 = vmul.f32 %v4068_v61, %v1953_v30  ;;  %v1462_v8 = vadd.f32 %v5554_v54, %v1461_v57  ;;  %v4184_v54 = vsel %vm1146_vm9, 1.0, %v5548_v7 }
 0x266   : > { %v1894_v22 = vpop.permute.xlu1 %1893  ;;  %v1957_v34 = vpop.permute.xlu0 %1956  ;;  %vm1131_vm14 = vcmp.ge.f32.partialorder %v5558_v39, %v4033_v18  ;;  %vm1061_vm5 = vcmp.ge.f32.partialorder %v5568_v55, %v3800_v14  ;;  %vm1073_vm9 = vcmp.ge.f32.partialorder %v5575_v58, %v3774_v51  ;;  %v5581_v58 = vld [vmem:[#allocation63_spill] sm:$0xff] }
 0x267   : > { %v2214_v63 = vmul.f32 %v4074_v32, %v1894_v22  ;;  %v2229_v19 = vmul.f32 %v4080_v38, %v1957_v34  ;;  %v1444_v34 = vadd.f32 %v4062_v27, %v1443_v35  ;;  %v5551_v35 = vld [vmem:[#allocation88_spill] sm:$0xff] }
 0x268   : > { %1933 = vbcast.lane.b32.xlu1 %v3613_v43, 352  ;;  %1803 = vbcast.lane.b32.xlu0 %v3573_v46, 360  ;;  %vm1145_vm10 = vcmp.ge.f32.partialorder %v5551_v35, %v4104_v50  ;;  %v1463_v35 = vadd.f32 %v3881_v16, %v1462_v8  ;;  %v4220_v8 = vsel %vm1131_vm14, 1.0, %v5548_v7 }
 0x269   : > { %v4101_v30 = vadd.f32 %v2360_v10, %v2214_v63  ;;  %v2381_v22 = vadd.f32 %v2229_v19, %v2228_v13  ;;  %v4118_v10 = vsel %vm1129_vm2, 1.0, %v5548_v7  ;;  %v5552_v63 = vld [vmem:[#allocation17_spill] sm:$0xff]  ;;  %v4165_v19 = vsel %vm1043_vm7, 1.0, %v5548_v7 }
 0x26a   : > { %v2024_v26 = vpop.permute.xlu1 %2023  ;;  %v2020_v52 = vpop.permute.xlu0 %2019  ;;  %vm1044_vm11 = vcmp.ge.f32.partialorder %v5552_v63, %v3777_v0  ;;  %5553 = vst [vmem:[#allocation88_spill] sm:$0xff] %v4165_v19 }
 0x26b   : > { %v2245_v2 = vmul.f32 %v4112_v60, %v2024_v26  ;;  %v2244_v12 = vmul.f32 %v4118_v10, %v2020_v52  ;;  %v1445_v26 = vadd.f32 %v4094_v15, %v1444_v34  ;;  %v4148_v52 = vsel %vm1115_vm6, 1.0, %v5548_v7 }
 0x26c   : > { %1870 = vbcast.lane.b32.xlu1 %v3602_v5, 360  ;;  %2063 = vbcast.lane.b32.xlu0 %v3641_v33, 344  ;;  %v1427_v34 = vadd.f32 %v4165_v19, %v1426_v9  ;;  %v4202_v62 = vsel %vm1044_vm11, 1.0, %v5548_v7  ;;  %v5561_v19 = vld [vmem:[#allocation22_spill] sm:$0xff] }
 0x26d   : > { %v2402_v1 = vadd.f32 %v2245_v2, %v2244_v12  ;;  %v1446_v37 = vadd.f32 %v4145_v21, %v1445_v26  ;;  %5559 = vst [vmem:[#allocation139_spill] sm:$0xff] %v4202_v62  ;;  %vm1060_vm0 = vcmp.ge.f32.partialorder %v5561_v19, %v3800_v14  ;;  %v1464_v21 = vadd.f32 %v3898_v53, %v1463_v35  ;;  %v5571_v19 = vld [vmem:[#allocation90_spill] sm:$0xff] }
 0x26e   : > { %v1961_v23 = vpop.permute.xlu1 %1960  ;;  %v1831_v31 = vpop.permute.xlu0 %1830  ;;  %v1428_v39 = vadd.f32 %v4202_v62, %v1427_v34  ;;  %v5565_v62 = vld [vmem:[#allocation18_spill] sm:$0xff]  ;;  %vm1147_vm7 = vcmp.ge.f32.partialorder %v5571_v19, %v4104_v50 }
 0x26f   : > { %v2230_v40 = vmul.f32 %v4148_v52, %v1961_v23  ;;  %v2199_v13 = vmul.f32 %v4154_v24, %v1831_v31  ;;  %v5555_v23 = vld [vmem:[#allocation23_spill] sm:$0xff]  ;;  %v4178_v31 = vsel %vm1058_vm8, 1.0, %v5548_v7  ;;  %vm1046_vm3 = vcmp.ge.f32.partialorder %v5565_v62, %v3777_v0 }
 0x270   : > { %2130 = vbcast.lane.b32.xlu1 %v3658_v25, 344  ;;  %2000 = vbcast.lane.b32.xlu0 %v3624_v45, 352  ;;  %vm1059_vm12 = vcmp.ge.f32.partialorder %v5555_v23, %v3800_v14  ;;  %5556 = vst [vmem:[#allocation17_spill] sm:$0xff] %v4178_v31  ;;  %v4306_v55 = vsel %vm1147_vm7, 1.0, %v5548_v7 }
 0x271   : > { %v2382_v2 = vadd.f32 %v2381_v22, %v2230_v40  ;;  %v2341_v12 = vadd.f32 %v2340_v28, %v2199_v13  ;;  %v4190_v28 = vsel %vm1145_vm10, 1.0, %v5548_v7  ;;  %v5557_v22 = vld [vmem:[#allocation48_spill] sm:$0xff]  ;;  %v5560_v13 = vld [vmem:[#allocation19_spill] sm:$0xff]  ;;  %v4217_v16 = vsel %vm1059_vm12, 1.0, %v5548_v7 }
 0x272   : > { %v2091_v57 = vpop.permute.xlu1 %2090  ;;  %v2087_v9 = vpop.permute.xlu0 %2086  ;;  %vm1100_vm13 = vcmp.ge.f32.partialorder %v5557_v22, %v3853_v11  ;;  %vm1045_vm15 = vcmp.ge.f32.partialorder %v5560_v13, %v3777_v0  ;;  %5562 = vst [vmem:[#allocation23_spill] sm:$0xff] %v4217_v16  ;;  %v4256_v13 = vsel %vm1060_vm0, 1.0, %v5548_v7 }
 0x273   : > { %v2261_v26 = vmul.f32 %v4184_v54, %v2091_v57  ;;  %v2260_v40 = vmul.f32 %v4190_v28, %v2087_v9  ;;  %v1447_v57 = vadd.f32 %v4178_v31, %v1446_v37  ;;  %v4226_v34 = vsel %vm1100_vm13, 1.0, %v5548_v7  ;;  %v5563_v37 = vld [vmem:[#allocation37_spill] sm:$0xff]  ;;  %5569 = vst [vmem:[#allocation75_spill] sm:$0xff] %v4256_v13 }
 0x274   : > { %1937 = vbcast.lane.b32.xlu1 %v3613_v43, 360  ;;  %1807 = vbcast.lane.b32.xlu0 %v3573_v46, 368  ;;  %vm1085_vm1 = vcmp.ge.f32.partialorder %v5563_v37, %v3833_v48  ;;  %v5566_v31 = vld [vmem:[#allocation21_spill] sm:$0xff]  ;;  %v4242_v22 = vsel %vm1045_vm15, 1.0, %v5548_v7  ;;  %v1465_v37 = vadd.f32 %v3925_v17, %v1464_v21  ;;  %vm1117_vm13 = vcmp.ge.f32.partialorder %v5581_v58, %v3983_v6 }
 0x275   : > { %v2423_v9 = vadd.f32 %v2261_v26, %v2260_v40  ;;  %v5564_v26 = vld [vmem:[#allocation61_spill] sm:$0xff]  ;;  %vm1047_vm4 = vcmp.ge.f32.partialorder %v5566_v31, %v3777_v0  ;;  %5567 = vst [vmem:[#allocation48_spill] sm:$0xff] %v4242_v22 }
 0x276   : > { %v2028_v63 = vpop.permute.xlu1 %2027  ;;  %v1898_v36 = vpop.permute.xlu0 %1897  ;;  %vm1116_vm2 = vcmp.ge.f32.partialorder %v5564_v26, %v3983_v6  ;;  %v4279_v26 = vsel %vm1046_vm3, 1.0, %v5548_v7 }
 0x277   : > { %v2246_v23 = vmul.f32 %v4220_v8, %v2028_v63  ;;  %v2215_v40 = vmul.f32 %v4226_v34, %v1898_v36  ;;  %v1429_v36 = vadd.f32 %v4242_v22, %v1428_v39  ;;  %v1448_v63 = vadd.f32 %v4217_v16, %v1447_v57  ;;  %5573 = vst [vmem:[#allocation19_spill] sm:$0xff] %v4279_v26 }
 0x278   : > { %1874 = vbcast.lane.b32.xlu1 %v3602_v5, 368  ;;  %2067 = vbcast.lane.b32.xlu0 %v3641_v33, 352  ;;  %v4262_v35 = vsel %vm1116_vm2, 1.0, %v5548_v7  ;;  %v1481_v22 = vadd.f32 %v3962_v42, %v3968_v49 }
 0x279   : > { %v2403_v15 = vadd.f32 %v2402_v1, %v2246_v23  ;;  %v2362_v27 = vadd.f32 %v4101_v30, %v2215_v40  ;;  %v2741_v30 = vsel %vm1085_vm1, 1.0, %v5548_v7  ;;  %v5570_v1 = vld [vmem:[#allocation50_spill] sm:$0xff]  ;;  %v5572_v40 = vld [vmem:[#allocation24_spill] sm:$0xff] }
 0x27a   : > { %v1965_v53 = vpop.permute.xlu1 %1964  ;;  %v1835_v39 = vpop.permute.xlu0 %1834  ;;  %vm1101_vm6 = vcmp.ge.f32.partialorder %v5570_v1, %v3853_v11  ;;  %vm1062_vm8 = vcmp.ge.f32.partialorder %v5572_v40, %v3800_v14  ;;  %v1482_v17 = vadd.f32 %v4039_v4, %v1481_v22  ;;  %v1430_v1 = vadd.f32 %v4279_v26, %v1429_v36  ;;  %v5580_v40 = vld [vmem:[#allocation28_spill] sm:$0xff] }
 0x27b   : > { %v2231_v57 = vmul.f32 %v4262_v35, %v1965_v53  ;;  %v2200_v23 = vmul.f32 %v2741_v30, %v1835_v39  ;;  %v4290_v53 = vsel %vm1061_vm5, 1.0, %v5548_v7  ;;  %v1449_v39 = vadd.f32 %v4256_v13, %v1448_v63 }
 0x27c   : > { %2134 = vbcast.lane.b32.xlu1 %v3658_v25, 352  ;;  %2004 = vbcast.lane.b32.xlu0 %v3624_v45, 360  ;;  %5574 = vst [vmem:[#allocation22_spill] sm:$0xff] %v4290_v53  ;;  %v4300_v49 = vsel %vm1101_vm6, 1.0, %v5548_v7  ;;  %v4318_v63 = vsel %vm1047_vm4, 1.0, %v5548_v7  ;;  %v4325_v19 = vsel %vm1062_vm8, 1.0, %v5548_v7  ;;  %vm1074_vm12 = vcmp.ge.f32.partialorder %v5580_v40, %v3774_v51 }
 0x27d   : > { %v2383_v62 = vadd.f32 %v2382_v2, %v2231_v57  ;;  %v2342_v16 = vadd.f32 %v2341_v12, %v2200_v23  ;;  %v5576_v2 = vld [vmem:[#allocation36_spill] sm:$0xff]  ;;  %v5577_v12 = vld [vmem:[#allocation74_spill] sm:$0xff]  ;;  %5578 = vst [vmem:[#allocation37_spill] sm:$0xff] %v4318_v63  ;;  %5579 = vst [vmem:[#allocation61_spill] sm:$0xff] %v4325_v19  ;;  %v1466_v57 = vadd.f32 %v3942_v56, %v1465_v37  ;;  %v4335_v36 = vsel %vm1073_vm9, 1.0, %v5548_v7 }
 0x27e   : > { %v1902_v42 = vpop.permute.xlu1 %1901  ;;  %v2095_v21 = vpop.permute.xlu0 %2094  ;;  %vm1086_vm10 = vcmp.ge.f32.partialorder %v5576_v2, %v3833_v48  ;;  %vm1132_vm11 = vcmp.ge.f32.partialorder %v5577_v12, %v4033_v18  ;;  %v1450_v23 = vadd.f32 %v4290_v53, %v1449_v39  ;;  %v5583_v39 = vld [vmem:[#allocation27_spill] sm:$0xff]  ;;  %v5588_v40 = vld [vmem:[#allocation30_spill] sm:$0xff] }
 0x27f   : > { %v2216_v4 = vmul.f32 %v4300_v49, %v1902_v42  ;;  %v2262_v22 = vmul.f32 %v4306_v55, %v2095_v21  ;;  %v1483_v21 = vadd.f32 %v4154_v24, %v1482_v17  ;;  %vm1063_vm15 = vcmp.ge.f32.partialorder %v5583_v39, %v3800_v14 }
 0x280   : > { %1941 = vbcast.lane.b32.xlu1 %v3613_v43, 368  ;;  %1811 = vbcast.lane.b32.xlu0 %v3573_v46, 376  ;;  %v2742_v46 = vsel %vm1086_vm10, 1.0, %v5548_v7  ;;  %v4358_v17 = vadd.f32 %v4318_v63, %v1430_v1  ;;  %v1467_v2 = vadd.f32 %v4335_v36, %v1466_v57  ;;  %v1451_v12 = vadd.f32 %v4325_v19, %v1450_v23  ;;  %v5587_v57 = vld [vmem:[#allocation77_spill] sm:$0xff] }
 0x281   : > { %v2363_v42 = vadd.f32 %v2362_v27, %v2216_v4  ;;  %v2424_v31 = vadd.f32 %v2423_v9, %v2262_v22  ;;  %v4348_v27 = vsel %vm1132_vm11, 1.0, %v5548_v7  ;;  %v5582_v9 = vld [vmem:[#allocation89_spill] sm:$0xff]  ;;  %v1484_v1 = vadd.f32 %v2741_v30, %v1483_v21  ;;  %v5589_v21 = vld [vmem:[#allocation39_spill] sm:$0xff] }
 0x282   : > { %v1839_v26 = vpop.permute.xlu1 %1838  ;;  %v2032_v56 = vpop.permute.xlu0 %2031  ;;  %vm1148_vm14 = vcmp.ge.f32.partialorder %v5582_v9, %v4104_v50  ;;  %5584 = vst [vmem:[#allocation18_spill] sm:$0xff] %v4358_v17  ;;  %vm1133_vm2 = vcmp.ge.f32.partialorder %v5587_v57, %v4033_v18  ;;  %vm1076_vm3 = vcmp.ge.f32.partialorder %v5588_v40, %v3774_v51  ;;  %vm1087_vm4 = vcmp.ge.f32.partialorder %v5589_v21, %v3833_v48 }
 0x283   : > { %v2201_v24 = vmul.f32 %v2742_v46, %v1839_v26  ;;  %v2247_v37 = vmul.f32 %v4348_v27, %v2032_v56  ;;  %v4368_v26 = vsel %vm1074_vm12, 1.0, %v5548_v7  ;;  %v5585_v56 = vld [vmem:[#allocation31_spill] sm:$0xff]  ;;  %v4395_v58 = vsel %vm1063_vm15, 1.0, %v5548_v7 }
 0x284   : > { %1878 = vbcast.lane.b32.xlu1 %v3602_v5, 376  ;;  %2071 = vbcast.lane.b32.xlu0 %v3641_v33, 360  ;;  %vm1075_vm0 = vcmp.ge.f32.partialorder %v5585_v56, %v3774_v51  ;;  %v4373_v5 = vsel %vm1148_vm14, 1.0, %v5548_v7  ;;  %v1502_v17 = vadd.f32 %v4004_v20, %v4010_v59  ;;  %v1485_v53 = vadd.f32 %v2742_v46, %v1484_v1  ;;  %v5593_v56 = vld [vmem:[#allocation26_spill] sm:$0xff] }
 0x285   : > { %v2343_v4 = vadd.f32 %v2342_v16, %v2201_v24  ;;  %v2404_v22 = vadd.f32 %v2403_v15, %v2247_v37  ;;  %v4379_v15 = vsel %vm1117_vm13, 1.0, %v5548_v7  ;;  %v5586_v16 = vld [vmem:[#allocation49_spill] sm:$0xff]  ;;  %v1468_v24 = vadd.f32 %v4368_v26, %v1467_v2  ;;  %v5591_v37 = vld [vmem:[#allocation38_spill] sm:$0xff] }
 0x286   : > { %v2099_v9 = vpop.permute.xlu1 %2098  ;;  %v1969_v63 = vpop.permute.xlu0 %1968  ;;  %vm1102_vm1 = vcmp.ge.f32.partialorder %v5586_v16, %v3853_v11  ;;  %vm1088_vm6 = vcmp.ge.f32.partialorder %v5591_v37, %v3833_v48  ;;  %v4408_v39 = vsel %vm1075_vm0, 1.0, %v5548_v7  ;;  %v4416_v2 = vsel %vm1133_vm2, 1.0, %v5548_v7 }
 0x287   : > { %v2263_v23 = vmul.f32 %v4373_v5, %v2099_v9  ;;  %v2232_v30 = vmul.f32 %v4379_v15, %v1969_v63  ;;  %v5590_v63 = vld [vmem:[#allocation20_spill] sm:$0xff]  ;;  %v2743_v46 = vsel %vm1087_vm4, 1.0, %v5548_v7  ;;  %vm1064_vm8 = vcmp.ge.f32.partialorder %v5593_v56, %v3800_v14 }
 0x288   : > { %2138 = vbcast.lane.b32.xlu1 %v3658_v25, 360  ;;  %2008 = vbcast.lane.b32.xlu0 %v3624_v45, 368  ;;  %vm1048_vm5 = vcmp.ge.f32.partialorder %v5590_v63, %v3777_v0  ;;  %v1503_v1 = vadd.f32 %v4074_v32, %v1502_v17  ;;  %v1469_v16 = vadd.f32 %v4408_v39, %v1468_v24  ;;  %v5599_v56 = vld [vmem:[#allocation40_spill] sm:$0xff]  ;;  %v5603_v63 = vld [vmem:[#allocation34_spill] sm:$0xff] }
 0x289   : > { %v2425_v9 = vadd.f32 %v2424_v31, %v2263_v23  ;;  %v2384_v19 = vadd.f32 %v2383_v62, %v2232_v30  ;;  %v4422_v62 = vsel %vm1102_vm1, 1.0, %v5548_v7  ;;  %v5592_v31 = vld [vmem:[#allocation62_spill] sm:$0xff]  ;;  %v4443_v23 = vsel %vm1076_vm3, 1.0, %v5548_v7  ;;  %v5594_v30 = vld [vmem:[#allocation33_spill] sm:$0xff] }
 0x28a   : > { %v2036_v13 = vpop.permute.xlu1 %2035  ;;  %v1906_v41 = vpop.permute.xlu0 %1905  ;;  %vm1118_vm7 = vcmp.ge.f32.partialorder %v5592_v31, %v3983_v6  ;;  %vm1077_vm9 = vcmp.ge.f32.partialorder %v5594_v30, %v3774_v51  ;;  %v1486_v21 = vadd.f32 %v2743_v46, %v1485_v53  ;;  %v5597_v31 = vld [vmem:[#allocation41_spill] sm:$0xff]  ;;  %v4465_v53 = vsel %vm1064_vm8, 1.0, %v5548_v7 }
 0x28b   : > { %v2248_v20 = vmul.f32 %v4416_v2, %v2036_v13  ;;  %v2217_v59 = vmul.f32 %v4422_v62, %v1906_v41  ;;  %v1452_v13 = vadd.f32 %v4395_v58, %v1451_v12  ;;  %v4448_v17 = vsel %vm1118_vm7, 1.0, %v5548_v7  ;;  %v5595_v12 = vld [vmem:[#allocation52_spill] sm:$0xff] }
 0x28c   : > { %2075 = vbcast.lane.b32.xlu1 %v3641_v33, 368  ;;  %1945 = vbcast.lane.b32.xlu0 %v3613_v43, 376  ;;  %vm1103_vm10 = vcmp.ge.f32.partialorder %v5595_v12, %v3853_v11  ;;  %vm1089_vm12 = vcmp.ge.f32.partialorder %v5597_v31, %v3833_v48  ;;  %v1504_v37 = vadd.f32 %v4226_v34, %v1503_v1  ;;  %v4477_v14 = vsel %vm1077_vm9, 1.0, %v5548_v7  ;;  %v5601_v31 = vld [vmem:[#allocation35_spill] sm:$0xff] }
 0x28d   : > { %v2405_v57 = vadd.f32 %v2404_v22, %v2248_v20  ;;  %v2364_v41 = vadd.f32 %v2363_v42, %v2217_v59  ;;  %v2744_v42 = vsel %vm1088_vm6, 1.0, %v5548_v7  ;;  %v5596_v22 = vld [vmem:[#allocation92_spill] sm:$0xff]  ;;  %v1470_v20 = vadd.f32 %v4443_v23, %v1469_v16 }
 0x28e   : > { %v1973_v32 = vpop.permute.xlu1 %1972  ;;  %v1843_v43 = vpop.permute.xlu0 %1842  ;;  %vm1149_vm11 = vcmp.ge.f32.partialorder %v5596_v22, %v4104_v50  ;;  %v5598_v59 = vld [vmem:[#allocation32_spill] sm:$0xff]  ;;  %vm1090_vm14 = vcmp.ge.f32.partialorder %v5599_v56, %v3833_v48  ;;  %v4498_v12 = vsel %vm1089_vm12, 1.0, %v5548_v7  ;;  %v4504_v22 = vsel %vm1048_vm5, 1.0, %v5548_v7 }
 0x28f   : > { %v2233_v40 = vmul.f32 %v4448_v17, %v1973_v32  ;;  %v2202_v24 = vmul.f32 %v2743_v46, %v1843_v43  ;;  %vm1078_vm13 = vcmp.ge.f32.partialorder %v5598_v59, %v3774_v51  ;;  %v5600_v16 = vld [vmem:[#allocation76_spill] sm:$0xff]  ;;  %vm1079_vm0 = vcmp.ge.f32.partialorder %v5601_v31, %v3774_v51 }
 0x290   : > { %2142 = vbcast.lane.b32.xlu1 %v3658_v25, 368  ;;  %2012 = vbcast.lane.b32.xlu0 %v3624_v45, 376  ;;  %v2759_v45 = vsel %vm1103_vm10, 1.0, %v5548_v7  ;;  %vm1134_vm15 = vcmp.ge.f32.partialorder %v5600_v16, %v4033_v18  ;;  %v4519_v0 = vsel %vm1078_vm13, 1.0, %v5548_v7  ;;  %vm1080_vm1 = vcmp.ge.f32.partialorder %v5603_v63, %v3774_v51  ;;  %v5606_v16 = vld [vmem:[#allocation43_spill] sm:$0xff] }
 0x291   : > { %v2385_v46 = vadd.f32 %v2384_v19, %v2233_v40  ;;  %v2344_v32 = vadd.f32 %v2343_v4, %v2202_v24  ;;  %v4489_v19 = vsel %vm1149_vm11, 1.0, %v5548_v7  ;;  %v1487_v4 = vadd.f32 %v2744_v42, %v1486_v21  ;;  %5602 = vst [vmem:[#allocation21_spill] sm:$0xff] %v4519_v0 }
 0x292   : > { %v1910_v34 = vpop.permute.xlu1 %1909  ;;  %v2103_v1 = vpop.permute.xlu0 %2102  ;;  %v4507_v21 = vadd.f32 %v4465_v53, %v1452_v13  ;;  %v1505_v40 = vadd.f32 %v4300_v49, %v1504_v37  ;;  %v1471_v24 = vadd.f32 %v4477_v14, %v1470_v20  ;;  %v5605_v37 = vld [vmem:[#allocation91_spill] sm:$0xff]  ;;  %vm1091_vm4 = vcmp.ge.f32.partialorder %v5606_v16, %v3833_v48 }
 0x293   : > { %v2218_v30 = vmul.f32 %v2759_v45, %v1910_v34  ;;  %v2264_v43 = vmul.f32 %v4489_v19, %v2103_v1  ;;  %v1488_v13 = vadd.f32 %v4498_v12, %v1487_v4  ;;  %vm1150_vm3 = vcmp.ge.f32.partialorder %v5605_v37, %v4104_v50  ;;  %v5609_v37 = vld [vmem:[#allocation51_spill] sm:$0xff] }
 0x294   : > { %2146 = vbcast.lane.b32.xlu1 %v3658_v25, 376  ;;  %2079 = vbcast.lane.b32.xlu0 %v3641_v33, 376  ;;  %v4527_v33 = vsel %vm1134_vm15, 1.0, %v5548_v7  ;;  %v1506_v4 = vadd.f32 %v4422_v62, %v1505_v40  ;;  %v4549_v56 = vsel %vm1079_vm0, 1.0, %v5548_v7  ;;  %vm1104_vm6 = vcmp.ge.f32.partialorder %v5609_v37, %v3853_v11 }
 0x295   : > { %v2365_v34 = vadd.f32 %v2364_v41, %v2218_v30  ;;  %v2426_v1 = vadd.f32 %v2425_v9, %v2264_v43  ;;  %v4534_v9 = vsel %vm1090_vm14, 1.0, %v5548_v7  ;;  %v5604_v41 = vld [vmem:[#allocation65_spill] sm:$0xff]  ;;  %v1472_v30 = vadd.f32 %v4519_v0, %v1471_v24  ;;  %5607 = vst [vmem:[#allocation25_spill] sm:$0xff] %v4549_v56  ;;  %v5608_v43 = vld [vmem:[#allocation42_spill] sm:$0xff] }
 0x296   : > { %v1847_v49 = vpop.permute.xlu1 %1846  ;;  %v2040_v25 = vpop.permute.xlu0 %2039  ;;  %vm1119_vm2 = vcmp.ge.f32.partialorder %v5604_v41, %v3983_v6  ;;  %vm1092_vm5 = vcmp.ge.f32.partialorder %v5608_v43, %v3833_v48  ;;  %v4558_v40 = vsel %vm1150_vm3, 1.0, %v5548_v7  ;;  %v1489_v43 = vadd.f32 %v4534_v9, %v1488_v13 }
 0x297   : > { %v2203_v20 = vmul.f32 %v2744_v42, %v1847_v49  ;;  %v2249_v59 = vmul.f32 %v4527_v33, %v2040_v25  ;;  %v1523_v42 = vadd.f32 %v4080_v38, %v4068_v61  ;;  %v4564_v31 = vsel %vm1119_vm2, 1.0, %v5548_v7 }
 0x298   : > { %v1473_v41 = vadd.f32 %v4549_v56, %v1472_v30  ;;  %v2760_v16 = vsel %vm1104_vm6, 1.0, %v5548_v7  ;;  %vm396_vm7 = vcmask 7168   ;;  %v1544_v30 = vadd.f32 %v4112_v60, %v4118_v10  ;;  %v5615_v60 = vld [vmem:[#allocation44_spill] sm:$0xff] }
 0x299   : > { %v2345_v49 = vadd.f32 %v2344_v32, %v2203_v20  ;;  %v2406_v25 = vadd.f32 %v2405_v57, %v2249_v59  ;;  %v1524_v61 = vadd.f32 %v4148_v52, %v1523_v42  ;;  %v4574_v32 = vsel %vm1091_vm4, 1.0, %v5548_v7  ;;  %398 = vst.msk [vmem:[#allocation5] sm:$0xff] %vm396_vm7, %v5548_v7  ;;  %397 = vst.msk [vmem:[#allocation4] sm:$0xff] %vm396_vm7, %v5548_v7 }
 0x29a   : > { %v2107_v62 = vpop.permute.xlu1 %2106  ;;  %v1977_v24 = vpop.permute.xlu0 %1976  ;;  %v1507_v20 = vadd.f32 %v2759_v45, %v1506_v4  ;;  %v4577_v59 = vsel %vm1092_vm5, 1.0, %v5548_v7  ;;  %v4584_v52 = vsel %vm1080_vm1, 1.0, %v5548_v7  ;;  %v5612_v45 = vld [vmem:[#allocation45_spill] sm:$0xff]  ;;  %v5613_v4 = vld [vmem:[#allocation54_spill] sm:$0xff]  ;;  %vm1094_vm11 = vcmp.ge.f32.partialorder %v5615_v60, %v3833_v48 }
 0x29b   : > { %v2265_v38 = vmul.f32 %v4558_v40, %v2107_v62  ;;  %v2234_v57 = vmul.f32 %v4564_v31, %v1977_v24  ;;  %5610 = vst [vmem:[#allocation50_spill] sm:$0xff] %v4577_v59  ;;  %5611 = vst [vmem:[#allocation90_spill] sm:$0xff] %v4584_v52  ;;  %vm1093_vm8 = vcmp.ge.f32.partialorder %v5612_v45, %v3833_v48 }
 0x29c   : > { %vm1105_vm9 = vcmp.ge.f32.partialorder %v5613_v4, %v3853_v11  ;;  %v1525_v37 = vadd.f32 %v4262_v35, %v1524_v61  ;;  %v1545_v10 = vadd.f32 %v4220_v8, %v1544_v30 }
 0x29d   : > { %v2427_v13 = vadd.f32 %v2426_v1, %v2265_v38  ;;  %v2386_v42 = vadd.f32 %v2385_v46, %v2234_v57  ;;  %v1490_v1 = vadd.f32 %v4574_v32, %v1489_v43  ;;  %v5614_v46 = vld [vmem:[#allocation79_spill] sm:$0xff]  ;;  %v1508_v43 = vadd.f32 %v2760_v16, %v1507_v20  ;;  %v5616_v57 = vld [vmem:[#allocation64_spill] sm:$0xff] }
 0x29e   : > { %v1914_v51 = vpop.permute.xlu1 %1913  ;;  %v1784_v63 = vpop.permute.xlu0 %1783  ;;  %vm1135_vm10 = vcmp.ge.f32.partialorder %v5614_v46, %v4033_v18  ;;  %v4609_v38 = vadd.f32 %v4584_v52, %v1473_v41  ;;  %vm1120_vm12 = vcmp.ge.f32.partialorder %v5616_v57, %v3983_v6  ;;  %v2761_v35 = vsel %vm1105_vm9, 1.0, %v5548_v7 }
 0x29f   : > { %v2219_v62 = vmul.f32 %v2760_v16, %v1914_v51  ;;  %v2188_v24 = vmul.f32 %v4335_v36, %v1784_v63  ;;  %v5617_v36 = vld [vmem:[#allocation94_spill] sm:$0xff]  ;;  %v4621_v20 = vsel %vm1135_vm10, 1.0, %v5548_v7  ;;  %v4624_v41 = vadd.f32 %v4577_v59, %v1490_v1  ;;  %v5618_v51 = vld [vmem:[#allocation53_spill] sm:$0xff] }
 0x2a0   : > { %vm1151_vm13 = vcmp.ge.f32.partialorder %v5617_v36, %v4104_v50  ;;  %v1526_v16 = vadd.f32 %v4379_v15, %v1525_v37  ;;  %vm1106_vm14 = vcmp.ge.f32.partialorder %v5618_v51, %v3853_v11  ;;  %v1546_v63 = vadd.f32 %v4348_v27, %v1545_v10  ;;  %v5620_v37 = vld [vmem:[#allocation135_spill] sm:$0xff]  ;;  %v5621_v27 = vld [vmem:[#allocation104_spill] sm:$0xff] }
 0x2a1   : > { %v2366_v56 = vadd.f32 %v2365_v34, %v2219_v62  ;;  %v2325_v46 = vadd.f32 %v3974_v47, %v2188_v24  ;;  %v4630_v47 = vsel %vm1093_vm8, 1.0, %v5548_v7  ;;  %v1565_v34 = vadd.f32 %v4184_v54, %v4190_v28  ;;  %v5622_v10 = vld [vmem:[#allocation136_spill] sm:$0xff] }
 0x2a2   : > { %v1851_v61 = vpop.permute.xlu1 %1850  ;;  %v2044_v8 = vpop.permute.xlu0 %2043  ;;  %v2776_v45 = vsel %vm1120_vm12, 1.0, %v5548_v7  ;;  %v1509_v1 = vadd.f32 %v2761_v35, %v1508_v43  ;;  %v4649_v15 = vsel %vm1151_vm13, 1.0, %v5548_v7  ;;  %v5624_v43 = vld [vmem:[#allocation120_spill] sm:$0xff]  ;;  %v1547_v51 = vadd.f32 %v4416_v2, %v1546_v63  ;;  %v5631_v2 = vld [vmem:[#allocation66_spill] sm:$0xff]  ;;  %v5632_v63 = vld [vmem:[#allocation67_spill] sm:$0xff] }
 0x2a3   : > { %v2204_v4 = vmul.f32 %v4498_v12, %v1851_v61  ;;  %v2250_v30 = vmul.f32 %v4621_v20, %v2044_v8  ;;  %v1566_v62 = vadd.f32 %v4306_v55, %v1565_v34  ;;  %v5619_v12 = vld [vmem:[#allocation103_spill] sm:$0xff]  ;;  %v2148_v61 = vmul.f32 %v5622_v10, %v5621_v27 }
 0x2a4   : > { %v2149_v24 = vmul.f32 %v5620_v37, %v5619_v12  ;;  %v5623_v8 = vld [vmem:[#allocation119_spill] sm:$0xff]  ;;  %v2164_v55 = vmul.f32 %v3875_v44, %v5624_v43  ;;  %v1527_v34 = vadd.f32 %v4448_v17, %v1526_v16  ;;  %v5627_v37 = vld [vmem:[#allocation137_spill] sm:$0xff]  ;;  %v5628_v44 = vld [vmem:[#allocation122_spill] sm:$0xff]  ;;  %v4677_v17 = vsel %vm1094_vm11, 1.0, %v5548_v7 }
 0x2a5   : > { %v2346_v54 = vadd.f32 %v2345_v49, %v2204_v4  ;;  %v2407_v28 = vadd.f32 %v2406_v25, %v2250_v30  ;;  %v2165_v57 = vmul.f32 %v3872_v3, %v5623_v8  ;;  %v4665_v30 = vsel %vm1106_vm14, 1.0, %v5548_v7  ;;  %v5625_v12 = vld [vmem:[#allocation55_spill] sm:$0xff]  ;;  %v5626_v3 = vld [vmem:[#allocation106_spill] sm:$0xff]  ;;  %v5629_v16 = vld [vmem:[#allocation56_spill] sm:$0xff] }
 0x2a6   : > { %v2111_v49 = vpop.permute.xlu1 %2110  ;;  %v1981_v25 = vpop.permute.xlu0 %1980  ;;  %vm1108_vm15 = vcmp.ge.f32.partialorder %v5625_v12, %v3853_v11  ;;  %v2150_v27 = vmul.f32 %v5627_v37, %v5626_v3  ;;  %v2166_v10 = vmul.f32 %v3919_v29, %v5628_v44  ;;  %vm1107_vm0 = vcmp.ge.f32.partialorder %v5629_v16, %v3853_v11  ;;  %v5630_v44 = vld [vmem:[#allocation78_spill] sm:$0xff] }
 0x2a7   : > { %v2266_v36 = vmul.f32 %v4649_v15, %v2111_v49  ;;  %v2235_v4 = vmul.f32 %v2776_v45, %v1981_v25  ;;  %v2276_v49 = vadd.f32 %v2149_v24, %v2148_v61  ;;  %v2297_v25 = vadd.f32 %v2165_v57, %v2164_v55  ;;  %v5635_v24 = vld [vmem:[#allocation121_spill] sm:$0xff]  ;;  %v5636_v61 = vld [vmem:[#allocation142_spill] sm:$0xff] }
 0x2a8   : > { %v1567_v3 = vadd.f32 %v4373_v5, %v1566_v62  ;;  %v1510_v29 = vadd.f32 %v4665_v30, %v1509_v1  ;;  %vm1136_vm1 = vcmp.ge.f32.partialorder %v5630_v44, %v4033_v18  ;;  %v1528_v60 = vadd.f32 %v4564_v31, %v1527_v34 }
 0x2a9   : > { %v2428_v8 = vadd.f32 %v2427_v13, %v2266_v36  ;;  %v2387_v43 = vadd.f32 %v2386_v42, %v2235_v4  ;;  %vm1122_vm2 = vcmp.ge.f32.partialorder %v5631_v2, %v3983_v6  ;;  %v2277_v13 = vadd.f32 %v2276_v49, %v2150_v27  ;;  %v5639_v27 = vld [vmem:[#allocation141_spill] sm:$0xff] }
 0x2aa   : > { %v1918_v37 = vpop.permute.xlu1 %1917  ;;  %v1788_v52 = vpop.permute.xlu0 %1787  ;;  %v2298_v42 = vadd.f32 %v2297_v25, %v2166_v10  ;;  %v4694_v5 = vsel %vm1107_vm0, 1.0, %v5548_v7  ;;  %vm1121_vm3 = vcmp.ge.f32.partialorder %v5632_v63, %v3983_v6  ;;  %v1548_v1 = vadd.f32 %v4527_v33, %v1547_v51  ;;  %v5637_v33 = vld [vmem:[#allocation93_spill] sm:$0xff]  ;;  %v5640_v51 = vld [vmem:[#allocation124_spill] sm:$0xff] }
 0x2ab   : > { %v2220_v0 = vmul.f32 %v2761_v35, %v1918_v37  ;;  %v2189_v59 = vmul.f32 %v4368_v26, %v1788_v52  ;;  %v5633_v26 = vld [vmem:[#allocation105_spill] sm:$0xff]  ;;  %v5634_v52 = vld [vmem:[#allocation138_spill] sm:$0xff]  ;;  %v2167_v57 = vmul.f32 %v5636_v61, %v5635_v24  ;;  %v1568_v55 = vadd.f32 %v4489_v19, %v1567_v3  ;;  %v5641_v19 = vld [vmem:[#allocation144_spill] sm:$0xff] }
 0x2ac   : > { %v2151_v62 = vmul.f32 %v5634_v52, %v5633_v26  ;;  %v2792_v4 = vsel %vm1136_vm1, 1.0, %v5548_v7  ;;  %vm1152_vm4 = vcmp.ge.f32.partialorder %v5637_v33, %v4104_v50  ;;  %v2168_v49 = vmul.f32 %v5641_v19, %v5640_v51  ;;  %v4717_v3 = vld [vmem:[%s328_s18] sm:$0xff]  ;;  %v5646_v61 = vld [vmem:[#allocation80_spill] sm:$0xff]  ;;  %v5651_v33 = vld [vmem:[#allocation123_spill] sm:$0xff] }
 0x2ad   : > { %v2367_v31 = vadd.f32 %v2366_v56, %v2220_v0  ;;  %v2326_v35 = vadd.f32 %v2325_v46, %v2189_v59  ;;  %v1529_v0 = vadd.f32 %v2776_v45, %v1528_v60  ;;  %v5638_v46 = vld [vmem:[#allocation108_spill] sm:$0xff]  ;;  %v2299_v25 = vadd.f32 %v2298_v42, %v2167_v57  ;;  %5642 = vst [vmem:[#allocation24_spill] sm:$0xff] %v4717_v3  ;;  %v5645_v24 = vld [vmem:[#allocation69_spill] sm:$0xff]  ;;  %v5654_v19 = vld [vmem:[#allocation110_spill] sm:$0xff] }
 0x2ae   : > { %v1855_v34 = vpop.permute.xlu1 %1854  ;;  %v2048_v36 = vpop.permute.xlu0 %2047  ;;  %v2152_v10 = vmul.f32 %v5639_v27, %v5638_v46  ;;  %v2278_v16 = vadd.f32 %v2277_v13, %v2151_v62  ;;  %v4729_v45 = vadd.f32 %v4630_v47, %v4624_v41  ;;  %v1569_v60 = vadd.f32 %v4558_v40, %v1568_v55  ;;  %v5649_v55 = vld [vmem:[#allocation107_spill] sm:$0xff] }
 0x2af   : > { %v2205_v56 = vmul.f32 %v4534_v9, %v1855_v34  ;;  %v2251_v59 = vmul.f32 %v2792_v4, %v2048_v36  ;;  %v2777_v9 = vsel %vm1121_vm3, 1.0, %v5548_v7  ;;  %v1549_v13 = vadd.f32 %v4621_v20, %v1548_v1  ;;  %v5644_v1 = vld [vmem:[#allocation81_spill] sm:$0xff]  ;;  %v5650_v34 = vld [vmem:[#allocation140_spill] sm:$0xff] }
 0x2b0   : > { %v4741_v63 = vsel %vm1108_vm15, 1.0, %v5548_v7  ;;  %v4747_v40 = vsel %vm1122_vm2, 1.0, %v5548_v7  ;;  %v1511_v20 = vadd.f32 %v4694_v5, %v1510_v29  ;;  %vm1137_vm5 = vcmp.ge.f32.partialorder %v5644_v1, %v4033_v18  ;;  %v5648_v29 = vld [vmem:[#allocation47_spill] sm:$0xff] }
 0x2b1   : > { %v4719_v37 = vadd.f32 %v2346_v54, %v2205_v56  ;;  %v4721_v44 = vadd.f32 %v2407_v28, %v2251_v59  ;;  %v2808_v54 = vsel %vm1152_vm4, 1.0, %v5548_v7  ;;  %5643 = vst [vmem:[#allocation29_spill] sm:$0xff] %v4741_v63  ;;  %v2279_v52 = vadd.f32 %v2278_v16, %v2152_v10  ;;  %v5652_v56 = vld [vmem:[#allocation146_spill] sm:$0xff]  ;;  %v5653_v16 = vld [vmem:[#allocation96_spill] sm:$0xff] }
 0x2b2   : > { %v2115_v42 = vpop.permute.xlu1 %2114  ;;  %v1985_v28 = vpop.permute.xlu0 %1984  ;;  %v2300_v62 = vadd.f32 %v2299_v25, %v2168_v49  ;;  %v1530_v12 = vadd.f32 %v2777_v9, %v1529_v0  ;;  %vm1123_vm6 = vcmp.ge.f32.partialorder %v5645_v24, %v3983_v6  ;;  %vm1138_vm8 = vcmp.ge.f32.partialorder %v5646_v61, %v4033_v18  ;;  %v5655_v49 = vld [vmem:[#allocation143_spill] sm:$0xff] }
 0x2b3   : > { %v2267_v26 = vmul.f32 %v2808_v54, %v2115_v42  ;;  %v2236_v41 = vmul.f32 %v2777_v9, %v1985_v28  ;;  %2479 = vadd.xlane.f32.xlu0 %v4717_v3  ;;  %vm1095_vm9 = vcmp.ge.f32.partialorder %v5648_v29, %v3833_v48  ;;  %v2153_v36 = vmul.f32 %v5650_v34, %v5649_v55  ;;  %v5657_v9 = vld [vmem:[#allocation148_spill] sm:$0xff]  ;;  %v5658_v42 = vld [vmem:[#allocation58_spill] sm:$0xff]  ;;  %v5663_v24 = vld [vmem:[#allocation83_spill] sm:$0xff] }
 0x2b4   : > { %v2169_v59 = vmul.f32 %v5652_v56, %v5651_v33  ;;  %v1570_v0 = vadd.f32 %v4649_v15, %v1569_v60  ;;  %v1550_v46 = vadd.f32 %v2792_v4, %v1549_v13  ;;  %vm1153_vm10 = vcmp.ge.f32.partialorder %v5653_v16, %v4104_v50  ;;  %v5656_v4 = vld [vmem:[#allocation126_spill] sm:$0xff]  ;;  %v5664_v34 = vld [vmem:[#allocation95_spill] sm:$0xff]  ;;  %v5671_v16 = vld [vmem:[#allocation149_spill] sm:$0xff] }
 0x2b5   : > { %v4757_v57 = vadd.f32 %v2428_v8, %v2267_v26  ;;  %v4759_v2 = vadd.f32 %v2387_v43, %v2236_v41  ;;  %v4776_v51 = vsel %vm1137_vm5, 1.0, %v5548_v7  ;;  %v2154_v25 = vmul.f32 %v5655_v49, %v5654_v19  ;;  %v5660_v26 = vld [vmem:[#allocation68_spill] sm:$0xff]  ;;  %v5665_v56 = vld [vmem:[#allocation71_spill] sm:$0xff] }
 0x2b6   : > { %v1922_v27 = vpop.permute.xlu1 %1921  ;;  %v1792_v10 = vpop.permute.xlu0 %1791  ;;  %v2280_v15 = vadd.f32 %v2279_v52, %v2153_v36  ;;  %v2170_v60 = vmul.f32 %v5657_v9, %v5656_v4  ;;  %v2301_v13 = vadd.f32 %v2300_v62, %v2169_v59  ;;  %vm1109_vm11 = vcmp.ge.f32.partialorder %v5658_v42, %v3853_v11  ;;  %v5673_v4 = vld [vmem:[#allocation98_spill] sm:$0xff]  ;;  %v5677_v42 = vld [vmem:[#allocation147_spill] sm:$0xff] }
 0x2b7   : > { %5647 = vst [vmem:[#allocation36_spill] sm:$0xff] %v4759_v2  ;;  %v2221_v8 = vmul.f32 %v4665_v30, %v1922_v27  ;;  %v2190_v43 = vmul.f32 %v4408_v39, %v1792_v10  ;;  %v1531_v28 = vadd.f32 %v4747_v40, %v1530_v12  ;;  %vm1124_vm12 = vcmp.ge.f32.partialorder %v5660_v26, %v3983_v6  ;;  %v5670_v10 = vld [vmem:[#allocation125_spill] sm:$0xff]  ;;  %v5691_v3 = vld [vmem:[#allocation111_spill] sm:$0xff] }
 0x2b8   : > { %v1571_v41 = vadd.f32 %v2808_v54, %v1570_v0  ;;  %v1551_v55 = vadd.f32 %v4776_v51, %v1550_v46  ;;  %v4808_v54 = vsel %vm1153_vm10, 1.0, %v5548_v7  ;;  %v4814_v62 = vsel %vm1138_vm8, 1.0, %v5548_v7  ;;  %v5668_v0 = vld [vmem:[#allocation109_spill] sm:$0xff] }
 0x2b9   : > { %v4784_v30 = vadd.f32 %v2367_v31, %v2221_v8  ;;  %v4786_v39 = vadd.f32 %v2326_v35, %v2190_v43  ;;  %v4800_v31 = vsel %vm1123_vm6, 1.0, %v5548_v7  ;;  %v5662_v35 = vld [vmem:[#allocation57_spill] sm:$0xff]  ;;  %v1512_v12 = vadd.f32 %v4741_v63, %v1511_v20 }
 0x2ba   : > { %v4791_v1 = vpop.permute.xlu1 %1858  ;;  %v4793_v52 = vpop.permute.xlu0 %2051  ;;  %5661 = vst [vmem:[#allocation28_spill] sm:$0xff] %v4800_v31  ;;  %vm1110_vm13 = vcmp.ge.f32.partialorder %v5662_v35, %v3853_v11  ;;  %vm1139_vm14 = vcmp.ge.f32.partialorder %v5663_v24, %v4033_v18  ;;  %vm1154_vm15 = vcmp.ge.f32.partialorder %v5664_v34, %v4104_v50  ;;  %v2281_v36 = vadd.f32 %v2280_v15, %v2154_v25  ;;  %v5669_v46 = vld [vmem:[#allocation145_spill] sm:$0xff]  ;;  %v5672_v15 = vld [vmem:[#allocation82_spill] sm:$0xff] }
 0x2bb   : > { %5659 = vst [vmem:[#allocation74_spill] sm:$0xff] %v4784_v30  ;;  %v2302_v33 = vadd.f32 %v2301_v13, %v2170_v60  ;;  %vm1125_vm0 = vcmp.ge.f32.partialorder %v5665_v56, %v3983_v6  ;;  %v1532_v59 = vadd.f32 %v4800_v31, %v1531_v28  ;;  %v4828_v61 = vsel %vm1124_vm12, 1.0, %v5548_v7  ;;  %v5676_v13 = vld [vmem:[#allocation112_spill] sm:$0xff]  ;;  %v5703_v30 = vld [vmem:[#allocation59_spill] sm:$0xff] }
 0x2bc   : > { %5666 = vst [vmem:[#allocation63_spill] sm:$0xff] %v4828_v61  ;;  %v4834_v20 = vsel %vm1109_vm11, 1.0, %v5548_v7  ;;  %v2155_v27 = vmul.f32 %v5669_v46, %v5668_v0  ;;  %v2171_v8 = vmul.f32 %v5671_v16, %v5670_v10  ;;  %v1572_v19 = vadd.f32 %v4808_v54, %v1571_v41  ;;  %v5678_v41 = vld [vmem:[#allocation128_spill] sm:$0xff]  ;;  %v5680_v46 = vld [vmem:[#allocation46_spill] sm:$0xff] }
 0x2bd   : > { %5667 = vst [vmem:[#allocation89_spill] sm:$0xff] %v4834_v20  ;;  %v1552_v25 = vadd.f32 %v4814_v62, %v1551_v55  ;;  %vm1140_vm1 = vcmp.ge.f32.partialorder %v5672_v15, %v4033_v18  ;;  %vm1155_vm2 = vcmp.ge.f32.partialorder %v5673_v4, %v4104_v50  ;;  %v4851_v9 = vsel %vm1154_vm15, 1.0, %v5548_v7  ;;  %v5679_v55 = vld [vmem:[#allocation151_spill] sm:$0xff]  ;;  %v5687_v4 = vld [vmem:[#allocation97_spill] sm:$0xff] }
 0x2be   : > { %v4840_v43 = vpop.permute.xlu1 %2118  ;;  %v4843_v49 = vpop.permute.xlu0 %1988  ;;  %5674 = vst [vmem:[#allocation27_spill] sm:$0xff] %v4851_v9  ;;  %v4857_v60 = vsel %vm1139_vm14, 1.0, %v5548_v7  ;;  %v2156_v28 = vmul.f32 %v5677_v42, %v5676_v13  ;;  %v2282_v26 = vadd.f32 %v2281_v36, %v2155_v27  ;;  %v2172_v34 = vmul.f32 %v5679_v55, %v5678_v41  ;;  %v5681_v36 = vld [vmem:[#allocation70_spill] sm:$0xff]  ;;  %v5688_v41 = vld [vmem:[#allocation60_spill] sm:$0xff]  ;;  %v5689_v15 = vld [vmem:[#allocation73_spill] sm:$0xff] }
 0x2bf   : > { %5675 = vst [vmem:[#allocation31_spill] sm:$0xff] %v4857_v60  ;;  %v2303_v0 = vadd.f32 %v2302_v33, %v2171_v8  ;;  %vm1096_vm3 = vcmp.ge.f32.partialorder %v5680_v46, %v3833_v48  ;;  %v1533_v10 = vadd.f32 %v4828_v61, %v1532_v59  ;;  %v1493_v16 = vadd.f32 %v4677_v17, %v4729_v45  ;;  %v5692_v61 = vld [vmem:[#allocation150_spill] sm:$0xff] }
 0x2c0   : > { %v4872_v24 = vsel %vm1095_vm9, 1.0, %v5548_v7  ;;  %vm1126_vm4 = vcmp.ge.f32.partialorder %v5681_v36, %v3983_v6  ;;  %v1573_v8 = vadd.f32 %v4851_v9, %v1572_v19  ;;  %v1553_v59 = vadd.f32 %v4857_v60, %v1552_v25  ;;  %v5686_v25 = vld [vmem:[#allocation85_spill] sm:$0xff]  ;;  %v5696_v36 = vld [vmem:[#allocation100_spill] sm:$0xff] }
 0x2c1   : > { %v4886_v45 = vsel %vm1125_vm0, 1.0, %v5548_v7  ;;  %v4892_v29 = vsel %vm1155_vm2, 1.0, %v5548_v7  ;;  %v1513_v13 = vadd.f32 %v4834_v20, %v1512_v12  ;;  %v4899_v19 = vsel %vm1140_vm1, 1.0, %v5548_v7 }
 0x2c2   : > { %v4876_v27 = vpop.permute.xlu1 %1925  ;;  %v4878_v33 = vpop.permute.xlu0 %1795  ;;  %5682 = vst [vmem:[#allocation49_spill] sm:$0xff] %v4886_v45  ;;  %5683 = vst [vmem:[#allocation77_spill] sm:$0xff] %v4892_v29  ;;  %v4905_v56 = vsel %vm1110_vm13, 1.0, %v5548_v7  ;;  %vm1141_vm5 = vcmp.ge.f32.partialorder %v5686_v25, %v4033_v18  ;;  %vm1156_vm6 = vcmp.ge.f32.partialorder %v5687_v4, %v4104_v50  ;;  %v2283_v42 = vadd.f32 %v2282_v26, %v2156_v28  ;;  %v5693_v4 = vld [vmem:[#allocation127_spill] sm:$0xff]  ;;  %v5694_v28 = vld [vmem:[#allocation17_spill] sm:$0xff] }
 0x2c3   : > { %5684 = vst [vmem:[#allocation30_spill] sm:$0xff] %v4899_v19  ;;  %5685 = vst [vmem:[#allocation39_spill] sm:$0xff] %v4905_v56  ;;  %v2304_v12 = vadd.f32 %v2303_v0, %v2172_v34  ;;  %vm1111_vm8 = vcmp.ge.f32.partialorder %v5688_v41, %v3853_v11  ;;  %vm1127_vm9 = vcmp.ge.f32.partialorder %v5689_v15, %v3983_v6  ;;  %v4920_v35 = vsel %vm1126_vm4, 1.0, %v5548_v7 }
 0x2c4   : > { %v1534_v55 = vadd.f32 %v4886_v45, %v1533_v10  ;;  %5690 = vst [vmem:[#allocation20_spill] sm:$0xff] %v4920_v35  ;;  %v2157_v60 = vmul.f32 %v5692_v61, %v5691_v3  ;;  %v2173_v26 = vmul.f32 %v5694_v28, %v5693_v4  ;;  %v1574_v20 = vadd.f32 %v4892_v29, %v1573_v8  ;;  %v5695_v45 = vld [vmem:[#allocation84_spill] sm:$0xff]  ;;  %v5699_v61 = vld [vmem:[#allocation114_spill] sm:$0xff] }
 0x2c5   : > { %v1554_v10 = vadd.f32 %v4899_v19, %v1553_v59  ;;  %vm1142_vm10 = vcmp.ge.f32.partialorder %v5695_v45, %v4033_v18  ;;  %vm1157_vm11 = vcmp.ge.f32.partialorder %v5696_v36, %v4104_v50  ;;  %v4937_v31 = vsel %vm1156_vm6, 1.0, %v5548_v7  ;;  %v5700_v4 = vld [vmem:[#allocation88_spill] sm:$0xff]  ;;  %v5701_v59 = vld [vmem:[#allocation130_spill] sm:$0xff]  ;;  %v5702_v19 = vld [vmem:[#allocation23_spill] sm:$0xff] }
 0x2c6   : > { %v4926_v34 = vpop.permute.xlu1 %1862  ;;  %v4928_v0 = vpop.permute.xlu0 %2055  ;;  %5697 = vst [vmem:[#allocation38_spill] sm:$0xff] %v4937_v31  ;;  %v4943_v3 = vsel %vm1141_vm5, 1.0, %v5548_v7  ;;  %v2158_v8 = vmul.f32 %v5700_v4, %v5699_v61  ;;  %v2284_v28 = vadd.f32 %v2283_v42, %v2157_v60  ;;  %v2174_v29 = vmul.f32 %v5702_v19, %v5701_v59  ;;  %v5705_v61 = vld [vmem:[#allocation72_spill] sm:$0xff]  ;;  %v5716_v59 = vld [vmem:[#allocation113_spill] sm:$0xff] }
 0x2c7   : > { %5698 = vst [vmem:[#allocation62_spill] sm:$0xff] %v4943_v3  ;;  %v2305_v9 = vadd.f32 %v2304_v12, %v2173_v26  ;;  %vm1112_vm12 = vcmp.ge.f32.partialorder %v5703_v30, %v3853_v11  ;;  %v1514_v2 = vadd.f32 %v4905_v56, %v1513_v13  ;;  %v1535_v63 = vadd.f32 %v4920_v35, %v1534_v55  ;;  %v5713_v26 = vld [vmem:[#allocation99_spill] sm:$0xff] }
 0x2c8   : > { %v4957_v25 = vsel %vm1111_vm8, 1.0, %v5548_v7  ;;  %vm1128_vm13 = vcmp.ge.f32.partialorder %v5705_v61, %v3983_v6  ;;  %v1575_v42 = vadd.f32 %v4937_v31, %v1574_v20  ;;  %v1555_v12 = vadd.f32 %v4943_v3, %v1554_v10  ;;  %v5722_v6 = vld [vmem:[#allocation102_spill] sm:$0xff] }
 0x2c9   : > { %5704 = vst [vmem:[#allocation26_spill] sm:$0xff] %v4957_v25  ;;  %v4971_v13 = vsel %vm1127_vm9, 1.0, %v5548_v7  ;;  %v1494_v41 = vadd.f32 %v4872_v24, %v1493_v16  ;;  %v4978_v55 = vsel %vm1157_vm11, 1.0, %v5548_v7  ;;  %v4984_v20 = vsel %vm1096_vm3, 1.0, %v5548_v7  ;;  %v5712_v16 = vld [vmem:[#allocation87_spill] sm:$0xff]  ;;  %v5729_v3 = vld [vmem:[#allocation18_spill] sm:$0xff] }
 0x2ca   : > { %v4961_v60 = vpop.permute.xlu1 %2122  ;;  %v4963_v19 = vpop.permute.xlu0 %1992  ;;  %5708 = vst [vmem:[#allocation92_spill] sm:$0xff] %v4971_v13  ;;  %5709 = vst [vmem:[#allocation41_spill] sm:$0xff] %v4978_v55  ;;  %v4990_v15 = vsel %vm1142_vm10, 1.0, %v5548_v7  ;;  %vm1143_vm14 = vcmp.ge.f32.partialorder %v5712_v16, %v4033_v18  ;;  %vm1158_vm15 = vcmp.ge.f32.partialorder %v5713_v26, %v4104_v50  ;;  %v2285_v10 = vadd.f32 %v2284_v28, %v2158_v8  ;;  %v5717_v26 = vld [vmem:[#allocation139_spill] sm:$0xff] }
 0x2cb   : > { %5706 = vst [vmem:[#allocation33_spill] sm:$0xff] %v4961_v60  ;;  %5707 = vst [vmem:[#allocation52_spill] sm:$0xff] %v4963_v19  ;;  %v2306_v36 = vadd.f32 %v2305_v9, %v2174_v29  ;;  %v1515_v4 = vadd.f32 %v4957_v25, %v1514_v2  ;;  %v1536_v48 = vadd.f32 %v4971_v13, %v1535_v63  ;;  %v5002_v46 = vsel %vm1112_vm12, 1.0, %v5548_v7  ;;  %v5718_v9 = vld [vmem:[#allocation129_spill] sm:$0xff]  ;;  %v5719_v29 = vld [vmem:[#allocation75_spill] sm:$0xff] }
 0x2cc   : > { %5710 = vst [vmem:[#allocation32_spill] sm:$0xff] %v4984_v20  ;;  %5711 = vst [vmem:[#allocation40_spill] sm:$0xff] %v4990_v15  ;;  %v5008_v45 = vsel %vm1128_vm13, 1.0, %v5548_v7  ;;  %v2159_v8 = vmul.f32 %v5717_v26, %v5716_v59  ;;  %v2175_v2 = vmul.f32 %v5719_v29, %v5718_v9  ;;  %v1576_v11 = vadd.f32 %v4978_v55, %v1575_v42  ;;  %v5721_v13 = vld [vmem:[#allocation86_spill] sm:$0xff]  ;;  %v5725_v26 = vld [vmem:[#allocation116_spill] sm:$0xff] }
 0x2cd   : > { %5714 = vst [vmem:[#allocation76_spill] sm:$0xff] %v5002_v46  ;;  %5715 = vst [vmem:[#allocation35_spill] sm:$0xff] %v5008_v45  ;;  %v1556_v30 = vadd.f32 %v4990_v15, %v1555_v12  ;;  %vm1144_vm0 = vcmp.ge.f32.partialorder %v5721_v13, %v4033_v18  ;;  %vm1159_vm1 = vcmp.ge.f32.partialorder %v5722_v6, %v4104_v50  ;;  %v5025_v61 = vsel %vm1158_vm15, 1.0, %v5548_v7  ;;  %v5726_v9 = vld [vmem:[#allocation48_spill] sm:$0xff]  ;;  %v5728_v15 = vld [vmem:[#allocation22_spill] sm:$0xff] }
 0x2ce   : > { %v5014_v28 = vpop.permute.xlu1 %1929  ;;  %v5016_v63 = vpop.permute.xlu0 %1799  ;;  %5723 = vst [vmem:[#allocation65_spill] sm:$0xff] %v5025_v61  ;;  %v5031_v59 = vsel %vm1143_vm14, 1.0, %v5548_v7  ;;  %v2160_v42 = vmul.f32 %v5726_v9, %v5725_v26  ;;  %v2286_v29 = vadd.f32 %v2285_v10, %v2159_v8  ;;  %v5727_v12 = vld [vmem:[#allocation132_spill] sm:$0xff]  ;;  %v2307_v55 = vadd.f32 %v2306_v36, %v2175_v2  ;;  %v5735_v6 = vld [vmem:[#allocation19_spill] sm:$0xff] }
 0x2cf   : > { %5720 = vst [vmem:[#allocation34_spill] sm:$0xff] %v5014_v28  ;;  %5724 = vst [vmem:[#allocation91_spill] sm:$0xff] %v5031_v59  ;;  %v2176_v35 = vmul.f32 %v5728_v15, %v5727_v12  ;;  %v1432_v25 = vadd.f32 %v4504_v22, %v5729_v3  ;;  %v1495_v31 = vadd.f32 %v4984_v20, %v1494_v41  ;;  %v1454_v19 = vrot.slane %v4507_v21, 4  ;;  %v5734_v12 = vld [vmem:[#allocation115_spill] sm:$0xff] }
 0x2d0   : > { %v1516_v56 = vadd.f32 %v5002_v46, %v1515_v4  ;;  %v1577_v26 = vadd.f32 %v5025_v61, %v1576_v11  ;;  %v1557_v10 = vadd.f32 %v5031_v59, %v1556_v30  ;;  %v1475_v15 = vrot.slane %v4609_v38, 4  ;;  %v5733_v4 = vld [vmem:[#allocation101_spill] sm:$0xff]  ;;  %v5736_v61 = vld [vmem:[#allocation131_spill] sm:$0xff] }
 0x2d1   : > { %v5053_v3 = vsel %vm1159_vm1, 1.0, %v5548_v7  ;;  %v1537_v41 = vadd.f32 %v5008_v45, %v1536_v48  ;;  %v5060_v36 = vsel %vm1144_vm0, 1.0, %v5548_v7  ;;  %vm1160_vm2 = vcmp.ge.f32.partialorder %v5733_v4, %v4104_v50  ;;  %v5737_v46 = vld [vmem:[#allocation61_spill] sm:$0xff] }
 0x2d2   : > { %v5042_v16 = vpop.permute.xlu1 %1866  ;;  %v5044_v60 = vpop.permute.xlu0 %2059  ;;  %5731 = vst [vmem:[#allocation42_spill] sm:$0xff] %v5053_v3  ;;  %5732 = vst [vmem:[#allocation51_spill] sm:$0xff] %v5060_v36  ;;  %v2287_v8 = vadd.f32 %v2286_v29, %v2160_v42  ;;  %v2308_v2 = vadd.f32 %v2307_v55, %v2176_v35  ;;  %v1433_v11 = vrot.slane %v1432_v25, 4  ;;  %v1496_v30 = vrot.slane %v1495_v31, 4  ;;  %v5741_v29 = vld [vmem:[#allocation118_spill] sm:$0xff]  ;;  %v5742_v4 = vld [vmem:[#allocation37_spill] sm:$0xff] }
 0x2d3   : > { %5730 = vst [vmem:[#allocation43_spill] sm:$0xff] %v5044_v60  ;;  %v1517_v9 = vrot.slane %v1516_v56, 4  ;;  %v2161_v59 = vmul.f32 %v5735_v6, %v5734_v12  ;;  %v2177_v48 = vmul.f32 %v5737_v46, %v5736_v61  ;;  %v1578_v18 = vadd.f32 %v5053_v3, %v1577_v26  ;;  %v5743_v61 = vld [vmem:[#allocation134_spill] sm:$0xff] }
 0x2d4   : > { %v1558_v13 = vadd.f32 %v5060_v36, %v1557_v10  ;;  %v1455_v50 = vadd.f32 %v1454_v19, %v4507_v21  ;;  %v1476_v35 = vadd.f32 %v1475_v15, %v4609_v38  ;;  %v1538_v55 = vrot.slane %v1537_v41, 4 }
 0x2d5   : > { %v5077_v42 = vsel %vm1160_vm2, 1.0, %v5548_v7  ;;  %v2162_v12 = vmul.f32 %v5742_v4, %v5741_v29  ;;  %v2288_v46 = vadd.f32 %v2287_v8, %v2161_v59  ;;  %v2178_v6 = vmul.f32 %v4395_v58, %v5743_v61  ;;  %v5745_v58 = vld [vmem:[#allocation117_spill] sm:$0xff] }
 0x2d6   : > { %v5068_v45 = vpop.permute.xlu1 %2126  ;;  %v5070_v60 = vpop.permute.xlu0 %1996  ;;  %5740 = vst [vmem:[#allocation79_spill] sm:$0xff] %v5077_v42  ;;  %v1497_v26 = vadd.f32 %v1496_v30, %v1495_v31  ;;  %v1518_v3 = vadd.f32 %v1517_v9, %v1516_v56  ;;  %v1579_v38 = vadd.f32 %v5077_v42, %v1578_v18  ;;  %v1559_v19 = vrot.slane %v1558_v13, 4  ;;  %v5746_v31 = vld [vmem:[#allocation133_spill] sm:$0xff] }
 0x2d7   : > { %5738 = vst [vmem:[#allocation45_spill] sm:$0xff] %v5068_v45  ;;  %5739 = vst [vmem:[#allocation54_spill] sm:$0xff] %v5070_v60  ;;  %v2309_v60 = vadd.f32 %v2308_v2, %v2177_v48  ;;  %v1434_v45 = vadd.f32 %v1433_v11, %v1432_v25  ;;  %v1456_v7 = vrot.slane %v1455_v50, 2  ;;  %v2289_v15 = vadd.f32 %v2288_v46, %v2162_v12 }
 0x2d8   : > { %v1477_v20 = vrot.slane %v1476_v35, 2  ;;  %v1539_v29 = vadd.f32 %v1538_v55, %v1537_v41  ;;  %v1498_v8 = vrot.slane %v1497_v26, 2  ;;  %v1519_v4 = vrot.slane %v1518_v3, 2 }
 0x2d9   : > { %v2310_v36 = vadd.f32 %v2309_v60, %v2178_v6  ;;  %v1435_v59 = vrot.slane %v1434_v45, 2  ;;  %v2163_v25 = vmul.f32 %v4504_v22, %v5745_v58  ;;  %v2179_v56 = vmul.f32 %v4465_v53, %v5746_v31 }
 0x2da   : > { %v5083_v10 = vpop.permute.xlu1 %1933  ;;  %v5085_v21 = vpop.permute.xlu0 %1803  ;;  %v1580_v30 = vrot.slane %v1579_v38, 4  ;;  %v1560_v9 = vadd.f32 %v1559_v19, %v1558_v13  ;;  %v1457_v48 = vadd.f32 %v1456_v7, %v1455_v50  ;;  %v1478_v12 = vadd.f32 %v1477_v20, %v1476_v35 }
 0x2db   : > { %5744 = vst [vmem:[#allocation44_spill] sm:$0xff] %v5083_v10  ;;  %v2290_v18 = vadd.f32 %v2289_v15, %v2163_v25  ;;  %v2311_v60 = vadd.f32 %v2310_v36, %v2179_v56  ;;  %v1540_v41 = vrot.slane %v1539_v29, 2  ;;  %v1436_v55 = vadd.f32 %v1435_v59, %v1434_v45 }
 0x2dc   : > { %v1499_v46 = vadd.f32 %v1498_v8, %v1497_v26  ;;  %v1520_v22 = vadd.f32 %v1519_v4, %v1518_v3  ;;  %v1581_v58 = vadd.f32 %v1580_v30, %v1579_v38  ;;  %v1561_v53 = vrot.slane %v1560_v9, 2 }
 0x2dd   : > { %v1458_v31 = vrot.slane %v1457_v48, 1  ;;  %v2291_v42 = vrot.slane %v2290_v18, 4  ;;  %v2312_v10 = vrot.slane %v2311_v60, 4  ;;  %v1541_v28 = vadd.f32 %v1540_v41, %v1539_v29 }
 0x2de   : > { %v5092_v2 = vpop.permute.xlu1 %1870  ;;  %v5094_v11 = vpop.permute.xlu0 %2063  ;;  %v1437_v13 = vrot.slane %v1436_v55, 1  ;;  %v1500_v50 = vrot.slane %v1499_v46, 1  ;;  %v1521_v36 = vrot.slane %v1520_v22, 1  ;;  %v1582_v45 = vrot.slane %v1581_v58, 2 }
 0x2df   : > { %5747 = vst [vmem:[#allocation64_spill] sm:$0xff] %v5094_v11  ;;  %v1479_v11 = vrot.slane %v1478_v12, 1  ;;  %v1562_v35 = vadd.f32 %v1561_v53, %v1560_v9  ;;  %v1459_v26 = vadd.f32 %v1458_v31, %v1457_v48  ;;  %vm1594_vm3 = vcmask 1041409   ;;  %v5750_v53 = vld [vmem:[#allocation25_spill] sm:$0xff] }
 0x2e0   : > { %vm1596_vm4 = vcmask 1042434   ;;  %v2292_v7 = vadd.f32 %v2291_v42, %v2290_v18  ;;  %v2313_v3 = vadd.f32 %v2312_v10, %v2311_v60  ;;  %v1542_v15 = vrot.slane %v1541_v28, 1 }
 0x2e1   : > { %v1480_v38 = vadd.f32 %v1479_v11, %v1478_v12  ;;  %v1438_v59 = vadd.f32 %v1437_v13, %v1436_v55  ;;  %v2191_v8 = vmul.f32 %v4443_v23, %v4878_v33  ;;  %vm1598_vm5 = vcmask 1043459   ;;  %v5748_v12 = vld [vmem:[#allocation50_spill] sm:$0xff]  ;;  %v5749_v55 = vld [vmem:[#allocation21_spill] sm:$0xff] }
 0x2e2   : > { %v5096_v61 = vpop.permute.xlu1 %2130  ;;  %v5098_v6 = vpop.permute.xlu0 %2000  ;;  %v1501_v29 = vadd.f32 %v1500_v50, %v1499_v46  ;;  %vm1600_vm6 = vcmask 1044484   ;;  %v1522_v56 = vadd.f32 %v1521_v36, %v1520_v22  ;;  %v1583_v30 = vadd.f32 %v1582_v45, %v1581_v58 }
 0x2e3   : > { %v1563_v9 = vrot.slane %v1562_v35, 1  ;;  %v2206_v48 = vmul.f32 %v4574_v32, %v4791_v1  ;;  %v2192_v42 = vmul.f32 %v4477_v14, %v5016_v63  ;;  %v1595_v10 = vsel %vm1594_vm3, %v1459_v26, %v1438_v59  ;;  %v5753_v59 = vld [vmem:[#allocation29_spill] sm:$0xff] }
 0x2e4   : > { %vm1602_vm8 = vcmask 1045509   ;;  %v2293_v11 = vrot.slane %v2292_v7, 2  ;;  %v2314_v23 = vrot.slane %v2313_v3, 2  ;;  %v1597_v33 = vsel %vm1596_vm4, %v1480_v38, %v1595_v10  ;;  %v5751_v38 = vld [vmem:[#allocation90_spill] sm:$0xff] }
 0x2e5   : > { %v1543_v18 = vadd.f32 %v1542_v15, %v1541_v28  ;;  %v2328_v60 = vadd.f32 %v4786_v39, %v2191_v8  ;;  %v2207_v41 = vmul.f32 %v5748_v12, %v4926_v34  ;;  %v2193_v46 = vmul.f32 %v5749_v55, %v5085_v21 }
 0x2e6   : > { %v5100_v19 = vpop.permute.xlu1 %1937  ;;  %v1808_v20 = vpop.permute.xlu0 %1807  ;;  %v1599_v32 = vsel %vm1598_vm5, %v1501_v29, %v1597_v33  ;;  %v1584_v22 = vrot.slane %v1583_v30, 1  ;;  %v1564_v58 = vadd.f32 %v1563_v9, %v1562_v35  ;;  %vm1604_vm9 = vcmask 1046534  }
 0x2e7   : > { %v1601_v63 = vsel %vm1600_vm6, %v1522_v56, %v1599_v32  ;;  %v2348_v28 = vadd.f32 %v4719_v37, %v2206_v48  ;;  %v2329_v39 = vadd.f32 %v2328_v60, %v2192_v42  ;;  %v2208_v34 = vmul.f32 %v4630_v47, %v5042_v16  ;;  %v5756_v48 = vld [vmem:[#allocation33_spill] sm:$0xff]  ;;  %v5757_v42 = vld [vmem:[#allocation27_spill] sm:$0xff] }
 0x2e8   : > { %v2194_v31 = vmul.f32 %v5750_v53, %v1808_v20  ;;  %v5127_v21 = vadd.f32 %v2293_v11, %v2292_v7  ;;  %v5129_v13 = vadd.f32 %v2314_v23, %v2313_v3  ;;  %v2252_v50 = vmul.f32 %v4776_v51, %v4793_v52  ;;  %v5758_v11 = vld [vmem:[#allocation52_spill] sm:$0xff]  ;;  %v5763_v32 = vld [vmem:[#allocation43_spill] sm:$0xff] }
 0x2e9   : > { %v1603_v36 = vsel %vm1602_vm8, %v1543_v18, %v1601_v63  ;;  %v2268_v45 = vmul.f32 %v4808_v54, %v4840_v43  ;;  %v2349_v35 = vadd.f32 %v2348_v28, %v2207_v41  ;;  %v2330_v37 = vadd.f32 %v2329_v39, %v2193_v46  ;;  %v5759_v23 = vld [vmem:[#allocation28_spill] sm:$0xff]  ;;  %v5764_v63 = vld [vmem:[#allocation31_spill] sm:$0xff]  ;;  %v5766_v28 = vld [vmem:[#allocation77_spill] sm:$0xff] }
 0x2ea   : > { %v1875_v4 = vpop.permute.xlu1 %1874  ;;  %v5104_v25 = vpop.permute.xlu0 %2067  ;;  %v2209_v26 = vmul.f32 %v4677_v17, %v5092_v2  ;;  %v2237_v47 = vmul.f32 %v4747_v40, %v4843_v49  ;;  %v2222_v16 = vmul.f32 %v4694_v5, %v4876_v27  ;;  %v5142_v3 = vadd.f32 %v1584_v22, %v1583_v30  ;;  %v5752_v2 = vld [vmem:[#allocation34_spill] sm:$0xff]  ;;  %v5754_v30 = vld [vmem:[#allocation36_spill] sm:$0xff]  ;;  %v5768_v53 = vld [vmem:[#allocation63_spill] sm:$0xff] }
 0x2eb   : > { %v5145_v51 = vsel %vm1604_vm9, %v1564_v58, %v1603_v36  ;;  %v2350_v52 = vadd.f32 %v2349_v35, %v2208_v34  ;;  %v2331_v54 = vadd.f32 %v2330_v37, %v2194_v31  ;;  %v2210_v43 = vmul.f32 %v4872_v24, %v1875_v4  ;;  %v5755_v4 = vld [vmem:[#allocation74_spill] sm:$0xff]  ;;  %v5762_v41 = vld [vmem:[#allocation32_spill] sm:$0xff]  ;;  %v5765_v58 = vld [vmem:[#allocation45_spill] sm:$0xff] }
 0x2ec   : > { %v2295_v17 = vrot.slane %v5127_v21, 1  ;;  %v2316_v40 = vrot.slane %v5129_v13, 1  ;;  %v2409_v49 = vadd.f32 %v4721_v44, %v2252_v50  ;;  %v2253_v5 = vmul.f32 %v4814_v62, %v4928_v0  ;;  %v5760_v62 = vld [vmem:[#allocation44_spill] sm:$0xff]  ;;  %v5761_v0 = vld [vmem:[#allocation89_spill] sm:$0xff]  ;;  %v5767_v34 = vld [vmem:[#allocation54_spill] sm:$0xff] }
 0x2ed   : > { %v2430_v27 = vadd.f32 %v4757_v57, %v2268_v45  ;;  %v2223_v8 = vmul.f32 %v5753_v59, %v5752_v2  ;;  %v2351_v29 = vadd.f32 %v2350_v52, %v2209_v26  ;;  %v2389_v24 = vadd.f32 %v5754_v30, %v2237_v47  ;;  %v5769_v36 = vld [vmem:[#allocation39_spill] sm:$0xff] }
 0x2ee   : > { %v5118_v1 = vpop.permute.xlu1 %2134  ;;  %v5120_v14 = vpop.permute.xlu0 %2004  ;;  %v2369_v9 = vadd.f32 %v5755_v4, %v2222_v16  ;;  %v2269_v10 = vmul.f32 %v5757_v42, %v5756_v48  ;;  %v2238_v44 = vmul.f32 %v5759_v23, %v5758_v11  ;;  %v2224_v57 = vmul.f32 %v5761_v0, %v5760_v62  ;;  %v5770_v16 = vld [vmem:[#allocation64_spill] sm:$0xff]  ;;  %v5775_v4 = vld [vmem:[#allocation62_spill] sm:$0xff]  ;;  %v5776_v11 = vld [vmem:[#allocation41_spill] sm:$0xff] }
 0x2ef   : > { %v2352_v60 = vadd.f32 %v2351_v29, %v2210_v43  ;;  %v2410_v46 = vadd.f32 %v2409_v49, %v2253_v5  ;;  %v2254_v22 = vmul.f32 %v5764_v63, %v5763_v32  ;;  %v2270_v39 = vmul.f32 %v5766_v28, %v5765_v58  ;;  %v5773_v5 = vld [vmem:[#allocation26_spill] sm:$0xff]  ;;  %v5781_v63 = vld [vmem:[#allocation92_spill] sm:$0xff] }
 0x2f0   : > { %v2239_v31 = vmul.f32 %v5768_v53, %v5767_v34  ;;  %v2370_v50 = vadd.f32 %v2369_v9, %v2223_v8  ;;  %v2225_v45 = vmul.f32 %v5769_v36, %v5100_v19  ;;  %v2431_v26 = vadd.f32 %v2430_v27, %v2269_v10  ;;  %v5774_v27 = vld [vmem:[#allocation49_spill] sm:$0xff] }
 0x2f1   : > { %v2390_v47 = vadd.f32 %v2389_v24, %v2238_v44  ;;  %vm1606_vm10 = vcmask 1047559   ;;  %v2411_v29 = vadd.f32 %v2410_v46, %v2254_v22  ;;  %v2240_v30 = vmul.f32 %v5774_v27, %v5098_v6  ;;  %v5778_v6 = vld [vmem:[#allocation76_spill] sm:$0xff]  ;;  %v5780_v46 = vld [vmem:[#allocation65_spill] sm:$0xff]  ;;  %v5786_v27 = vld [vmem:[#allocation51_spill] sm:$0xff] }
 0x2f2   : > { %v1942_v20 = vpop.permute.xlu1 %1941  ;;  %v1812_v7 = vpop.permute.xlu0 %1811  ;;  %v2371_v49 = vadd.f32 %v2370_v50, %v2224_v57  ;;  %v2432_v19 = vadd.f32 %v2431_v26, %v2270_v39  ;;  %v2256_v9 = vmul.f32 %v5775_v4, %v5104_v25  ;;  %v2272_v23 = vmul.f32 %v5776_v11, %v5118_v1  ;;  %v5783_v26 = vld [vmem:[#allocation42_spill] sm:$0xff] }
 0x2f3   : > { %v2195_v15 = vmul.f32 %v5751_v38, %v1812_v7  ;;  %v5771_v7 = vld [vmem:[#allocation30_spill] sm:$0xff]  ;;  %v2226_v2 = vmul.f32 %v5773_v5, %v1942_v20  ;;  %v5777_v20 = vld [vmem:[#allocation20_spill] sm:$0xff]  ;;  %v2317_v58 = vadd.f32 %v2316_v40, %v5129_v13 }
 0x2f4   : > { %v2255_v52 = vmul.f32 %v5771_v7, %v5770_v16  ;;  %v2372_v24 = vadd.f32 %v2371_v49, %v2225_v45  ;;  %v2241_v44 = vmul.f32 %v5777_v20, %v5120_v14  ;;  %v5784_v7 = vld [vmem:[#allocation35_spill] sm:$0xff] }
 0x2f5   : > { %v2332_v56 = vadd.f32 %v2331_v54, %v2195_v15  ;;  %v5772_v54 = vld [vmem:[#allocation38_spill] sm:$0xff] }
 0x2f6   : > { %v1879_v33 = vpop.permute.xlu1 %1878  ;;  %v2072_v18 = vpop.permute.xlu0 %2071  ;;  %v2271_v43 = vmul.f32 %v5772_v54, %v5096_v61  ;;  %v2412_v42 = vadd.f32 %v2411_v29, %v2255_v52  ;;  %v2373_v0 = vadd.f32 %v2372_v24, %v2226_v2 }
 0x2f7   : > { %v2333_v12 = vrot.slane %v2332_v56, 4  ;;  %v2211_v55 = vmul.f32 %v5762_v41, %v1879_v33 }
 0x2f8   : > { %v2433_v10 = vadd.f32 %v2432_v19, %v2271_v43  ;;  %v2413_v1 = vadd.f32 %v2412_v42, %v2256_v9  ;;  %v5785_v19 = vld [vmem:[#allocation79_spill] sm:$0xff] }
 0x2f9   : > { %v2334_v35 = vadd.f32 %v2333_v12, %v2332_v56  ;;  %v2353_v37 = vadd.f32 %v2352_v60, %v2211_v55  ;;  %v2391_v56 = vadd.f32 %v2390_v47, %v2239_v31  ;;  %v5779_v55 = vld [vmem:[#allocation40_spill] sm:$0xff]  ;;  %v5782_v31 = vld [vmem:[#allocation91_spill] sm:$0xff] }
 0x2fa   : > { %v2139_v38 = vpop.permute.xlu1 %2138  ;;  %v2009_v15 = vpop.permute.xlu0 %2008  ;;  %v2257_v25 = vmul.f32 %v5779_v55, %v2072_v18  ;;  %v2434_v14 = vadd.f32 %v2433_v10, %v2272_v23  ;;  %v2296_v18 = vadd.f32 %v2295_v17, %v5127_v21 }
 0x2fb   : > { %v2335_v59 = vrot.slane %v2334_v35, 2  ;;  %v2354_v8 = vrot.slane %v2353_v37, 4  ;;  %v2392_v41 = vadd.f32 %v2391_v56, %v2240_v30  ;;  %v2273_v32 = vmul.f32 %v5780_v46, %v2139_v38 }
 0x2fc   : > { %v2242_v22 = vmul.f32 %v5781_v63, %v2009_v15  ;;  %v2414_v16 = vadd.f32 %v2413_v1, %v2257_v25  ;;  %v2452_v54 = vsel %vm1594_vm3, %v2317_v58, %v2296_v18  ;;  %v1607_v15 = vsel %vm1606_vm10, %v5142_v3, %v5145_v51 }
 0x2fd   : > { %v2336_v48 = vadd.f32 %v2335_v59, %v2334_v35  ;;  %v2355_v61 = vadd.f32 %v2354_v8, %v2353_v37  ;;  %v2393_v34 = vadd.f32 %v2392_v41, %v2241_v44  ;;  %v2435_v13 = vadd.f32 %v2434_v14, %v2273_v32 }
 0x2fe   : > { %v2076_v33 = vpop.permute.xlu1 %2075  ;;  %v1946_v62 = vpop.permute.xlu0 %1945  ;;  %v2468_v3 = vmax.f32 %v1607_v15, 1.0 }
 0x2ff   : > { %v2337_v57 = vrot.slane %v2336_v48, 1  ;;  %v2356_v60 = vrot.slane %v2355_v61, 2  ;;  %v2227_v12 = vmul.f32 %v5778_v6, %v1946_v62  ;;  %v2258_v50 = vmul.f32 %v5782_v31, %v2076_v33 }
 0x300   : > { %v2394_v40 = vadd.f32 %v2393_v34, %v2242_v22  ;;  %2892 = vrcp.f32 %v2468_v3  ;;  %v2478_v34 = vld [vmem:[#allocation5] sm:$0xff] }
 0x301   : > { %v2357_v28 = vadd.f32 %v2356_v60, %v2355_v61  ;;  %v2374_v39 = vadd.f32 %v2373_v0, %v2227_v12  ;;  %v2338_v53 = vadd.f32 %v2337_v57, %v2336_v48  ;;  %v2415_v21 = vadd.f32 %v2414_v16, %v2258_v50 }
 0x302   : > { %v2143_v36 = vpop.permute.xlu1 %2142  ;;  %v2013_v45 = vpop.permute.xlu0 %2012 }
 0x303   : > { %v2358_v35 = vrot.slane %v2357_v28, 1  ;;  %v2375_v37 = vrot.slane %v2374_v39, 4  ;;  %v2274_v47 = vmul.f32 %v5783_v26, %v2143_v36  ;;  %v2243_v52 = vmul.f32 %v5784_v7, %v2013_v45  ;;  %v2471_v45 = vld [vmem:[#allocation4] sm:$0xff] }
 0x304   : > { %v2453_v49 = vsel %vm1596_vm4, %v2338_v53, %v2452_v54 }
 0x305   : > { %v2359_v43 = vadd.f32 %v2358_v35, %v2357_v28  ;;  %v2376_v38 = vadd.f32 %v2375_v37, %v2374_v39  ;;  %v2436_v17 = vadd.f32 %v2435_v13, %v2274_v47  ;;  %v2395_v5 = vadd.f32 %v2394_v40, %v2243_v52  ;;  %v5787_v39 = vld [vmem:[#allocation24_spill] sm:$0xff] }
 0x306   : > { %v2147_v2 = vpop.permute.xlu1 %2146  ;;  %v2080_v59 = vpop.permute.xlu0 %2079 }
 0x307   : > { %v2454_v8 = vsel %vm1598_vm5, %v2359_v43, %v2453_v49  ;;  %v2377_v29 = vrot.slane %v2376_v38, 2  ;;  %v2275_v56 = vmul.f32 %v5785_v19, %v2147_v2  ;;  %v2259_v30 = vmul.f32 %v5786_v27, %v2080_v59 }
 0x308   : > { %v2396_v24 = vrot.slane %v2395_v5, 4 }
 0x309   : > { %v2378_v4 = vadd.f32 %v2377_v29, %v2376_v38  ;;  %v2437_v9 = vadd.f32 %v2436_v17, %v2275_v56  ;;  %v2416_v48 = vadd.f32 %v2415_v21, %v2259_v30 }
 0x30a   : > { %v2397_v61 = vadd.f32 %v2396_v24, %v2395_v5  ;;  %v2893_v58 = vpop.eup %2892 }
 0x30b   : > { %v2379_v51 = vrot.slane %v2378_v4, 1  ;;  %v2438_v42 = vrot.slane %v2437_v9, 4  ;;  %v2417_v10 = vrot.slane %v2416_v48, 4 }
 0x30c   : > { %v2398_v11 = vrot.slane %v2397_v61, 2 }
 0x30d   : > { %v2380_v23 = vadd.f32 %v2379_v51, %v2378_v4  ;;  %v2439_v20 = vadd.f32 %v2438_v42, %v2437_v9  ;;  %v2418_v44 = vadd.f32 %v2417_v10, %v2416_v48 }
 0x30e   : > { %v2399_v33 = vadd.f32 %v2398_v11, %v2397_v61 }
 0x30f   : > { %v2440_v62 = vrot.slane %v2439_v20, 2  ;;  %v2419_v0 = vrot.slane %v2418_v44, 2  ;;  %v2455_v57 = vsel %vm1600_vm6, %v2380_v23, %v2454_v8 }
 0x310   : > { %v2400_v60 = vrot.slane %v2399_v33, 1 }
 0x311   : > { %v2441_v6 = vadd.f32 %v2440_v62, %v2439_v20  ;;  %v2420_v12 = vadd.f32 %v2419_v0, %v2418_v44 }
 0x312   : > { %v2401_v41 = vadd.f32 %v2400_v60, %v2399_v33 }
 0x313   : > { %v2442_v55 = vrot.slane %v2441_v6, 1  ;;  %v2421_v25 = vrot.slane %v2420_v12, 1 }
 0x314   : > { %v2456_v46 = vsel %vm1602_vm8, %v2401_v41, %v2455_v57 }
 0x315   : > { %v2443_v32 = vadd.f32 %v2442_v55, %v2441_v6  ;;  %v2422_v63 = vadd.f32 %v2421_v25, %v2420_v12 }
 0x317   : > { %v2457_v22 = vsel %vm1604_vm9, %v2422_v63, %v2456_v46 }
 0x318   : > { %v2458_v1 = vsel %vm1606_vm10, %v2443_v32, %v2457_v22 }
 0x319   : > { %v2470_v28 = vmul.f32 %v2893_v58, %v2458_v1 }
 0x31b   : > { %v2472_v14 = vmul.f32 %v2470_v28, %v5787_v39 }
 0x31d   : > { %2473 = vadd.xlane.f32.xlu1 %v2472_v14 }
 0x340   : > { %v2480_v53 = vpop.xlane.xlu0 %2479 }
 0x341   : > { %v2481_v31 = vadd.f32 %v2480_v53, %v2478_v34 }
 0x343   : > { %2482 = vst.msk [vmem:[#allocation5] sm:$0xff] %vm396_vm7, %v2481_v31 }
 0x34a   : > { %v2485_v50 = vld [vmem:[#allocation5] sm:$0xff] }
 0x34b   : > { %2492 = vst.msk [vmem:[%s389_s25] sm:$0xff] %vm396_vm7, %v2485_v50  ;;  %v2487_v36 = vmax.f32 %v2485_v50, 1.0 }
 0x34d   : > { %2894 = vrcp.f32 %v2487_v36 }
 0x357   : > { %v2895_v37 = vpop.eup %2894 }
 0x3aa   : > { %v2474_v18 = vpop.xlane.xlu1 %2473 }
 0x3ab   : > { %v2475_v35 = vadd.f32 %v2474_v18, %v2471_v45 }
 0x3ad   : > { %2477 = vst.msk [vmem:[#allocation4] sm:$0xff] %vm396_vm7, %v2475_v35 }
 0x3b4   : > { %v2486_v26 = vld [vmem:[#allocation4] sm:$0xff] }
 0x3b5   : > { %v2489_v47 = vmul.f32 %v2895_v37, %v2486_v26 }
 0x3b7   : > { %2491 = vst.msk [vmem:[%s385_s7] sm:$0xff] %vm396_vm7, %v2489_v47 }
 0x3b8 PF: > { %s25_s23 = sadd.s32 1, %s3074_s23   ;;  %s5788_s12 = sld [smem:[#allocation16_spill]] }
 0x3b9   : > { %p22_p3 = scmp.ge.s32.totalorder %s25_s23, 7   ;;  %s5789_s18 = smov %s3058_s19 }
 0x3ba   : > { %s5790_s19 = smov %s3062_s20  ;;  %s5791_s20 = smov %s3159_s29 }
 0x3bb   : > { %s5792_s21 = smov %s3070_s22  ;;  %24 = sbr.rel (!%p22_p3) target bundleno = 10 (0xa), region = 141 }
 0x3be   : > { %s5793_s22 = smov %s5788_s12 }
 0x3c2   :  { %2526 = vsyncpa [#allocation7], 1 }
 0x3c3   :  { %2528 = vsyncpa [#allocation7 + $0x1], 1 }
 0x3c4   :  { %2529 = vsyncpa [#allocation9], 1 }
 0x3c5   :  { %2531 = vsyncpa [#allocation9 + $0x1], 1 }
 0x3c6   :  { %2532 = vsyncpa [#allocation12], 1 }
 0x3c7   :  { %2534 = vsyncpa [#allocation12 + $0x1], 1 }

</bundles_post_ra>
